<compile_context>
chip_gen: v7x
topology: tpu7x:2x2x1
jax: 0.10.0
libtpu: 0.0.40
codegen_flags: <defaults>
</compile_context>

<pallas_src>
import functools
import numpy as np
import jax
import jax.numpy as jnp
from jax.experimental import pallas as pl
from jax.experimental.pallas import tpu as pltpu


# ----------------------------- configuration --------------------------------
WINDOW_SIZE = (2, 4, 4)          # 3-D window
NUM_HEADS = 4
DIM = 32                         # feature channels
HEAD_DIM = DIM // NUM_HEADS
SCALE = HEAD_DIM ** (-0.5)
N = int(np.prod(WINDOW_SIZE))    # tokens per window = 32
NW = 2                           # number of distinct window masks
B = 8                            # total windows (must be a multiple of NW)


# ------------------- relative position index (host precompute) --------------
def relative_position_index_3d(window_size):
    d, h, w = window_size
    coords = np.stack(np.meshgrid(np.arange(d), np.arange(h), np.arange(w),
                                  indexing="ij"))                 # (3, d, h, w)
    coords_flatten = coords.reshape(3, -1)                        # (3, n)
    rel = coords_flatten[:, :, None] - coords_flatten[:, None, :] # (3, n, n)
    rel = rel.transpose(1, 2, 0).copy()                           # (n, n, 3)
    rel[:, :, 0] += d - 1
    rel[:, :, 1] += h - 1
    rel[:, :, 2] += w - 1
    rel[:, :, 0] *= (2 * h - 1) * (2 * w - 1)
    rel[:, :, 1] *= (2 * w - 1)
    return rel.sum(-1)                                            # (n, n) int


# ------------------------------ Pallas kernel --------------------------------
def window_attention_kernel(x_ref, wqkv_ref, bqkv_ref, wproj_ref, bproj_ref,
                            bm_ref, o_ref, qkv_ref, *, bw, nw, n, dim,
                            head_dim, num_heads, scale):
    # x_ref:     (bw*n, C)    rows of `bw` consecutive windows
    # wqkv_ref:  (C, 3C)      qkv weight (in, out);  bqkv_ref: (1, 3C)
    # wproj_ref: (C, C)       output projection;     bproj_ref:(1, C)
    # bm_ref:    (NW, H, N, N) pre-combined rel-pos bias + window mask
    # o_ref:     (bw*n, C)
    # qkv_ref:   VMEM scratch (bw*n, 3C) float32

    # Batched qkv projection over all windows in this grid step (M = bw*n).
    qkv_ref[...] = (jnp.dot(x_ref[...], wqkv_ref[...],
                            preferred_element_type=jnp.float32)
                    + bqkv_ref[0])

    wproj = wproj_ref[...]
    bproj = bproj_ref[0]

    for w in range(bw):                            # static, unrolled
        r0 = w * n
        qkv_w = qkv_ref[r0:r0 + n, :]              # (n, 3C) for this window
        m = w % nw                                 # static mask id (bw % nw == 0)
        y = jnp.zeros((n, dim), jnp.float32)
        for h in range(num_heads):                 # static, unrolled
            lo = h * head_dim
            q = qkv_w[:, lo:lo + head_dim] * scale
            k = qkv_w[:, dim + lo:dim + lo + head_dim]
            v = qkv_w[:, 2 * dim + lo:2 * dim + lo + head_dim]

            attn = jnp.dot(q, k.T, preferred_element_type=jnp.float32)
            attn = attn + bm_ref[m, h]

            # numerically-stable softmax; reciprocal goes to the EUP slot
            attn = attn - jnp.max(attn, axis=-1, keepdims=True)
            p = jnp.exp(attn)
            p = p * pl.reciprocal(jnp.sum(p, axis=-1, keepdims=True),
                                  approx=True)

            # Fused per-head output projection (no head concat, no separate
            # (n, C) @ (C, C) proj matmul).
            y = y + jnp.dot(jnp.dot(p, v, preferred_element_type=jnp.float32),
                            wproj[lo:lo + head_dim, :],
                            preferred_element_type=jnp.float32)
        o_ref[r0:r0 + n, :] = (y + bproj).astype(o_ref.dtype)


def _windows_per_step(b, n, nw, target_rows=128):
    """Largest multiple of nw dividing b with bw*n <= target_rows (>= nw)."""
    bw = nw
    cand = nw
    while cand <= b:
        if b % cand == 0 and cand * n <= target_rows:
            bw = cand
        cand += nw
    return bw


def window_attention(x, w_qkv, b_qkv, w_proj, b_proj, rel_bias, mask):
    b, n, c = x.shape
    nw = mask.shape[0]
    num_heads = rel_bias.shape[0]
    head_dim = c // num_heads
    assert b % nw == 0, "number of windows must be a multiple of the mask count"
    bw = _windows_per_step(b, n, nw)
    grid = (b // bw,)

    # Pre-combine relative-position bias and window mask: (NW, H, N, N).
    bias_mask = rel_bias[None, :, :, :] + mask[:, None, :, :]

    kernel = functools.partial(
        window_attention_kernel, bw=bw, nw=nw, n=n, dim=c,
        head_dim=head_dim, num_heads=num_heads, scale=head_dim ** (-0.5))

    out = pl.pallas_call(
        kernel,
        out_shape=jax.ShapeDtypeStruct((b * n, c), x.dtype),
        grid=grid,
        in_specs=[
            pl.BlockSpec((bw * n, c), lambda i: (i, 0)),
            pl.BlockSpec((c, 3 * c), lambda i: (0, 0)),
            pl.BlockSpec((1, 3 * c), lambda i: (0, 0)),
            pl.BlockSpec((c, c), lambda i: (0, 0)),
            pl.BlockSpec((1, c), lambda i: (0, 0)),
            pl.BlockSpec((nw, num_heads, n, n), lambda i: (0, 0, 0, 0)),
        ],
        out_specs=pl.BlockSpec((bw * n, c), lambda i: (i, 0)),
        scratch_shapes=[pltpu.VMEM((bw * n, 3 * c), jnp.float32)],
        compiler_params=pltpu.CompilerParams(
            dimension_semantics=("parallel",)),
    )(x.reshape(b * n, c), w_qkv, b_qkv, w_proj, b_proj, bias_mask)
    return out.reshape(b, n, c)


# -------------------------- pure-JAX reference -------------------------------
def reference_forward(x, w_qkv, b_qkv, w_proj, b_proj, rel_bias, mask):
    b, n, c = x.shape
    nw = mask.shape[0]
    qkv = (x @ w_qkv + b_qkv).reshape(b, n, 3, NUM_HEADS, HEAD_DIM)
    qkv = jnp.transpose(qkv, (2, 0, 3, 1, 4))
    q, k, v = qkv[0], qkv[1], qkv[2]
    q = q * SCALE
    attn = jnp.einsum("bhqd,bhkd->bhqk", q, k)
    attn = attn + rel_bias[None]
    attn = attn.reshape(b // nw, nw, NUM_HEADS, n, n) + mask[None, :, None]
    attn = attn.reshape(b, NUM_HEADS, n, n)
    attn = jax.nn.softmax(attn, axis=-1)
    out = jnp.einsum("bhqk,bhkd->bhqd", attn, v)
    out = jnp.transpose(out, (0, 2, 1, 3)).reshape(b, n, c)
    return out @ w_proj + b_proj


# ------------------------------------ main -----------------------------------
if __name__ == "__main__":
    key = jax.random.PRNGKey(0)
    k_x, k_tab, k_wqkv, k_bqkv, k_wproj, k_bproj, k_mask = jax.random.split(key, 7)

    # Parameters (deterministic synthetic init).
    table_size = ((2 * WINDOW_SIZE[0] - 1) *
                  (2 * WINDOW_SIZE[1] - 1) *
                  (2 * WINDOW_SIZE[2] - 1))
    # trunc_normal_(std=0.02) equivalent
    rel_table = 0.02 * jax.random.truncated_normal(
        k_tab, -2.0, 2.0, (table_size, NUM_HEADS), dtype=jnp.float32)

    w_qkv = 0.05 * jax.random.normal(k_wqkv, (DIM, 3 * DIM), dtype=jnp.float32)
    b_qkv = 0.05 * jax.random.normal(k_bqkv, (1, 3 * DIM), dtype=jnp.float32)
    w_proj = 0.05 * jax.random.normal(k_wproj, (DIM, DIM), dtype=jnp.float32)
    b_proj = 0.05 * jax.random.normal(k_bproj, (1, DIM), dtype=jnp.float32)

    # Relative position bias, gathered on host side (glue, not hot path).
    rpi = jnp.asarray(relative_position_index_3d(WINDOW_SIZE))      # (N, N)
    rel_bias = rel_table[rpi.reshape(-1)].reshape(N, N, NUM_HEADS)
    rel_bias = jnp.transpose(rel_bias, (2, 0, 1))                    # (H, N, N)

    # Inputs.
    x = jax.random.normal(k_x, (B, N, DIM), dtype=jnp.float32)
    mask = jax.random.normal(k_mask, (NW, N, N), dtype=jnp.float32)

    out = window_attention(x, w_qkv, b_qkv, w_proj, b_proj, rel_bias, mask)
    out = jax.block_until_ready(out)

    ref = reference_forward(x, w_qkv, b_qkv, w_proj, b_proj, rel_bias, mask)
    # tolerance slightly relaxed vs. 1e-4 because of the approximate (EUP)
    # reciprocal in the softmax normalisation
    np.testing.assert_allclose(np.asarray(out), np.asarray(ref),
                               rtol=2e-3, atol=2e-3)
    print("KERNEL_OK")
</pallas_src>

<mosaic_0001>
module attributes {stable_mosaic.version = 11 : i64} {
  func.func @window_attention_kernel(%arg0: i32, %arg1: memref<128x32xf32, #tpu.memory_space<vmem>>, %arg2: memref<32x96xf32, #tpu.memory_space<vmem>>, %arg3: memref<1x96xf32, #tpu.memory_space<vmem>>, %arg4: memref<32x32xf32, #tpu.memory_space<vmem>>, %arg5: memref<1x32xf32, #tpu.memory_space<vmem>>, %arg6: memref<2x4x32x32xf32, #tpu.memory_space<vmem>>, %arg7: memref<128x32xf32, #tpu.memory_space<vmem>>, %arg8: memref<128x96xf32, #tpu.memory_space<vmem>>) attributes {dimension_semantics = [#tpu.dimension_semantics<parallel>], iteration_bounds = array<i64: 2>, scalar_prefetch = 0 : i64, scratch_operands = 1 : i64, tpu.core_type = #tpu.core_type<tc>, window_params = [{transform_indices = @transform_0, window_bounds = array<i64: 128, 32>}, {pipeline_mode = #tpu.pipeline_mode<synchronous>, transform_indices = @transform_1, window_bounds = array<i64: 32, 96>}, {pipeline_mode = #tpu.pipeline_mode<synchronous>, transform_indices = @transform_2, window_bounds = array<i64: 1, 96>}, {pipeline_mode = #tpu.pipeline_mode<synchronous>, transform_indices = @transform_3, window_bounds = array<i64: 32, 32>}, {pipeline_mode = #tpu.pipeline_mode<synchronous>, transform_indices = @transform_4, window_bounds = array<i64: 1, 32>}, {pipeline_mode = #tpu.pipeline_mode<synchronous>, transform_indices = @transform_5, window_bounds = array<i64: 2, 4, 32, 32>}, {transform_indices = @transform_6, window_bounds = array<i64: 128, 32>}]} {
    %c0 = arith.constant 0 : index
    %c0_0 = arith.constant 0 : index
    %0 = vector.load %arg1[%c0, %c0_0] : memref<128x32xf32, #tpu.memory_space<vmem>>, vector<128x32xf32>
    %c0_1 = arith.constant 0 : index
    %c0_2 = arith.constant 0 : index
    %1 = vector.load %arg2[%c0_1, %c0_2] : memref<32x96xf32, #tpu.memory_space<vmem>>, vector<32x96xf32>
    %cst = arith.constant dense<0.000000e+00> : vector<128x96xf32>
    %2 = tpu.matmul %0, %1, %cst {dimension_numbers = #tpu.dot_dimension_numbers<[1], [0], [0], [1], [0, 0, 1, 1], [], []>} : vector<128x32xf32>, vector<32x96xf32>, vector<128x96xf32> -> vector<128x96xf32>
    %c0_3 = arith.constant 0 : index
    %c0_4 = arith.constant 0 : index
    %3 = vector.load %arg3[%c0_3, %c0_4] : memref<1x96xf32, #tpu.memory_space<vmem>>, vector<1x96xf32>
    %4 = vector.shape_cast %3 : vector<1x96xf32> to vector<96xf32>
    %5 = vector.shape_cast %4 : vector<96xf32> to vector<1x96xf32>
    %6 = vector.broadcast %5 : vector<1x96xf32> to vector<128x96xf32>
    %7 = arith.addf %2, %6 : vector<128x96xf32>
    %c0_5 = arith.constant 0 : index
    %c0_6 = arith.constant 0 : index
    %8 = vector.load %arg8[%c0_5, %c0_6] : memref<128x96xf32, #tpu.memory_space<vmem>>, vector<128x96xf32>
    tpu.vector_store %arg8[%c0_5, %c0_6], %7 {strides = array<i32>} : memref<128x96xf32, #tpu.memory_space<vmem>>, vector<128x96xf32>,
    %c0_7 = arith.constant 0 : index
    %c0_8 = arith.constant 0 : index
    %9 = vector.load %arg4[%c0_7, %c0_8] : memref<32x32xf32, #tpu.memory_space<vmem>>, vector<32x32xf32>
    %c0_9 = arith.constant 0 : index
    %c0_10 = arith.constant 0 : index
    %10 = vector.load %arg5[%c0_9, %c0_10] : memref<1x32xf32, #tpu.memory_space<vmem>>, vector<1x32xf32>
    %11 = vector.shape_cast %10 : vector<1x32xf32> to vector<32xf32>
    %c0_11 = arith.constant 0 : index
    %c0_12 = arith.constant 0 : index
    %12 = vector.load %arg8[%c0_11, %c0_12] : memref<128x96xf32, #tpu.memory_space<vmem>>, vector<32x96xf32>
    %cst_13 = arith.constant 0.000000e+00 : f32
    %13 = vector.broadcast %cst_13 : f32 to vector<32x32xf32>
    %14 = vector.extract_strided_slice %12 {offsets = [0, 0], sizes = [32, 8], strides = [1, 1]} : vector<32x96xf32> to vector<32x8xf32>
    %cst_14 = arith.constant 0.353553385 : f32
    %15 = vector.broadcast %cst_14 : f32 to vector<32x8xf32>
    %16 = arith.mulf %14, %15 : vector<32x8xf32>
    %17 = vector.extract_strided_slice %12 {offsets = [0, 32], sizes = [32, 8], strides = [1, 1]} : vector<32x96xf32> to vector<32x8xf32>
    %18 = vector.extract_strided_slice %12 {offsets = [0, 64], sizes = [32, 8], strides = [1, 1]} : vector<32x96xf32> to vector<32x8xf32>
    %19 = tpu.transpose %17, [1, 0] : vector<32x8xf32> -> vector<8x32xf32>
    %cst_15 = arith.constant dense<0.000000e+00> : vector<32x32xf32>
    %20 = tpu.matmul %16, %19, %cst_15 {dimension_numbers = #tpu.dot_dimension_numbers<[1], [0], [0], [1], [0, 0, 1, 1], [], []>} : vector<32x8xf32>, vector<8x32xf32>, vector<32x32xf32> -> vector<32x32xf32>
    %c0_16 = arith.constant 0 : index
    %c0_17 = arith.constant 0 : index
    %c0_18 = arith.constant 0 : index
    %c0_19 = arith.constant 0 : index
    %21 = vector.load %arg6[%c0_16, %c0_17, %c0_18, %c0_19] : memref<2x4x32x32xf32, #tpu.memory_space<vmem>>, vector<1x1x32x32xf32>
    %22 = vector.shape_cast %21 : vector<1x1x32x32xf32> to vector<32x32xf32>
    %23 = arith.addf %20, %22 : vector<32x32xf32>
    %cst_20 = arith.constant dense<0xFF800000> : vector<32xf32>
    %24 = vector.multi_reduction <maximumf>, %23, %cst_20 [1] : vector<32x32xf32> to vector<32xf32>
    %25 = vector.shape_cast %24 : vector<32xf32> to vector<32x1xf32>
    %26 = vector.broadcast %25 : vector<32x1xf32> to vector<32x32xf32>
    %27 = arith.subf %23, %26 : vector<32x32xf32>
    %28 = math.exp %27 : vector<32x32xf32>
    %cst_21 = arith.constant dense<0.000000e+00> : vector<32xf32>
    %29 = vector.multi_reduction <add>, %28, %cst_21 [1] : vector<32x32xf32> to vector<32xf32>
    %30 = vector.shape_cast %29 : vector<32xf32> to vector<32x1xf32>
    %31 = tpu.reciprocal %30 {approx = true} : vector<32x1xf32> -> vector<32x1xf32>
    %32 = vector.broadcast %31 : vector<32x1xf32> to vector<32x32xf32>
    %33 = arith.mulf %28, %32 : vector<32x32xf32>
    %cst_22 = arith.constant dense<0.000000e+00> : vector<32x8xf32>
    %34 = tpu.matmul %33, %18, %cst_22 {dimension_numbers = #tpu.dot_dimension_numbers<[1], [0], [0], [1], [0, 0, 1, 1], [], []>} : vector<32x32xf32>, vector<32x8xf32>, vector<32x8xf32> -> vector<32x8xf32>
    %35 = vector.extract_strided_slice %9 {offsets = [0, 0], sizes = [8, 32], strides = [1, 1]} : vector<32x32xf32> to vector<8x32xf32>
    %cst_23 = arith.constant dense<0.000000e+00> : vector<32x32xf32>
    %36 = tpu.matmul %34, %35, %cst_23 {dimension_numbers = #tpu.dot_dimension_numbers<[1], [0], [0], [1], [0, 0, 1, 1], [], []>} : vector<32x8xf32>, vector<8x32xf32>, vector<32x32xf32> -> vector<32x32xf32>
    %37 = arith.addf %13, %36 : vector<32x32xf32>
    %38 = vector.extract_strided_slice %12 {offsets = [0, 8], sizes = [32, 8], strides = [1, 1]} : vector<32x96xf32> to vector<32x8xf32>
    %cst_24 = arith.constant 0.353553385 : f32
    %39 = vector.broadcast %cst_24 : f32 to vector<32x8xf32>
    %40 = arith.mulf %38, %39 : vector<32x8xf32>
    %41 = vector.extract_strided_slice %12 {offsets = [0, 40], sizes = [32, 8], strides = [1, 1]} : vector<32x96xf32> to vector<32x8xf32>
    %42 = vector.extract_strided_slice %12 {offsets = [0, 72], sizes = [32, 8], strides = [1, 1]} : vector<32x96xf32> to vector<32x8xf32>
    %43 = tpu.transpose %41, [1, 0] : vector<32x8xf32> -> vector<8x32xf32>
    %cst_25 = arith.constant dense<0.000000e+00> : vector<32x32xf32>
    %44 = tpu.matmul %40, %43, %cst_25 {dimension_numbers = #tpu.dot_dimension_numbers<[1], [0], [0], [1], [0, 0, 1, 1], [], []>} : vector<32x8xf32>, vector<8x32xf32>, vector<32x32xf32> -> vector<32x32xf32>
    %c0_26 = arith.constant 0 : index
    %c1 = arith.constant 1 : index
    %c0_27 = arith.constant 0 : index
    %c0_28 = arith.constant 0 : index
    %45 = vector.load %arg6[%c0_26, %c1, %c0_27, %c0_28] : memref<2x4x32x32xf32, #tpu.memory_space<vmem>>, vector<1x1x32x32xf32>
    %46 = vector.shape_cast %45 : vector<1x1x32x32xf32> to vector<32x32xf32>
    %47 = arith.addf %44, %46 : vector<32x32xf32>
    %cst_29 = arith.constant dense<0xFF800000> : vector<32xf32>
    %48 = vector.multi_reduction <maximumf>, %47, %cst_29 [1] : vector<32x32xf32> to vector<32xf32>
    %49 = vector.shape_cast %48 : vector<32xf32> to vector<32x1xf32>
    %50 = vector.broadcast %49 : vector<32x1xf32> to vector<32x32xf32>
    %51 = arith.subf %47, %50 : vector<32x32xf32>
    %52 = math.exp %51 : vector<32x32xf32>
    %cst_30 = arith.constant dense<0.000000e+00> : vector<32xf32>
    %53 = vector.multi_reduction <add>, %52, %cst_30 [1] : vector<32x32xf32> to vector<32xf32>
    %54 = vector.shape_cast %53 : vector<32xf32> to vector<32x1xf32>
    %55 = tpu.reciprocal %54 {approx = true} : vector<32x1xf32> -> vector<32x1xf32>
    %56 = vector.broadcast %55 : vector<32x1xf32> to vector<32x32xf32>
    %57 = arith.mulf %52, %56 : vector<32x32xf32>
    %cst_31 = arith.constant dense<0.000000e+00> : vector<32x8xf32>
    %58 = tpu.matmul %57, %42, %cst_31 {dimension_numbers = #tpu.dot_dimension_numbers<[1], [0], [0], [1], [0, 0, 1, 1], [], []>} : vector<32x32xf32>, vector<32x8xf32>, vector<32x8xf32> -> vector<32x8xf32>
    %59 = vector.extract_strided_slice %9 {offsets = [8, 0], sizes = [8, 32], strides = [1, 1]} : vector<32x32xf32> to vector<8x32xf32>
    %cst_32 = arith.constant dense<0.000000e+00> : vector<32x32xf32>
    %60 = tpu.matmul %58, %59, %cst_32 {dimension_numbers = #tpu.dot_dimension_numbers<[1], [0], [0], [1], [0, 0, 1, 1], [], []>} : vector<32x8xf32>, vector<8x32xf32>, vector<32x32xf32> -> vector<32x32xf32>
    %61 = arith.addf %37, %60 : vector<32x32xf32>
    %62 = vector.extract_strided_slice %12 {offsets = [0, 16], sizes = [32, 8], strides = [1, 1]} : vector<32x96xf32> to vector<32x8xf32>
    %cst_33 = arith.constant 0.353553385 : f32
    %63 = vector.broadcast %cst_33 : f32 to vector<32x8xf32>
    %64 = arith.mulf %62, %63 : vector<32x8xf32>
    %65 = vector.extract_strided_slice %12 {offsets = [0, 48], sizes = [32, 8], strides = [1, 1]} : vector<32x96xf32> to vector<32x8xf32>
    %66 = vector.extract_strided_slice %12 {offsets = [0, 80], sizes = [32, 8], strides = [1, 1]} : vector<32x96xf32> to vector<32x8xf32>
    %67 = tpu.transpose %65, [1, 0] : vector<32x8xf32> -> vector<8x32xf32>
    %cst_34 = arith.constant dense<0.000000e+00> : vector<32x32xf32>
    %68 = tpu.matmul %64, %67, %cst_34 {dimension_numbers = #tpu.dot_dimension_numbers<[1], [0], [0], [1], [0, 0, 1, 1], [], []>} : vector<32x8xf32>, vector<8x32xf32>, vector<32x32xf32> -> vector<32x32xf32>
    %c0_35 = arith.constant 0 : index
    %c2 = arith.constant 2 : index
    %c0_36 = arith.constant 0 : index
    %c0_37 = arith.constant 0 : index
    %69 = vector.load %arg6[%c0_35, %c2, %c0_36, %c0_37] : memref<2x4x32x32xf32, #tpu.memory_space<vmem>>, vector<1x1x32x32xf32>
    %70 = vector.shape_cast %69 : vector<1x1x32x32xf32> to vector<32x32xf32>
    %71 = arith.addf %68, %70 : vector<32x32xf32>
    %cst_38 = arith.constant dense<0xFF800000> : vector<32xf32>
    %72 = vector.multi_reduction <maximumf>, %71, %cst_38 [1] : vector<32x32xf32> to vector<32xf32>
    %73 = vector.shape_cast %72 : vector<32xf32> to vector<32x1xf32>
    %74 = vector.broadcast %73 : vector<32x1xf32> to vector<32x32xf32>
    %75 = arith.subf %71, %74 : vector<32x32xf32>
    %76 = math.exp %75 : vector<32x32xf32>
    %cst_39 = arith.constant dense<0.000000e+00> : vector<32xf32>
    %77 = vector.multi_reduction <add>, %76, %cst_39 [1] : vector<32x32xf32> to vector<32xf32>
    %78 = vector.shape_cast %77 : vector<32xf32> to vector<32x1xf32>
    %79 = tpu.reciprocal %78 {approx = true} : vector<32x1xf32> -> vector<32x1xf32>
    %80 = vector.broadcast %79 : vector<32x1xf32> to vector<32x32xf32>
    %81 = arith.mulf %76, %80 : vector<32x32xf32>
    %cst_40 = arith.constant dense<0.000000e+00> : vector<32x8xf32>
    %82 = tpu.matmul %81, %66, %cst_40 {dimension_numbers = #tpu.dot_dimension_numbers<[1], [0], [0], [1], [0, 0, 1, 1], [], []>} : vector<32x32xf32>, vector<32x8xf32>, vector<32x8xf32> -> vector<32x8xf32>
    %83 = vector.extract_strided_slice %9 {offsets = [16, 0], sizes = [8, 32], strides = [1, 1]} : vector<32x32xf32> to vector<8x32xf32>
    %cst_41 = arith.constant dense<0.000000e+00> : vector<32x32xf32>
    %84 = tpu.matmul %82, %83, %cst_41 {dimension_numbers = #tpu.dot_dimension_numbers<[1], [0], [0], [1], [0, 0, 1, 1], [], []>} : vector<32x8xf32>, vector<8x32xf32>, vector<32x32xf32> -> vector<32x32xf32>
    %85 = arith.addf %61, %84 : vector<32x32xf32>
    %86 = vector.extract_strided_slice %12 {offsets = [0, 24], sizes = [32, 8], strides = [1, 1]} : vector<32x96xf32> to vector<32x8xf32>
    %cst_42 = arith.constant 0.353553385 : f32
    %87 = vector.broadcast %cst_42 : f32 to vector<32x8xf32>
    %88 = arith.mulf %86, %87 : vector<32x8xf32>
    %89 = vector.extract_strided_slice %12 {offsets = [0, 56], sizes = [32, 8], strides = [1, 1]} : vector<32x96xf32> to vector<32x8xf32>
    %90 = vector.extract_strided_slice %12 {offsets = [0, 88], sizes = [32, 8], strides = [1, 1]} : vector<32x96xf32> to vector<32x8xf32>
    %91 = tpu.transpose %89, [1, 0] : vector<32x8xf32> -> vector<8x32xf32>
    %cst_43 = arith.constant dense<0.000000e+00> : vector<32x32xf32>
    %92 = tpu.matmul %88, %91, %cst_43 {dimension_numbers = #tpu.dot_dimension_numbers<[1], [0], [0], [1], [0, 0, 1, 1], [], []>} : vector<32x8xf32>, vector<8x32xf32>, vector<32x32xf32> -> vector<32x32xf32>
    %c0_44 = arith.constant 0 : index
    %c3 = arith.constant 3 : index
    %c0_45 = arith.constant 0 : index
    %c0_46 = arith.constant 0 : index
    %93 = vector.load %arg6[%c0_44, %c3, %c0_45, %c0_46] : memref<2x4x32x32xf32, #tpu.memory_space<vmem>>, vector<1x1x32x32xf32>
    %94 = vector.shape_cast %93 : vector<1x1x32x32xf32> to vector<32x32xf32>
    %95 = arith.addf %92, %94 : vector<32x32xf32>
    %cst_47 = arith.constant dense<0xFF800000> : vector<32xf32>
    %96 = vector.multi_reduction <maximumf>, %95, %cst_47 [1] : vector<32x32xf32> to vector<32xf32>
    %97 = vector.shape_cast %96 : vector<32xf32> to vector<32x1xf32>
    %98 = vector.broadcast %97 : vector<32x1xf32> to vector<32x32xf32>
    %99 = arith.subf %95, %98 : vector<32x32xf32>
    %100 = math.exp %99 : vector<32x32xf32>
    %cst_48 = arith.constant dense<0.000000e+00> : vector<32xf32>
    %101 = vector.multi_reduction <add>, %100, %cst_48 [1] : vector<32x32xf32> to vector<32xf32>
    %102 = vector.shape_cast %101 : vector<32xf32> to vector<32x1xf32>
    %103 = tpu.reciprocal %102 {approx = true} : vector<32x1xf32> -> vector<32x1xf32>
    %104 = vector.broadcast %103 : vector<32x1xf32> to vector<32x32xf32>
    %105 = arith.mulf %100, %104 : vector<32x32xf32>
    %cst_49 = arith.constant dense<0.000000e+00> : vector<32x8xf32>
    %106 = tpu.matmul %105, %90, %cst_49 {dimension_numbers = #tpu.dot_dimension_numbers<[1], [0], [0], [1], [0, 0, 1, 1], [], []>} : vector<32x32xf32>, vector<32x8xf32>, vector<32x8xf32> -> vector<32x8xf32>
    %107 = vector.extract_strided_slice %9 {offsets = [24, 0], sizes = [8, 32], strides = [1, 1]} : vector<32x32xf32> to vector<8x32xf32>
    %cst_50 = arith.constant dense<0.000000e+00> : vector<32x32xf32>
    %108 = tpu.matmul %106, %107, %cst_50 {dimension_numbers = #tpu.dot_dimension_numbers<[1], [0], [0], [1], [0, 0, 1, 1], [], []>} : vector<32x8xf32>, vector<8x32xf32>, vector<32x32xf32> -> vector<32x32xf32>
    %109 = arith.addf %85, %108 : vector<32x32xf32>
    %110 = vector.shape_cast %11 : vector<32xf32> to vector<1x32xf32>
    %111 = vector.broadcast %110 : vector<1x32xf32> to vector<32x32xf32>
    %112 = arith.addf %109, %111 : vector<32x32xf32>
    %c0_51 = arith.constant 0 : index
    %c0_52 = arith.constant 0 : index
    %113 = vector.load %arg7[%c0_51, %c0_52] : memref<128x32xf32, #tpu.memory_space<vmem>>, vector<32x32xf32>
    tpu.vector_store %arg7[%c0_51, %c0_52], %112 {strides = array<i32>} : memref<128x32xf32, #tpu.memory_space<vmem>>, vector<32x32xf32>,
    %c32 = arith.constant 32 : index
    %c0_53 = arith.constant 0 : index
    %114 = vector.load %arg8[%c32, %c0_53] : memref<128x96xf32, #tpu.memory_space<vmem>>, vector<32x96xf32>
    %cst_54 = arith.constant 0.000000e+00 : f32
    %115 = vector.broadcast %cst_54 : f32 to vector<32x32xf32>
    %116 = vector.extract_strided_slice %114 {offsets = [0, 0], sizes = [32, 8], strides = [1, 1]} : vector<32x96xf32> to vector<32x8xf32>
    %cst_55 = arith.constant 0.353553385 : f32
    %117 = vector.broadcast %cst_55 : f32 to vector<32x8xf32>
    %118 = arith.mulf %116, %117 : vector<32x8xf32>
    %119 = vector.extract_strided_slice %114 {offsets = [0, 32], sizes = [32, 8], strides = [1, 1]} : vector<32x96xf32> to vector<32x8xf32>
    %120 = vector.extract_strided_slice %114 {offsets = [0, 64], sizes = [32, 8], strides = [1, 1]} : vector<32x96xf32> to vector<32x8xf32>
    %121 = tpu.transpose %119, [1, 0] : vector<32x8xf32> -> vector<8x32xf32>
    %cst_56 = arith.constant dense<0.000000e+00> : vector<32x32xf32>
    %122 = tpu.matmul %118, %121, %cst_56 {dimension_numbers = #tpu.dot_dimension_numbers<[1], [0], [0], [1], [0, 0, 1, 1], [], []>} : vector<32x8xf32>, vector<8x32xf32>, vector<32x32xf32> -> vector<32x32xf32>
    %c1_57 = arith.constant 1 : index
    %c0_58 = arith.constant 0 : index
    %c0_59 = arith.constant 0 : index
    %c0_60 = arith.constant 0 : index
    %123 = vector.load %arg6[%c1_57, %c0_58, %c0_59, %c0_60] : memref<2x4x32x32xf32, #tpu.memory_space<vmem>>, vector<1x1x32x32xf32>
    %124 = vector.shape_cast %123 : vector<1x1x32x32xf32> to vector<32x32xf32>
    %125 = arith.addf %122, %124 : vector<32x32xf32>
    %cst_61 = arith.constant dense<0xFF800000> : vector<32xf32>
    %126 = vector.multi_reduction <maximumf>, %125, %cst_61 [1] : vector<32x32xf32> to vector<32xf32>
    %127 = vector.shape_cast %126 : vector<32xf32> to vector<32x1xf32>
    %128 = vector.broadcast %127 : vector<32x1xf32> to vector<32x32xf32>
    %129 = arith.subf %125, %128 : vector<32x32xf32>
    %130 = math.exp %129 : vector<32x32xf32>
    %cst_62 = arith.constant dense<0.000000e+00> : vector<32xf32>
    %131 = vector.multi_reduction <add>, %130, %cst_62 [1] : vector<32x32xf32> to vector<32xf32>
    %132 = vector.shape_cast %131 : vector<32xf32> to vector<32x1xf32>
    %133 = tpu.reciprocal %132 {approx = true} : vector<32x1xf32> -> vector<32x1xf32>
    %134 = vector.broadcast %133 : vector<32x1xf32> to vector<32x32xf32>
    %135 = arith.mulf %130, %134 : vector<32x32xf32>
    %cst_63 = arith.constant dense<0.000000e+00> : vector<32x8xf32>
    %136 = tpu.matmul %135, %120, %cst_63 {dimension_numbers = #tpu.dot_dimension_numbers<[1], [0], [0], [1], [0, 0, 1, 1], [], []>} : vector<32x32xf32>, vector<32x8xf32>, vector<32x8xf32> -> vector<32x8xf32>
    %137 = vector.extract_strided_slice %9 {offsets = [0, 0], sizes = [8, 32], strides = [1, 1]} : vector<32x32xf32> to vector<8x32xf32>
    %cst_64 = arith.constant dense<0.000000e+00> : vector<32x32xf32>
    %138 = tpu.matmul %136, %137, %cst_64 {dimension_numbers = #tpu.dot_dimension_numbers<[1], [0], [0], [1], [0, 0, 1, 1], [], []>} : vector<32x8xf32>, vector<8x32xf32>, vector<32x32xf32> -> vector<32x32xf32>
    %139 = arith.addf %115, %138 : vector<32x32xf32>
    %140 = vector.extract_strided_slice %114 {offsets = [0, 8], sizes = [32, 8], strides = [1, 1]} : vector<32x96xf32> to vector<32x8xf32>
    %cst_65 = arith.constant 0.353553385 : f32
    %141 = vector.broadcast %cst_65 : f32 to vector<32x8xf32>
    %142 = arith.mulf %140, %141 : vector<32x8xf32>
    %143 = vector.extract_strided_slice %114 {offsets = [0, 40], sizes = [32, 8], strides = [1, 1]} : vector<32x96xf32> to vector<32x8xf32>
    %144 = vector.extract_strided_slice %114 {offsets = [0, 72], sizes = [32, 8], strides = [1, 1]} : vector<32x96xf32> to vector<32x8xf32>
    %145 = tpu.transpose %143, [1, 0] : vector<32x8xf32> -> vector<8x32xf32>
    %cst_66 = arith.constant dense<0.000000e+00> : vector<32x32xf32>
    %146 = tpu.matmul %142, %145, %cst_66 {dimension_numbers = #tpu.dot_dimension_numbers<[1], [0], [0], [1], [0, 0, 1, 1], [], []>} : vector<32x8xf32>, vector<8x32xf32>, vector<32x32xf32> -> vector<32x32xf32>
    %c1_67 = arith.constant 1 : index
    %c1_68 = arith.constant 1 : index
    %c0_69 = arith.constant 0 : index
    %c0_70 = arith.constant 0 : index
    %147 = vector.load %arg6[%c1_67, %c1_68, %c0_69, %c0_70] : memref<2x4x32x32xf32, #tpu.memory_space<vmem>>, vector<1x1x32x32xf32>
    %148 = vector.shape_cast %147 : vector<1x1x32x32xf32> to vector<32x32xf32>
    %149 = arith.addf %146, %148 : vector<32x32xf32>
    %cst_71 = arith.constant dense<0xFF800000> : vector<32xf32>
    %150 = vector.multi_reduction <maximumf>, %149, %cst_71 [1] : vector<32x32xf32> to vector<32xf32>
    %151 = vector.shape_cast %150 : vector<32xf32> to vector<32x1xf32>
    %152 = vector.broadcast %151 : vector<32x1xf32> to vector<32x32xf32>
    %153 = arith.subf %149, %152 : vector<32x32xf32>
    %154 = math.exp %153 : vector<32x32xf32>
    %cst_72 = arith.constant dense<0.000000e+00> : vector<32xf32>
    %155 = vector.multi_reduction <add>, %154, %cst_72 [1] : vector<32x32xf32> to vector<32xf32>
    %156 = vector.shape_cast %155 : vector<32xf32> to vector<32x1xf32>
    %157 = tpu.reciprocal %156 {approx = true} : vector<32x1xf32> -> vector<32x1xf32>
    %158 = vector.broadcast %157 : vector<32x1xf32> to vector<32x32xf32>
    %159 = arith.mulf %154, %158 : vector<32x32xf32>
    %cst_73 = arith.constant dense<0.000000e+00> : vector<32x8xf32>
    %160 = tpu.matmul %159, %144, %cst_73 {dimension_numbers = #tpu.dot_dimension_numbers<[1], [0], [0], [1], [0, 0, 1, 1], [], []>} : vector<32x32xf32>, vector<32x8xf32>, vector<32x8xf32> -> vector<32x8xf32>
    %161 = vector.extract_strided_slice %9 {offsets = [8, 0], sizes = [8, 32], strides = [1, 1]} : vector<32x32xf32> to vector<8x32xf32>
    %cst_74 = arith.constant dense<0.000000e+00> : vector<32x32xf32>
    %162 = tpu.matmul %160, %161, %cst_74 {dimension_numbers = #tpu.dot_dimension_numbers<[1], [0], [0], [1], [0, 0, 1, 1], [], []>} : vector<32x8xf32>, vector<8x32xf32>, vector<32x32xf32> -> vector<32x32xf32>
    %163 = arith.addf %139, %162 : vector<32x32xf32>
    %164 = vector.extract_strided_slice %114 {offsets = [0, 16], sizes = [32, 8], strides = [1, 1]} : vector<32x96xf32> to vector<32x8xf32>
    %cst_75 = arith.constant 0.353553385 : f32
    %165 = vector.broadcast %cst_75 : f32 to vector<32x8xf32>
    %166 = arith.mulf %164, %165 : vector<32x8xf32>
    %167 = vector.extract_strided_slice %114 {offsets = [0, 48], sizes = [32, 8], strides = [1, 1]} : vector<32x96xf32> to vector<32x8xf32>
    %168 = vector.extract_strided_slice %114 {offsets = [0, 80], sizes = [32, 8], strides = [1, 1]} : vector<32x96xf32> to vector<32x8xf32>
    %169 = tpu.transpose %167, [1, 0] : vector<32x8xf32> -> vector<8x32xf32>
    %cst_76 = arith.constant dense<0.000000e+00> : vector<32x32xf32>
    %170 = tpu.matmul %166, %169, %cst_76 {dimension_numbers = #tpu.dot_dimension_numbers<[1], [0], [0], [1], [0, 0, 1, 1], [], []>} : vector<32x8xf32>, vector<8x32xf32>, vector<32x32xf32> -> vector<32x32xf32>
    %c1_77 = arith.constant 1 : index
    %c2_78 = arith.constant 2 : index
    %c0_79 = arith.constant 0 : index
    %c0_80 = arith.constant 0 : index
    %171 = vector.load %arg6[%c1_77, %c2_78, %c0_79, %c0_80] : memref<2x4x32x32xf32, #tpu.memory_space<vmem>>, vector<1x1x32x32xf32>
    %172 = vector.shape_cast %171 : vector<1x1x32x32xf32> to vector<32x32xf32>
    %173 = arith.addf %170, %172 : vector<32x32xf32>
    %cst_81 = arith.constant dense<0xFF800000> : vector<32xf32>
    %174 = vector.multi_reduction <maximumf>, %173, %cst_81 [1] : vector<32x32xf32> to vector<32xf32>
    %175 = vector.shape_cast %174 : vector<32xf32> to vector<32x1xf32>
    %176 = vector.broadcast %175 : vector<32x1xf32> to vector<32x32xf32>
    %177 = arith.subf %173, %176 : vector<32x32xf32>
    %178 = math.exp %177 : vector<32x32xf32>
    %cst_82 = arith.constant dense<0.000000e+00> : vector<32xf32>
    %179 = vector.multi_reduction <add>, %178, %cst_82 [1] : vector<32x32xf32> to vector<32xf32>
    %180 = vector.shape_cast %179 : vector<32xf32> to vector<32x1xf32>
    %181 = tpu.reciprocal %180 {approx = true} : vector<32x1xf32> -> vector<32x1xf32>
    %182 = vector.broadcast %181 : vector<32x1xf32> to vector<32x32xf32>
    %183 = arith.mulf %178, %182 : vector<32x32xf32>
    %cst_83 = arith.constant dense<0.000000e+00> : vector<32x8xf32>
    %184 = tpu.matmul %183, %168, %cst_83 {dimension_numbers = #tpu.dot_dimension_numbers<[1], [0], [0], [1], [0, 0, 1, 1], [], []>} : vector<32x32xf32>, vector<32x8xf32>, vector<32x8xf32> -> vector<32x8xf32>
    %185 = vector.extract_strided_slice %9 {offsets = [16, 0], sizes = [8, 32], strides = [1, 1]} : vector<32x32xf32> to vector<8x32xf32>
    %cst_84 = arith.constant dense<0.000000e+00> : vector<32x32xf32>
    %186 = tpu.matmul %184, %185, %cst_84 {dimension_numbers = #tpu.dot_dimension_numbers<[1], [0], [0], [1], [0, 0, 1, 1], [], []>} : vector<32x8xf32>, vector<8x32xf32>, vector<32x32xf32> -> vector<32x32xf32>
    %187 = arith.addf %163, %186 : vector<32x32xf32>
    %188 = vector.extract_strided_slice %114 {offsets = [0, 24], sizes = [32, 8], strides = [1, 1]} : vector<32x96xf32> to vector<32x8xf32>
    %cst_85 = arith.constant 0.353553385 : f32
    %189 = vector.broadcast %cst_85 : f32 to vector<32x8xf32>
    %190 = arith.mulf %188, %189 : vector<32x8xf32>
    %191 = vector.extract_strided_slice %114 {offsets = [0, 56], sizes = [32, 8], strides = [1, 1]} : vector<32x96xf32> to vector<32x8xf32>
    %192 = vector.extract_strided_slice %114 {offsets = [0, 88], sizes = [32, 8], strides = [1, 1]} : vector<32x96xf32> to vector<32x8xf32>
    %193 = tpu.transpose %191, [1, 0] : vector<32x8xf32> -> vector<8x32xf32>
    %cst_86 = arith.constant dense<0.000000e+00> : vector<32x32xf32>
    %194 = tpu.matmul %190, %193, %cst_86 {dimension_numbers = #tpu.dot_dimension_numbers<[1], [0], [0], [1], [0, 0, 1, 1], [], []>} : vector<32x8xf32>, vector<8x32xf32>, vector<32x32xf32> -> vector<32x32xf32>
    %c1_87 = arith.constant 1 : index
    %c3_88 = arith.constant 3 : index
    %c0_89 = arith.constant 0 : index
    %c0_90 = arith.constant 0 : index
    %195 = vector.load %arg6[%c1_87, %c3_88, %c0_89, %c0_90] : memref<2x4x32x32xf32, #tpu.memory_space<vmem>>, vector<1x1x32x32xf32>
    %196 = vector.shape_cast %195 : vector<1x1x32x32xf32> to vector<32x32xf32>
    %197 = arith.addf %194, %196 : vector<32x32xf32>
    %cst_91 = arith.constant dense<0xFF800000> : vector<32xf32>
    %198 = vector.multi_reduction <maximumf>, %197, %cst_91 [1] : vector<32x32xf32> to vector<32xf32>
    %199 = vector.shape_cast %198 : vector<32xf32> to vector<32x1xf32>
    %200 = vector.broadcast %199 : vector<32x1xf32> to vector<32x32xf32>
    %201 = arith.subf %197, %200 : vector<32x32xf32>
    %202 = math.exp %201 : vector<32x32xf32>
    %cst_92 = arith.constant dense<0.000000e+00> : vector<32xf32>
    %203 = vector.multi_reduction <add>, %202, %cst_92 [1] : vector<32x32xf32> to vector<32xf32>
    %204 = vector.shape_cast %203 : vector<32xf32> to vector<32x1xf32>
    %205 = tpu.reciprocal %204 {approx = true} : vector<32x1xf32> -> vector<32x1xf32>
    %206 = vector.broadcast %205 : vector<32x1xf32> to vector<32x32xf32>
    %207 = arith.mulf %202, %206 : vector<32x32xf32>
    %cst_93 = arith.constant dense<0.000000e+00> : vector<32x8xf32>
    %208 = tpu.matmul %207, %192, %cst_93 {dimension_numbers = #tpu.dot_dimension_numbers<[1], [0], [0], [1], [0, 0, 1, 1], [], []>} : vector<32x32xf32>, vector<32x8xf32>, vector<32x8xf32> -> vector<32x8xf32>
    %209 = vector.extract_strided_slice %9 {offsets = [24, 0], sizes = [8, 32], strides = [1, 1]} : vector<32x32xf32> to vector<8x32xf32>
    %cst_94 = arith.constant dense<0.000000e+00> : vector<32x32xf32>
    %210 = tpu.matmul %208, %209, %cst_94 {dimension_numbers = #tpu.dot_dimension_numbers<[1], [0], [0], [1], [0, 0, 1, 1], [], []>} : vector<32x8xf32>, vector<8x32xf32>, vector<32x32xf32> -> vector<32x32xf32>
    %211 = arith.addf %187, %210 : vector<32x32xf32>
    %212 = vector.shape_cast %11 : vector<32xf32> to vector<1x32xf32>
    %213 = vector.broadcast %212 : vector<1x32xf32> to vector<32x32xf32>
    %214 = arith.addf %211, %213 : vector<32x32xf32>
    %c32_95 = arith.constant 32 : index
    %c0_96 = arith.constant 0 : index
    %215 = vector.load %arg7[%c32_95, %c0_96] : memref<128x32xf32, #tpu.memory_space<vmem>>, vector<32x32xf32>
    tpu.vector_store %arg7[%c32_95, %c0_96], %214 {strides = array<i32>} : memref<128x32xf32, #tpu.memory_space<vmem>>, vector<32x32xf32>,
    %c64 = arith.constant 64 : index
    %c0_97 = arith.constant 0 : index
    %216 = vector.load %arg8[%c64, %c0_97] : memref<128x96xf32, #tpu.memory_space<vmem>>, vector<32x96xf32>
    %cst_98 = arith.constant 0.000000e+00 : f32
    %217 = vector.broadcast %cst_98 : f32 to vector<32x32xf32>
    %218 = vector.extract_strided_slice %216 {offsets = [0, 0], sizes = [32, 8], strides = [1, 1]} : vector<32x96xf32> to vector<32x8xf32>
    %cst_99 = arith.constant 0.353553385 : f32
    %219 = vector.broadcast %cst_99 : f32 to vector<32x8xf32>
    %220 = arith.mulf %218, %219 : vector<32x8xf32>
    %221 = vector.extract_strided_slice %216 {offsets = [0, 32], sizes = [32, 8], strides = [1, 1]} : vector<32x96xf32> to vector<32x8xf32>
    %222 = vector.extract_strided_slice %216 {offsets = [0, 64], sizes = [32, 8], strides = [1, 1]} : vector<32x96xf32> to vector<32x8xf32>
    %223 = tpu.transpose %221, [1, 0] : vector<32x8xf32> -> vector<8x32xf32>
    %cst_100 = arith.constant dense<0.000000e+00> : vector<32x32xf32>
    %224 = tpu.matmul %220, %223, %cst_100 {dimension_numbers = #tpu.dot_dimension_numbers<[1], [0], [0], [1], [0, 0, 1, 1], [], []>} : vector<32x8xf32>, vector<8x32xf32>, vector<32x32xf32> -> vector<32x32xf32>
    %c0_101 = arith.constant 0 : index
    %c0_102 = arith.constant 0 : index
    %c0_103 = arith.constant 0 : index
    %c0_104 = arith.constant 0 : index
    %225 = vector.load %arg6[%c0_101, %c0_102, %c0_103, %c0_104] : memref<2x4x32x32xf32, #tpu.memory_space<vmem>>, vector<1x1x32x32xf32>
    %226 = vector.shape_cast %225 : vector<1x1x32x32xf32> to vector<32x32xf32>
    %227 = arith.addf %224, %226 : vector<32x32xf32>
    %cst_105 = arith.constant dense<0xFF800000> : vector<32xf32>
    %228 = vector.multi_reduction <maximumf>, %227, %cst_105 [1] : vector<32x32xf32> to vector<32xf32>
    %229 = vector.shape_cast %228 : vector<32xf32> to vector<32x1xf32>
    %230 = vector.broadcast %229 : vector<32x1xf32> to vector<32x32xf32>
    %231 = arith.subf %227, %230 : vector<32x32xf32>
    %232 = math.exp %231 : vector<32x32xf32>
    %cst_106 = arith.constant dense<0.000000e+00> : vector<32xf32>
    %233 = vector.multi_reduction <add>, %232, %cst_106 [1] : vector<32x32xf32> to vector<32xf32>
    %234 = vector.shape_cast %233 : vector<32xf32> to vector<32x1xf32>
    %235 = tpu.reciprocal %234 {approx = true} : vector<32x1xf32> -> vector<32x1xf32>
    %236 = vector.broadcast %235 : vector<32x1xf32> to vector<32x32xf32>
    %237 = arith.mulf %232, %236 : vector<32x32xf32>
    %cst_107 = arith.constant dense<0.000000e+00> : vector<32x8xf32>
    %238 = tpu.matmul %237, %222, %cst_107 {dimension_numbers = #tpu.dot_dimension_numbers<[1], [0], [0], [1], [0, 0, 1, 1], [], []>} : vector<32x32xf32>, vector<32x8xf32>, vector<32x8xf32> -> vector<32x8xf32>
    %239 = vector.extract_strided_slice %9 {offsets = [0, 0], sizes = [8, 32], strides = [1, 1]} : vector<32x32xf32> to vector<8x32xf32>
    %cst_108 = arith.constant dense<0.000000e+00> : vector<32x32xf32>
    %240 = tpu.matmul %238, %239, %cst_108 {dimension_numbers = #tpu.dot_dimension_numbers<[1], [0], [0], [1], [0, 0, 1, 1], [], []>} : vector<32x8xf32>, vector<8x32xf32>, vector<32x32xf32> -> vector<32x32xf32>
    %241 = arith.addf %217, %240 : vector<32x32xf32>
    %242 = vector.extract_strided_slice %216 {offsets = [0, 8], sizes = [32, 8], strides = [1, 1]} : vector<32x96xf32> to vector<32x8xf32>
    %cst_109 = arith.constant 0.353553385 : f32
    %243 = vector.broadcast %cst_109 : f32 to vector<32x8xf32>
    %244 = arith.mulf %242, %243 : vector<32x8xf32>
    %245 = vector.extract_strided_slice %216 {offsets = [0, 40], sizes = [32, 8], strides = [1, 1]} : vector<32x96xf32> to vector<32x8xf32>
    %246 = vector.extract_strided_slice %216 {offsets = [0, 72], sizes = [32, 8], strides = [1, 1]} : vector<32x96xf32> to vector<32x8xf32>
    %247 = tpu.transpose %245, [1, 0] : vector<32x8xf32> -> vector<8x32xf32>
    %cst_110 = arith.constant dense<0.000000e+00> : vector<32x32xf32>
    %248 = tpu.matmul %244, %247, %cst_110 {dimension_numbers = #tpu.dot_dimension_numbers<[1], [0], [0], [1], [0, 0, 1, 1], [], []>} : vector<32x8xf32>, vector<8x32xf32>, vector<32x32xf32> -> vector<32x32xf32>
    %c0_111 = arith.constant 0 : index
    %c1_112 = arith.constant 1 : index
    %c0_113 = arith.constant 0 : index
    %c0_114 = arith.constant 0 : index
    %249 = vector.load %arg6[%c0_111, %c1_112, %c0_113, %c0_114] : memref<2x4x32x32xf32, #tpu.memory_space<vmem>>, vector<1x1x32x32xf32>
    %250 = vector.shape_cast %249 : vector<1x1x32x32xf32> to vector<32x32xf32>
    %251 = arith.addf %248, %250 : vector<32x32xf32>
    %cst_115 = arith.constant dense<0xFF800000> : vector<32xf32>
    %252 = vector.multi_reduction <maximumf>, %251, %cst_115 [1] : vector<32x32xf32> to vector<32xf32>
    %253 = vector.shape_cast %252 : vector<32xf32> to vector<32x1xf32>
    %254 = vector.broadcast %253 : vector<32x1xf32> to vector<32x32xf32>
    %255 = arith.subf %251, %254 : vector<32x32xf32>
    %256 = math.exp %255 : vector<32x32xf32>
    %cst_116 = arith.constant dense<0.000000e+00> : vector<32xf32>
    %257 = vector.multi_reduction <add>, %256, %cst_116 [1] : vector<32x32xf32> to vector<32xf32>
    %258 = vector.shape_cast %257 : vector<32xf32> to vector<32x1xf32>
    %259 = tpu.reciprocal %258 {approx = true} : vector<32x1xf32> -> vector<32x1xf32>
    %260 = vector.broadcast %259 : vector<32x1xf32> to vector<32x32xf32>
    %261 = arith.mulf %256, %260 : vector<32x32xf32>
    %cst_117 = arith.constant dense<0.000000e+00> : vector<32x8xf32>
    %262 = tpu.matmul %261, %246, %cst_117 {dimension_numbers = #tpu.dot_dimension_numbers<[1], [0], [0], [1], [0, 0, 1, 1], [], []>} : vector<32x32xf32>, vector<32x8xf32>, vector<32x8xf32> -> vector<32x8xf32>
    %263 = vector.extract_strided_slice %9 {offsets = [8, 0], sizes = [8, 32], strides = [1, 1]} : vector<32x32xf32> to vector<8x32xf32>
    %cst_118 = arith.constant dense<0.000000e+00> : vector<32x32xf32>
    %264 = tpu.matmul %262, %263, %cst_118 {dimension_numbers = #tpu.dot_dimension_numbers<[1], [0], [0], [1], [0, 0, 1, 1], [], []>} : vector<32x8xf32>, vector<8x32xf32>, vector<32x32xf32> -> vector<32x32xf32>
    %265 = arith.addf %241, %264 : vector<32x32xf32>
    %266 = vector.extract_strided_slice %216 {offsets = [0, 16], sizes = [32, 8], strides = [1, 1]} : vector<32x96xf32> to vector<32x8xf32>
    %cst_119 = arith.constant 0.353553385 : f32
    %267 = vector.broadcast %cst_119 : f32 to vector<32x8xf32>
    %268 = arith.mulf %266, %267 : vector<32x8xf32>
    %269 = vector.extract_strided_slice %216 {offsets = [0, 48], sizes = [32, 8], strides = [1, 1]} : vector<32x96xf32> to vector<32x8xf32>
    %270 = vector.extract_strided_slice %216 {offsets = [0, 80], sizes = [32, 8], strides = [1, 1]} : vector<32x96xf32> to vector<32x8xf32>
    %271 = tpu.transpose %269, [1, 0] : vector<32x8xf32> -> vector<8x32xf32>
    %cst_120 = arith.constant dense<0.000000e+00> : vector<32x32xf32>
    %272 = tpu.matmul %268, %271, %cst_120 {dimension_numbers = #tpu.dot_dimension_numbers<[1], [0], [0], [1], [0, 0, 1, 1], [], []>} : vector<32x8xf32>, vector<8x32xf32>, vector<32x32xf32> -> vector<32x32xf32>
    %c0_121 = arith.constant 0 : index
    %c2_122 = arith.constant 2 : index
    %c0_123 = arith.constant 0 : index
    %c0_124 = arith.constant 0 : index
    %273 = vector.load %arg6[%c0_121, %c2_122, %c0_123, %c0_124] : memref<2x4x32x32xf32, #tpu.memory_space<vmem>>, vector<1x1x32x32xf32>
    %274 = vector.shape_cast %273 : vector<1x1x32x32xf32> to vector<32x32xf32>
    %275 = arith.addf %272, %274 : vector<32x32xf32>
    %cst_125 = arith.constant dense<0xFF800000> : vector<32xf32>
    %276 = vector.multi_reduction <maximumf>, %275, %cst_125 [1] : vector<32x32xf32> to vector<32xf32>
    %277 = vector.shape_cast %276 : vector<32xf32> to vector<32x1xf32>
    %278 = vector.broadcast %277 : vector<32x1xf32> to vector<32x32xf32>
    %279 = arith.subf %275, %278 : vector<32x32xf32>
    %280 = math.exp %279 : vector<32x32xf32>
    %cst_126 = arith.constant dense<0.000000e+00> : vector<32xf32>
    %281 = vector.multi_reduction <add>, %280, %cst_126 [1] : vector<32x32xf32> to vector<32xf32>
    %282 = vector.shape_cast %281 : vector<32xf32> to vector<32x1xf32>
    %283 = tpu.reciprocal %282 {approx = true} : vector<32x1xf32> -> vector<32x1xf32>
    %284 = vector.broadcast %283 : vector<32x1xf32> to vector<32x32xf32>
    %285 = arith.mulf %280, %284 : vector<32x32xf32>
    %cst_127 = arith.constant dense<0.000000e+00> : vector<32x8xf32>
    %286 = tpu.matmul %285, %270, %cst_127 {dimension_numbers = #tpu.dot_dimension_numbers<[1], [0], [0], [1], [0, 0, 1, 1], [], []>} : vector<32x32xf32>, vector<32x8xf32>, vector<32x8xf32> -> vector<32x8xf32>
    %287 = vector.extract_strided_slice %9 {offsets = [16, 0], sizes = [8, 32], strides = [1, 1]} : vector<32x32xf32> to vector<8x32xf32>
    %cst_128 = arith.constant dense<0.000000e+00> : vector<32x32xf32>
    %288 = tpu.matmul %286, %287, %cst_128 {dimension_numbers = #tpu.dot_dimension_numbers<[1], [0], [0], [1], [0, 0, 1, 1], [], []>} : vector<32x8xf32>, vector<8x32xf32>, vector<32x32xf32> -> vector<32x32xf32>
    %289 = arith.addf %265, %288 : vector<32x32xf32>
    %290 = vector.extract_strided_slice %216 {offsets = [0, 24], sizes = [32, 8], strides = [1, 1]} : vector<32x96xf32> to vector<32x8xf32>
    %cst_129 = arith.constant 0.353553385 : f32
    %291 = vector.broadcast %cst_129 : f32 to vector<32x8xf32>
    %292 = arith.mulf %290, %291 : vector<32x8xf32>
    %293 = vector.extract_strided_slice %216 {offsets = [0, 56], sizes = [32, 8], strides = [1, 1]} : vector<32x96xf32> to vector<32x8xf32>
    %294 = vector.extract_strided_slice %216 {offsets = [0, 88], sizes = [32, 8], strides = [1, 1]} : vector<32x96xf32> to vector<32x8xf32>
    %295 = tpu.transpose %293, [1, 0] : vector<32x8xf32> -> vector<8x32xf32>
    %cst_130 = arith.constant dense<0.000000e+00> : vector<32x32xf32>
    %296 = tpu.matmul %292, %295, %cst_130 {dimension_numbers = #tpu.dot_dimension_numbers<[1], [0], [0], [1], [0, 0, 1, 1], [], []>} : vector<32x8xf32>, vector<8x32xf32>, vector<32x32xf32> -> vector<32x32xf32>
    %c0_131 = arith.constant 0 : index
    %c3_132 = arith.constant 3 : index
    %c0_133 = arith.constant 0 : index
    %c0_134 = arith.constant 0 : index
    %297 = vector.load %arg6[%c0_131, %c3_132, %c0_133, %c0_134] : memref<2x4x32x32xf32, #tpu.memory_space<vmem>>, vector<1x1x32x32xf32>
    %298 = vector.shape_cast %297 : vector<1x1x32x32xf32> to vector<32x32xf32>
    %299 = arith.addf %296, %298 : vector<32x32xf32>
    %cst_135 = arith.constant dense<0xFF800000> : vector<32xf32>
    %300 = vector.multi_reduction <maximumf>, %299, %cst_135 [1] : vector<32x32xf32> to vector<32xf32>
    %301 = vector.shape_cast %300 : vector<32xf32> to vector<32x1xf32>
    %302 = vector.broadcast %301 : vector<32x1xf32> to vector<32x32xf32>
    %303 = arith.subf %299, %302 : vector<32x32xf32>
    %304 = math.exp %303 : vector<32x32xf32>
    %cst_136 = arith.constant dense<0.000000e+00> : vector<32xf32>
    %305 = vector.multi_reduction <add>, %304, %cst_136 [1] : vector<32x32xf32> to vector<32xf32>
    %306 = vector.shape_cast %305 : vector<32xf32> to vector<32x1xf32>
    %307 = tpu.reciprocal %306 {approx = true} : vector<32x1xf32> -> vector<32x1xf32>
    %308 = vector.broadcast %307 : vector<32x1xf32> to vector<32x32xf32>
    %309 = arith.mulf %304, %308 : vector<32x32xf32>
    %cst_137 = arith.constant dense<0.000000e+00> : vector<32x8xf32>
    %310 = tpu.matmul %309, %294, %cst_137 {dimension_numbers = #tpu.dot_dimension_numbers<[1], [0], [0], [1], [0, 0, 1, 1], [], []>} : vector<32x32xf32>, vector<32x8xf32>, vector<32x8xf32> -> vector<32x8xf32>
    %311 = vector.extract_strided_slice %9 {offsets = [24, 0], sizes = [8, 32], strides = [1, 1]} : vector<32x32xf32> to vector<8x32xf32>
    %cst_138 = arith.constant dense<0.000000e+00> : vector<32x32xf32>
    %312 = tpu.matmul %310, %311, %cst_138 {dimension_numbers = #tpu.dot_dimension_numbers<[1], [0], [0], [1], [0, 0, 1, 1], [], []>} : vector<32x8xf32>, vector<8x32xf32>, vector<32x32xf32> -> vector<32x32xf32>
    %313 = arith.addf %289, %312 : vector<32x32xf32>
    %314 = vector.shape_cast %11 : vector<32xf32> to vector<1x32xf32>
    %315 = vector.broadcast %314 : vector<1x32xf32> to vector<32x32xf32>
    %316 = arith.addf %313, %315 : vector<32x32xf32>
    %c64_139 = arith.constant 64 : index
    %c0_140 = arith.constant 0 : index
    %317 = vector.load %arg7[%c64_139, %c0_140] : memref<128x32xf32, #tpu.memory_space<vmem>>, vector<32x32xf32>
    tpu.vector_store %arg7[%c64_139, %c0_140], %316 {strides = array<i32>} : memref<128x32xf32, #tpu.memory_space<vmem>>, vector<32x32xf32>,
    %c96 = arith.constant 96 : index
    %c0_141 = arith.constant 0 : index
    %318 = vector.load %arg8[%c96, %c0_141] : memref<128x96xf32, #tpu.memory_space<vmem>>, vector<32x96xf32>
    %cst_142 = arith.constant 0.000000e+00 : f32
    %319 = vector.broadcast %cst_142 : f32 to vector<32x32xf32>
    %320 = vector.extract_strided_slice %318 {offsets = [0, 0], sizes = [32, 8], strides = [1, 1]} : vector<32x96xf32> to vector<32x8xf32>
    %cst_143 = arith.constant 0.353553385 : f32
    %321 = vector.broadcast %cst_143 : f32 to vector<32x8xf32>
    %322 = arith.mulf %320, %321 : vector<32x8xf32>
    %323 = vector.extract_strided_slice %318 {offsets = [0, 32], sizes = [32, 8], strides = [1, 1]} : vector<32x96xf32> to vector<32x8xf32>
    %324 = vector.extract_strided_slice %318 {offsets = [0, 64], sizes = [32, 8], strides = [1, 1]} : vector<32x96xf32> to vector<32x8xf32>
    %325 = tpu.transpose %323, [1, 0] : vector<32x8xf32> -> vector<8x32xf32>
    %cst_144 = arith.constant dense<0.000000e+00> : vector<32x32xf32>
    %326 = tpu.matmul %322, %325, %cst_144 {dimension_numbers = #tpu.dot_dimension_numbers<[1], [0], [0], [1], [0, 0, 1, 1], [], []>} : vector<32x8xf32>, vector<8x32xf32>, vector<32x32xf32> -> vector<32x32xf32>
    %c1_145 = arith.constant 1 : index
    %c0_146 = arith.constant 0 : index
    %c0_147 = arith.constant 0 : index
    %c0_148 = arith.constant 0 : index
    %327 = vector.load %arg6[%c1_145, %c0_146, %c0_147, %c0_148] : memref<2x4x32x32xf32, #tpu.memory_space<vmem>>, vector<1x1x32x32xf32>
    %328 = vector.shape_cast %327 : vector<1x1x32x32xf32> to vector<32x32xf32>
    %329 = arith.addf %326, %328 : vector<32x32xf32>
    %cst_149 = arith.constant dense<0xFF800000> : vector<32xf32>
    %330 = vector.multi_reduction <maximumf>, %329, %cst_149 [1] : vector<32x32xf32> to vector<32xf32>
    %331 = vector.shape_cast %330 : vector<32xf32> to vector<32x1xf32>
    %332 = vector.broadcast %331 : vector<32x1xf32> to vector<32x32xf32>
    %333 = arith.subf %329, %332 : vector<32x32xf32>
    %334 = math.exp %333 : vector<32x32xf32>
    %cst_150 = arith.constant dense<0.000000e+00> : vector<32xf32>
    %335 = vector.multi_reduction <add>, %334, %cst_150 [1] : vector<32x32xf32> to vector<32xf32>
    %336 = vector.shape_cast %335 : vector<32xf32> to vector<32x1xf32>
    %337 = tpu.reciprocal %336 {approx = true} : vector<32x1xf32> -> vector<32x1xf32>
    %338 = vector.broadcast %337 : vector<32x1xf32> to vector<32x32xf32>
    %339 = arith.mulf %334, %338 : vector<32x32xf32>
    %cst_151 = arith.constant dense<0.000000e+00> : vector<32x8xf32>
    %340 = tpu.matmul %339, %324, %cst_151 {dimension_numbers = #tpu.dot_dimension_numbers<[1], [0], [0], [1], [0, 0, 1, 1], [], []>} : vector<32x32xf32>, vector<32x8xf32>, vector<32x8xf32> -> vector<32x8xf32>
    %341 = vector.extract_strided_slice %9 {offsets = [0, 0], sizes = [8, 32], strides = [1, 1]} : vector<32x32xf32> to vector<8x32xf32>
    %cst_152 = arith.constant dense<0.000000e+00> : vector<32x32xf32>
    %342 = tpu.matmul %340, %341, %cst_152 {dimension_numbers = #tpu.dot_dimension_numbers<[1], [0], [0], [1], [0, 0, 1, 1], [], []>} : vector<32x8xf32>, vector<8x32xf32>, vector<32x32xf32> -> vector<32x32xf32>
    %343 = arith.addf %319, %342 : vector<32x32xf32>
    %344 = vector.extract_strided_slice %318 {offsets = [0, 8], sizes = [32, 8], strides = [1, 1]} : vector<32x96xf32> to vector<32x8xf32>
    %cst_153 = arith.constant 0.353553385 : f32
    %345 = vector.broadcast %cst_153 : f32 to vector<32x8xf32>
    %346 = arith.mulf %344, %345 : vector<32x8xf32>
    %347 = vector.extract_strided_slice %318 {offsets = [0, 40], sizes = [32, 8], strides = [1, 1]} : vector<32x96xf32> to vector<32x8xf32>
    %348 = vector.extract_strided_slice %318 {offsets = [0, 72], sizes = [32, 8], strides = [1, 1]} : vector<32x96xf32> to vector<32x8xf32>
    %349 = tpu.transpose %347, [1, 0] : vector<32x8xf32> -> vector<8x32xf32>
    %cst_154 = arith.constant dense<0.000000e+00> : vector<32x32xf32>
    %350 = tpu.matmul %346, %349, %cst_154 {dimension_numbers = #tpu.dot_dimension_numbers<[1], [0], [0], [1], [0, 0, 1, 1], [], []>} : vector<32x8xf32>, vector<8x32xf32>, vector<32x32xf32> -> vector<32x32xf32>
    %c1_155 = arith.constant 1 : index
    %c1_156 = arith.constant 1 : index
    %c0_157 = arith.constant 0 : index
    %c0_158 = arith.constant 0 : index
    %351 = vector.load %arg6[%c1_155, %c1_156, %c0_157, %c0_158] : memref<2x4x32x32xf32, #tpu.memory_space<vmem>>, vector<1x1x32x32xf32>
    %352 = vector.shape_cast %351 : vector<1x1x32x32xf32> to vector<32x32xf32>
    %353 = arith.addf %350, %352 : vector<32x32xf32>
    %cst_159 = arith.constant dense<0xFF800000> : vector<32xf32>
    %354 = vector.multi_reduction <maximumf>, %353, %cst_159 [1] : vector<32x32xf32> to vector<32xf32>
    %355 = vector.shape_cast %354 : vector<32xf32> to vector<32x1xf32>
    %356 = vector.broadcast %355 : vector<32x1xf32> to vector<32x32xf32>
    %357 = arith.subf %353, %356 : vector<32x32xf32>
    %358 = math.exp %357 : vector<32x32xf32>
    %cst_160 = arith.constant dense<0.000000e+00> : vector<32xf32>
    %359 = vector.multi_reduction <add>, %358, %cst_160 [1] : vector<32x32xf32> to vector<32xf32>
    %360 = vector.shape_cast %359 : vector<32xf32> to vector<32x1xf32>
    %361 = tpu.reciprocal %360 {approx = true} : vector<32x1xf32> -> vector<32x1xf32>
    %362 = vector.broadcast %361 : vector<32x1xf32> to vector<32x32xf32>
    %363 = arith.mulf %358, %362 : vector<32x32xf32>
    %cst_161 = arith.constant dense<0.000000e+00> : vector<32x8xf32>
    %364 = tpu.matmul %363, %348, %cst_161 {dimension_numbers = #tpu.dot_dimension_numbers<[1], [0], [0], [1], [0, 0, 1, 1], [], []>} : vector<32x32xf32>, vector<32x8xf32>, vector<32x8xf32> -> vector<32x8xf32>
    %365 = vector.extract_strided_slice %9 {offsets = [8, 0], sizes = [8, 32], strides = [1, 1]} : vector<32x32xf32> to vector<8x32xf32>
    %cst_162 = arith.constant dense<0.000000e+00> : vector<32x32xf32>
    %366 = tpu.matmul %364, %365, %cst_162 {dimension_numbers = #tpu.dot_dimension_numbers<[1], [0], [0], [1], [0, 0, 1, 1], [], []>} : vector<32x8xf32>, vector<8x32xf32>, vector<32x32xf32> -> vector<32x32xf32>
    %367 = arith.addf %343, %366 : vector<32x32xf32>
    %368 = vector.extract_strided_slice %318 {offsets = [0, 16], sizes = [32, 8], strides = [1, 1]} : vector<32x96xf32> to vector<32x8xf32>
    %cst_163 = arith.constant 0.353553385 : f32
    %369 = vector.broadcast %cst_163 : f32 to vector<32x8xf32>
    %370 = arith.mulf %368, %369 : vector<32x8xf32>
    %371 = vector.extract_strided_slice %318 {offsets = [0, 48], sizes = [32, 8], strides = [1, 1]} : vector<32x96xf32> to vector<32x8xf32>
    %372 = vector.extract_strided_slice %318 {offsets = [0, 80], sizes = [32, 8], strides = [1, 1]} : vector<32x96xf32> to vector<32x8xf32>
    %373 = tpu.transpose %371, [1, 0] : vector<32x8xf32> -> vector<8x32xf32>
    %cst_164 = arith.constant dense<0.000000e+00> : vector<32x32xf32>
    %374 = tpu.matmul %370, %373, %cst_164 {dimension_numbers = #tpu.dot_dimension_numbers<[1], [0], [0], [1], [0, 0, 1, 1], [], []>} : vector<32x8xf32>, vector<8x32xf32>, vector<32x32xf32> -> vector<32x32xf32>
    %c1_165 = arith.constant 1 : index
    %c2_166 = arith.constant 2 : index
    %c0_167 = arith.constant 0 : index
    %c0_168 = arith.constant 0 : index
    %375 = vector.load %arg6[%c1_165, %c2_166, %c0_167, %c0_168] : memref<2x4x32x32xf32, #tpu.memory_space<vmem>>, vector<1x1x32x32xf32>
    %376 = vector.shape_cast %375 : vector<1x1x32x32xf32> to vector<32x32xf32>
    %377 = arith.addf %374, %376 : vector<32x32xf32>
    %cst_169 = arith.constant dense<0xFF800000> : vector<32xf32>
    %378 = vector.multi_reduction <maximumf>, %377, %cst_169 [1] : vector<32x32xf32> to vector<32xf32>
    %379 = vector.shape_cast %378 : vector<32xf32> to vector<32x1xf32>
    %380 = vector.broadcast %379 : vector<32x1xf32> to vector<32x32xf32>
    %381 = arith.subf %377, %380 : vector<32x32xf32>
    %382 = math.exp %381 : vector<32x32xf32>
    %cst_170 = arith.constant dense<0.000000e+00> : vector<32xf32>
    %383 = vector.multi_reduction <add>, %382, %cst_170 [1] : vector<32x32xf32> to vector<32xf32>
    %384 = vector.shape_cast %383 : vector<32xf32> to vector<32x1xf32>
    %385 = tpu.reciprocal %384 {approx = true} : vector<32x1xf32> -> vector<32x1xf32>
    %386 = vector.broadcast %385 : vector<32x1xf32> to vector<32x32xf32>
    %387 = arith.mulf %382, %386 : vector<32x32xf32>
    %cst_171 = arith.constant dense<0.000000e+00> : vector<32x8xf32>
    %388 = tpu.matmul %387, %372, %cst_171 {dimension_numbers = #tpu.dot_dimension_numbers<[1], [0], [0], [1], [0, 0, 1, 1], [], []>} : vector<32x32xf32>, vector<32x8xf32>, vector<32x8xf32> -> vector<32x8xf32>
    %389 = vector.extract_strided_slice %9 {offsets = [16, 0], sizes = [8, 32], strides = [1, 1]} : vector<32x32xf32> to vector<8x32xf32>
    %cst_172 = arith.constant dense<0.000000e+00> : vector<32x32xf32>
    %390 = tpu.matmul %388, %389, %cst_172 {dimension_numbers = #tpu.dot_dimension_numbers<[1], [0], [0], [1], [0, 0, 1, 1], [], []>} : vector<32x8xf32>, vector<8x32xf32>, vector<32x32xf32> -> vector<32x32xf32>
    %391 = arith.addf %367, %390 : vector<32x32xf32>
    %392 = vector.extract_strided_slice %318 {offsets = [0, 24], sizes = [32, 8], strides = [1, 1]} : vector<32x96xf32> to vector<32x8xf32>
    %cst_173 = arith.constant 0.353553385 : f32
    %393 = vector.broadcast %cst_173 : f32 to vector<32x8xf32>
    %394 = arith.mulf %392, %393 : vector<32x8xf32>
    %395 = vector.extract_strided_slice %318 {offsets = [0, 56], sizes = [32, 8], strides = [1, 1]} : vector<32x96xf32> to vector<32x8xf32>
    %396 = vector.extract_strided_slice %318 {offsets = [0, 88], sizes = [32, 8], strides = [1, 1]} : vector<32x96xf32> to vector<32x8xf32>
    %397 = tpu.transpose %395, [1, 0] : vector<32x8xf32> -> vector<8x32xf32>
    %cst_174 = arith.constant dense<0.000000e+00> : vector<32x32xf32>
    %398 = tpu.matmul %394, %397, %cst_174 {dimension_numbers = #tpu.dot_dimension_numbers<[1], [0], [0], [1], [0, 0, 1, 1], [], []>} : vector<32x8xf32>, vector<8x32xf32>, vector<32x32xf32> -> vector<32x32xf32>
    %c1_175 = arith.constant 1 : index
    %c3_176 = arith.constant 3 : index
    %c0_177 = arith.constant 0 : index
    %c0_178 = arith.constant 0 : index
    %399 = vector.load %arg6[%c1_175, %c3_176, %c0_177, %c0_178] : memref<2x4x32x32xf32, #tpu.memory_space<vmem>>, vector<1x1x32x32xf32>
    %400 = vector.shape_cast %399 : vector<1x1x32x32xf32> to vector<32x32xf32>
    %401 = arith.addf %398, %400 : vector<32x32xf32>
    %cst_179 = arith.constant dense<0xFF800000> : vector<32xf32>
    %402 = vector.multi_reduction <maximumf>, %401, %cst_179 [1] : vector<32x32xf32> to vector<32xf32>
    %403 = vector.shape_cast %402 : vector<32xf32> to vector<32x1xf32>
    %404 = vector.broadcast %403 : vector<32x1xf32> to vector<32x32xf32>
    %405 = arith.subf %401, %404 : vector<32x32xf32>
    %406 = math.exp %405 : vector<32x32xf32>
    %cst_180 = arith.constant dense<0.000000e+00> : vector<32xf32>
    %407 = vector.multi_reduction <add>, %406, %cst_180 [1] : vector<32x32xf32> to vector<32xf32>
    %408 = vector.shape_cast %407 : vector<32xf32> to vector<32x1xf32>
    %409 = tpu.reciprocal %408 {approx = true} : vector<32x1xf32> -> vector<32x1xf32>
    %410 = vector.broadcast %409 : vector<32x1xf32> to vector<32x32xf32>
    %411 = arith.mulf %406, %410 : vector<32x32xf32>
    %cst_181 = arith.constant dense<0.000000e+00> : vector<32x8xf32>
    %412 = tpu.matmul %411, %396, %cst_181 {dimension_numbers = #tpu.dot_dimension_numbers<[1], [0], [0], [1], [0, 0, 1, 1], [], []>} : vector<32x32xf32>, vector<32x8xf32>, vector<32x8xf32> -> vector<32x8xf32>
    %413 = vector.extract_strided_slice %9 {offsets = [24, 0], sizes = [8, 32], strides = [1, 1]} : vector<32x32xf32> to vector<8x32xf32>
    %cst_182 = arith.constant dense<0.000000e+00> : vector<32x32xf32>
    %414 = tpu.matmul %412, %413, %cst_182 {dimension_numbers = #tpu.dot_dimension_numbers<[1], [0], [0], [1], [0, 0, 1, 1], [], []>} : vector<32x8xf32>, vector<8x32xf32>, vector<32x32xf32> -> vector<32x32xf32>
    %415 = arith.addf %391, %414 : vector<32x32xf32>
    %416 = vector.shape_cast %11 : vector<32xf32> to vector<1x32xf32>
    %417 = vector.broadcast %416 : vector<1x32xf32> to vector<32x32xf32>
    %418 = arith.addf %415, %417 : vector<32x32xf32>
    %c96_183 = arith.constant 96 : index
    %c0_184 = arith.constant 0 : index
    %419 = vector.load %arg7[%c96_183, %c0_184] : memref<128x32xf32, #tpu.memory_space<vmem>>, vector<32x32xf32>
    tpu.vector_store %arg7[%c96_183, %c0_184], %418 {strides = array<i32>} : memref<128x32xf32, #tpu.memory_space<vmem>>, vector<32x32xf32>,
    return
  }
  func.func @transform_0(%arg0: i32) -> (i32, i32) {
    %c0_i32 = arith.constant 0 : i32
    %c0_i32_0 = arith.constant 0 : i32
    return %arg0, %c0_i32 : i32, i32
  }
  func.func @transform_1(%arg0: i32) -> (i32, i32) {
    %c0_i32 = arith.constant 0 : i32
    %c0_i32_0 = arith.constant 0 : i32
    %c0_i32_1 = arith.constant 0 : i32
    return %c0_i32, %c0_i32_0 : i32, i32
  }
  func.func @transform_2(%arg0: i32) -> (i32, i32) {
    %c0_i32 = arith.constant 0 : i32
    %c0_i32_0 = arith.constant 0 : i32
    %c0_i32_1 = arith.constant 0 : i32
    return %c0_i32, %c0_i32_0 : i32, i32
  }
  func.func @transform_3(%arg0: i32) -> (i32, i32) {
    %c0_i32 = arith.constant 0 : i32
    %c0_i32_0 = arith.constant 0 : i32
    %c0_i32_1 = arith.constant 0 : i32
    return %c0_i32, %c0_i32_0 : i32, i32
  }
  func.func @transform_4(%arg0: i32) -> (i32, i32) {
    %c0_i32 = arith.constant 0 : i32
    %c0_i32_0 = arith.constant 0 : i32
    %c0_i32_1 = arith.constant 0 : i32
    return %c0_i32, %c0_i32_0 : i32, i32
  }
  func.func @transform_5(%arg0: i32) -> (i32, i32, i32, i32) {
    %c0_i32 = arith.constant 0 : i32
    %c0_i32_0 = arith.constant 0 : i32
    %c0_i32_1 = arith.constant 0 : i32
    %c0_i32_2 = arith.constant 0 : i32
    %c0_i32_3 = arith.constant 0 : i32
    return %c0_i32, %c0_i32_0, %c0_i32_1, %c0_i32_2 : i32, i32, i32, i32
  }
  func.func @transform_6(%arg0: i32) -> (i32, i32) {
    %c0_i32 = arith.constant 0 : i32
    %c0_i32_0 = arith.constant 0 : i32
    return %arg0, %c0_i32 : i32, i32
  }
}

</mosaic_0001>

<bundles_post_ra>
// kernel: tpu_custom_call.1
= control target key start
LH: loop header
LB: loop body
LE: loop exit
PB: predicated region body
PF: predicated region fallthrough
CT: control target
= control target key end

     0   :  { %s8948_s21 = smov 0   ;;  %s10584_s0 = inlined_call_operand.vmem [shape: f32[256,32], index: 0, kind: input, shape index: {}]   ;;  %s10585_s1 = inlined_call_operand.vmem [shape: f32[32,96], index: 1, kind: input, shape index: {}]   ;;  %s10586_s2 = inlined_call_operand.vmem [shape: f32[1,96], index: 2, kind: input, shape index: {}]   ;;  %s10587_s3 = inlined_call_operand.vmem [shape: f32[32,32], index: 3, kind: input, shape index: {}]   ;;  %s10588_s4 = inlined_call_operand.vmem [shape: f32[1,32], index: 4, kind: input, shape index: {}]   ;;  %s10589_s5 = inlined_call_operand.vmem [shape: f32[2,4,32,32], index: 5, kind: input, shape index: {}]   ;;  %s10590_s6 = inlined_call_operand.vmem [shape: f32[256,32], index: 6, kind: output, shape index: {}]  }
   0x1 LB: > { %s6600_s22 = sadd.s32 4294967295, %s8900_s21   ;;  %p6604_p0 = scmp.ge.s32.totalorder %s8900_s21, 1  ;;  %s8900_s21 = sphi %s8948_s21, %s16_s21  }
   0x2   : > { %p213_p1 = scmp.lt.s32.totalorder %s8900_s21, 3 }
   0x4   : > { %p214_p2 = pnand %p6604_p0, %p213_p1 }
   0x5   : > { %v271_v0 = vld [vmem:[%s10585_s1] sm:$0xff] (!%p214_p2)  ;;  %v272_v1 = vld [vmem:[%s10585_s1 + $0x8] sm:$0xff] (!%p214_p2)  ;;  %v273_v2 = vld [vmem:[%s10585_s1 + $0x10] sm:$0xff] (!%p214_p2)  ;;  %s6605_s29 = sshll.u32 (!%p214_p2), %s6600_s22, 4  ;;  %vm282_vm0 = vcmask (!%p214_p2), 261120   ;;  %vm476_vm1 = vcmask (!%p214_p2), 785408  }
   0x6   : > { %217 = sbr.rel (%p214_p2) target bundleno = 4474 (0x117a), region = 44  ;;  %v7905_v3 = vpack.c.bf16 (!%p214_p2), %v272_v1, %v271_v0  ;;  %v274_v4 = vld [vmem:[%s10585_s1 + $0x18] sm:$0xff] (!%p214_p2)  ;;  %p244_p3 = scmp.lt.s32.totalorder (!%p214_p2), %s6605_s29, 31  ;;  %v9005_v18 = vld [vmem:[%s10586_s2] ss:$0 sm:$0xff] (!%p214_p2)  ;;  %vm522_vm2 = vcmask (!%p214_p2), 64512  }
   0x7   : > { %v7909_v5 = vpack.c.bf16 (!%p214_p2), %v274_v4, %v273_v2  ;;  %s8902_s14 = smov (!%p214_p2), 88   ;;  %s8903_s15 = smov (!%p214_p2), 96   ;;  %vm9072_vm3 = vmpackc.low (!%p214_p2), %vm522_vm2, %vm522_vm2 }
   0x8   : > { %7906 = vmatprep.subr.bf16.mxu0 (!%p214_p2), %v7905_v3  ;;  %s8904_s16 = smov (!%p214_p2), 120   ;;  %s8905_s17 = smov (!%p214_p2), 80  }
   0x9   : > { %7908 = vmatpush3.bf16.msra.mxu0 (!%p214_p2), %v7905_v3  ;;  %s8906_s18 = smov (!%p214_p2), 112   ;;  %s8907_s19 = smov (!%p214_p2), 64  }
   0xa   : > { %7910 = vmatprep.subr.bf16.mxu0 (!%p214_p2), %v7909_v5  ;;  %s8908_s20 = smov (!%p214_p2), 56   ;;  %s8909_s22 = smov (!%p214_p2), 72  }
   0xb   : > { %s8910_s23 = smov (!%p214_p2), 104   ;;  %s8911_s10 = smov (!%p214_p2), 48  }
   0xc   : > { %s8912_s24 = smov (!%p214_p2), 40  }
   0xd   : > { %s10594_s29 = smov (!%p244_p3, %s6605_s29), 31  ;;  %7912 = vmatpush3.bf16.msra.mxu0 %v7909_v5 }
   0xe   : > { %s6606_s8 = sshll.u32 %s10594_s29, 3 }
   0xf   : > { %s8976_s11 = scalar_lea.vmem %s10584_s0, %s6606_s8  ;;  %s9748_s25 = scalar_lea.vmem %s10590_s6, %s6606_s8 }
  0x10   : > { %v255_v6 = vld [vmem:[%s8976_s11] sm:$0xff]  ;;  %v256_v7 = vld [vmem:[%s8976_s11 + $0x8] sm:$0xff]  ;;  %v257_v8 = vld [vmem:[%s8976_s11 + $0x10] sm:$0xff] }
  0x11   : > { %7305 = vmatprep.mubr.msk.f32.mxu0 %vm282_vm0, %v255_v6  ;;  %v258_v9 = vld [vmem:[%s8976_s11 + $0x18] sm:$0xff]  ;;  %v259_v10 = vld [vmem:[%s8976_s11 + $0x20] sm:$0xff]  ;;  %v260_v11 = vld [vmem:[%s8976_s11 + $0x28] sm:$0xff] }
  0x12   : > { %7306 = vmatmul.mubr.msk.f32.vlgmr.msra.gmra.mrb[0].mxu0 %vm282_vm0, %v256_v7  ;;  %v261_v12 = vld [vmem:[%s8976_s11 + $0x30] sm:$0xff]  ;;  %v262_v13 = vld [vmem:[%s8976_s11 + $0x38] sm:$0xff]  ;;  %v263_v14 = vld [vmem:[%s8976_s11 + $0x40] sm:$0xff] }
  0x13   : > { %7308 = vmatprep.mubr.msk.f32.mxu0 %vm282_vm0, %v257_v8  ;;  %v264_v15 = vld [vmem:[%s8976_s11 + $0x48] sm:$0xff]  ;;  %v265_v16 = vld [vmem:[%s8976_s11 + $0x50] sm:$0xff]  ;;  %v266_v17 = vld [vmem:[%s8976_s11 + $0x58] sm:$0xff] }
  0x14   : > { %v267_v23 = vld [vmem:[%s8976_s11 + $0x60] sm:$0xff]  ;;  %v268_v24 = vld [vmem:[%s8976_s11 + $0x68] sm:$0xff]  ;;  %v269_v29 = vld [vmem:[%s8976_s11 + $0x70] sm:$0xff] }
  0x15   : > { %v270_v30 = vld [vmem:[%s8976_s11 + $0x78] sm:$0xff] }
  0x16   : > { %7309 = vmatmul.mubr.msk.f32.gmra.mrb[2].mxu0 %vm282_vm0, %v258_v9 }
  0x17   : > { %7311 = vmatprep.mubr.msk.f32.mxu0 %vm282_vm0, %v259_v10 }
  0x1a   : > { %7312 = vmatmul.mubr.msk.f32.gmra.mrb[4].mxu0 %vm282_vm0, %v260_v11 }
  0x1b   : > { %7314 = vmatprep.mubr.msk.f32.mxu0 %vm282_vm0, %v261_v12 }
  0x1e   : > { %7315 = vmatmul.mubr.msk.f32.gmra.mrb[6].mxu0 %vm282_vm0, %v262_v13 }
  0x1f   : > { %7317 = vmatprep.mubr.msk.f32.mxu0 %vm282_vm0, %v263_v14 }
  0x22   : > { %7318 = vmatmul.mubr.msk.f32.gmra.mrb[8].mxu0 %vm282_vm0, %v264_v15 }
  0x23   : > { %7320 = vmatprep.mubr.msk.f32.mxu0 %vm282_vm0, %v265_v16 }
  0x26   : > { %7321 = vmatmul.mubr.msk.f32.gmra.mrb[10].mxu0 %vm282_vm0, %v266_v17 }
  0x27   : > { %7323 = vmatprep.mubr.msk.f32.mxu0 %vm282_vm0, %v267_v23 }
  0x2a   : > { %7324 = vmatmul.mubr.msk.f32.gmra.mrb[12].mxu0 %vm282_vm0, %v268_v24 }
  0x2b   : > { %7326 = vmatprep.mubr.msk.f32.mxu0 %vm282_vm0, %v269_v29 }
  0x2e   : > { %7327 = vmatmul.mubr.msk.f32.gmra.mrb[14].mxu0 %vm282_vm0, %v270_v30 }
  0xe5   : > { %v7307_v19 = vpop.f32.mrb[0].mxu0 }
  0xe6   : > { %v403_v20 = vadd.f32 %v7307_v19, %v9005_v18  ;;  %v397_v21 = vpop.f32.mrb[1].mxu0 }
  0xe7   : > { %v398_v22 = vadd.f32 %v9005_v18, %v397_v21 }
  0xe8   : > { %478 = vst.msk [vmem:[#allocation2 + $0x8] sm:$0xff] %vm476_vm1, %v403_v20 }
  0xe9   : > { %477 = vst.msk [vmem:[#allocation2] sm:$0xff] %vm476_vm1, %v398_v22  ;;  %v7310_v25 = vpop.f32.mrb[2].mxu0 }
  0xea   : > { %v413_v26 = vadd.f32 %v7310_v25, %v9005_v18  ;;  %v407_v27 = vpop.f32.mrb[3].mxu0 }
  0xeb   : > { %v408_v28 = vadd.f32 %v9005_v18, %v407_v27 }
  0xec   : > { %480 = vst.msk [vmem:[#allocation2 + $0x18] sm:$0xff] %vm476_vm1, %v413_v26 }
  0xed   : > { %479 = vst.msk [vmem:[#allocation2 + $0x10] sm:$0xff] %vm476_vm1, %v408_v28  ;;  %v7313_v41 = vpop.f32.mrb[4].mxu0 }
  0xee   : > { %v423_v42 = vadd.f32 %v7313_v41, %v9005_v18  ;;  %v417_v43 = vpop.f32.mrb[5].mxu0 }
  0xef   : > { %v499_v31 = vld [vmem:[#allocation2 + $0x8] sm:$0xff]  ;;  %v418_v44 = vadd.f32 %v9005_v18, %v417_v43 }
  0xf0   : > { %v498_v32 = vld [vmem:[#allocation2] sm:$0xff]  ;;  %v9039_v38 = vmul.f32 0.35355338, %v499_v31  ;;  %482 = vst.msk [vmem:[#allocation2 + $0x28] sm:$0xff] %vm476_vm1, %v423_v42 }
  0xf1   : > { %v9023_v33 = vpack.i.bf16 %v499_v31, %v498_v32  ;;  %v9025_v34 = vmul.f32 0.35355338, %v498_v32  ;;  %481 = vst.msk [vmem:[#allocation2 + $0x20] sm:$0xff] %vm476_vm1, %v418_v44  ;;  %v7316_v45 = vpop.f32.mrb[6].mxu0 }
  0xf2   : > { %v433_v48 = vadd.f32 %v7316_v45, %v9005_v18  ;;  %v427_v53 = vpop.f32.mrb[7].mxu0 }
  0xf3   : > { %8315 = vrot.lane.b32.xlu1 %v9023_v33, %s8902_s14  ;;  %8305 = vrot.lane.b32.xlu0 %v9023_v33, %s8903_s15  ;;  %v501_v35 = vld [vmem:[#allocation2 + $0x18] sm:$0xff]  ;;  %v428_v55 = vadd.f32 %v9005_v18, %v427_v53 }
  0xf4   : > { %7337 = vmatprep.mubr.msk.f32.mxu1 %vm522_vm2, %v9025_v34  ;;  %v500_v36 = vld [vmem:[#allocation2 + $0x10] sm:$0xff]  ;;  %v9045_v39 = vmul.f32 0.35355338, %v501_v35  ;;  %484 = vst.msk [vmem:[#allocation2 + $0x38] sm:$0xff] %vm476_vm1, %v433_v48 }
  0xf5   : > { %v9033_v37 = vpack.i.bf16 %v501_v35, %v500_v36  ;;  %v9047_v40 = vmul.f32 0.35355338, %v500_v36  ;;  %v7319_v58 = vpop.f32.mrb[8].mxu0  ;;  %483 = vst.msk [vmem:[#allocation2 + $0x30] sm:$0xff] %vm476_vm1, %v428_v55 }
  0xf6   : > { %v443_v61 = vadd.f32 %v7319_v58, %v9005_v18  ;;  %v437_v2 = vpop.f32.mrb[9].mxu0 }
  0xf7   : > { %8320 = vrot.lane.b32.xlu1 %v9033_v37, %s8902_s14  ;;  %8310 = vrot.lane.b32.xlu0 %v9033_v37, %s8903_s15  ;;  %v438_v3 = vadd.f32 %v9005_v18, %v437_v2  ;;  %v9134_v42 = vld [vmem:[#allocation2 + $0x28] sm:$0xff] }
  0xf8   : > { %486 = vst.msk [vmem:[#allocation2 + $0x48] sm:$0xff] %vm476_vm1, %v443_v61  ;;  %v9132_v41 = vld [vmem:[#allocation2 + $0x20] sm:$0xff] }
  0xf9   : > { %v7322_v6 = vpop.f32.mrb[10].mxu0  ;;  %485 = vst.msk [vmem:[#allocation2 + $0x40] sm:$0xff] %vm476_vm1, %v438_v3  ;;  %v9139_v43 = vpack.i.bf16 %v9134_v42, %v9132_v41 }
  0xfa   : > { %v453_v9 = vadd.f32 %v7322_v6, %v9005_v18  ;;  %v447_v10 = vpop.f32.mrb[11].mxu0  ;;  %v508_v6 = vld [vmem:[%s10589_s5 + $0x10] sm:$0xff] }
  0xfb   : > { %788 = vrot.lane.b32.xlu1 %v9039_v38, %s8904_s16  ;;  %786 = vrot.lane.b32.xlu0 %v9025_v34, %s8904_s16  ;;  %v448_v11 = vadd.f32 %v9005_v18, %v447_v10  ;;  %v9143_v45 = vld [vmem:[#allocation2 + $0x38] sm:$0xff] }
  0xfc   : > { %488 = vst.msk [vmem:[#allocation2 + $0x58] sm:$0xff] %vm476_vm1, %v453_v9  ;;  %v9141_v44 = vld [vmem:[#allocation2 + $0x30] sm:$0xff] }
  0xfd   : > { %487 = vst.msk [vmem:[#allocation2 + $0x50] sm:$0xff] %vm476_vm1, %v448_v11  ;;  %v7325_v27 = vpop.f32.mrb[12].mxu0  ;;  %v6640_v9 = vld [vmem:[%s10589_s5 + $0x30] sm:$0xff]  ;;  %v509_v11 = vld [vmem:[%s10589_s5 + $0x18] sm:$0xff] }
  0xfe   : > { %v463_v28 = vadd.f32 %v7325_v27, %v9005_v18  ;;  %v457_v29 = vpop.f32.mrb[13].mxu0 }
  0xff   : > { %792 = vrot.lane.b32.xlu1 %v9045_v39, %s8904_s16  ;;  %790 = vrot.lane.b32.xlu0 %v9047_v40, %s8904_s16  ;;  %v458_v30 = vadd.f32 %v9005_v18, %v457_v29 }
 0x100   : > { %490 = vst.msk [vmem:[#allocation2 + $0x68] sm:$0xff] %vm476_vm1, %v463_v28 }
 0x101   : > { %489 = vst.msk [vmem:[#allocation2 + $0x60] sm:$0xff] %vm476_vm1, %v458_v30  ;;  %v7328_v31 = vpop.f32.mrb[14].mxu0 }
 0x102   : > { %v473_v32 = vadd.f32 %v7328_v31, %v9005_v18  ;;  %v467_v35 = vpop.f32.mrb[15].mxu0 }
 0x103   : > { %8330 = vrot.lane.b32.xlu1 %v9033_v37, %s8905_s17  ;;  %8325 = vrot.lane.b32.xlu0 %v9023_v33, %s8905_s17  ;;  %v468_v36 = vadd.f32 %v9005_v18, %v467_v35  ;;  %v3528_v18 = vld [vmem:[#allocation2 + $0x40] sm:$0xff] }
 0x104   : > { %492 = vst.msk [vmem:[#allocation2 + $0x78] sm:$0xff] %vm476_vm1, %v473_v32 }
 0x105   : > { %491 = vst.msk [vmem:[#allocation2 + $0x70] sm:$0xff] %vm476_vm1, %v468_v36 }
 0x107   : > { %1257 = vrot.lane.b32.xlu1 %v9039_v38, %s8906_s18  ;;  %1255 = vrot.lane.b32.xlu0 %v9025_v34, %s8906_s18  ;;  %v5037_v53 = vld [vmem:[#allocation2 + $0x68] sm:$0xff] }
 0x10b   : > { %1261 = vrot.lane.b32.xlu1 %v9045_v39, %s8906_s18  ;;  %1259 = vrot.lane.b32.xlu0 %v9047_v40, %s8906_s18 }
 0x165   : > { %v8316_v46 = vpop.permute.xlu1 %8315  ;;  %v8306_v47 = vpop.permute.xlu0 %8305 }
 0x166   : > { %v8318_v49 = vunpack.i.h.bf16 %v8316_v46  ;;  %v8317_v50 = vunpack.i.l.bf16 %v8316_v46  ;;  %v8308_v51 = vunpack.i.h.bf16 %v8306_v47  ;;  %v8307_v52 = vunpack.i.l.bf16 %v8306_v47  ;;  %v3529_v47 = vld [vmem:[#allocation2 + $0x48] sm:$0xff] }
 0x167   : > { %v9147_v46 = vpack.i.bf16 %v9143_v45, %v9141_v44  ;;  %v9149_v48 = vpack.i.bf16 %v3529_v47, %v3528_v18 }
 0x168   : > { %v7933_v56 = vpack.c.bf16 %v8318_v49, %v8317_v50  ;;  %v7913_v57 = vpack.c.bf16 %v8308_v51, %v8307_v52  ;;  %v3530_v49 = vld [vmem:[#allocation2 + $0x50] sm:$0xff]  ;;  %v3531_v50 = vld [vmem:[#allocation2 + $0x58] sm:$0xff]  ;;  %v5036_v52 = vld [vmem:[#allocation2 + $0x60] sm:$0xff] }
 0x169   : > { %v8321_v59 = vpop.permute.xlu1 %8320  ;;  %v8311_v60 = vpop.permute.xlu0 %8310  ;;  %v9151_v51 = vpack.i.bf16 %v3531_v50, %v3530_v49  ;;  %v9153_v55 = vpack.i.bf16 %v5037_v53, %v5036_v52 }
 0x16a   : > { %v8323_v62 = vunpack.i.h.bf16 %v8321_v59  ;;  %v8322_v63 = vunpack.i.l.bf16 %v8321_v59  ;;  %v8313_v0 = vunpack.i.h.bf16 %v8311_v60  ;;  %v8312_v1 = vunpack.i.l.bf16 %v8311_v60  ;;  %7915 = vmatprep.subr.msk.bf16.mxu1 %vm9072_vm3, %v7913_v57  ;;  %7935 = vmatprep.subr.msk.bf16.mxu0 %vm9072_vm3, %v7933_v56  ;;  %v507_v59 = vld [vmem:[%s10589_s5 + $0x8] sm:$0xff]  ;;  %v506_v60 = vld [vmem:[%s10589_s5] sm:$0xff] }
 0x16b   : > { %7918 = vmatpush3.bf16.xpose.msk.msra.mxu1 %vm9072_vm3, %v7913_v57  ;;  %7938 = vmatpush3.bf16.xpose.msk.msra.mxu0 %vm9072_vm3, %v7933_v56  ;;  %v5038_v56 = vld [vmem:[#allocation2 + $0x70] sm:$0xff]  ;;  %v5039_v57 = vld [vmem:[#allocation2 + $0x78] sm:$0xff] }
 0x16c   : > { %v7939_v4 = vpack.c.bf16 %v8323_v62, %v8322_v63  ;;  %v7919_v5 = vpack.c.bf16 %v8313_v0, %v8312_v1  ;;  %v9155_v58 = vpack.i.bf16 %v5039_v57, %v5038_v56  ;;  %v6638_v63 = vld [vmem:[%s10589_s5 + $0x20] sm:$0xff] }
 0x16d   : > { %v789_v7 = vpop.permute.xlu1 %788  ;;  %v787_v8 = vpop.permute.xlu0 %786 }
 0x16e   : > { %7365 = vmatprep.mubr.msk.f32.mxu0 %vm522_vm2, %v787_v8  ;;  %7921 = vmatprep.subr.msk.bf16.mxu1 %vm9072_vm3, %v7919_v5 }
 0x16f   : > { %7941 = vmatprep.subr.msk.bf16.mxu0 %vm9072_vm3, %v7939_v4 }
 0x171   : > { %v793_v12 = vpop.permute.xlu1 %792  ;;  %v791_v13 = vpop.permute.xlu0 %790 }
 0x173   : > { %7924 = vmatpush3.bf16.xpose.msk.msra.mxu1 %vm9072_vm3, %v7919_v5  ;;  %7944 = vmatpush3.bf16.xpose.msk.msra.mxu0 %vm9072_vm3, %v7939_v4 }
 0x175   : > { %v8331_v14 = vpop.permute.xlu1 %8330  ;;  %v8326_v15 = vpop.permute.xlu0 %8325 }
 0x176   : > { %v8328_v16 = vunpack.i.h.bf16 %v8326_v15  ;;  %v8327_v17 = vunpack.i.l.bf16 %v8326_v15  ;;  %v8333_v19 = vunpack.i.h.bf16 %v8331_v14  ;;  %v8332_v20 = vunpack.i.l.bf16 %v8331_v14 }
 0x178   : > { %v7953_v21 = vpack.c.bf16 %v8328_v16, %v8327_v17  ;;  %v7959_v22 = vpack.c.bf16 %v8333_v19, %v8332_v20  ;;  %v6639_v20 = vld [vmem:[%s10589_s5 + $0x28] sm:$0xff] }
 0x179   : > { %v1256_v23 = vpop.permute.xlu0 %1255  ;;  %v1258_v24 = vpop.permute.xlu1 %1257 }
 0x17a   : > { %7338 = vmatmul.mubr.msk.f32.vlgmr.msra.gmra.mrb[0].mxu1 %vm522_vm2, %v9039_v38  ;;  %7366 = vmatmul.mubr.msk.f32.vlgmr.msra.gmra.mrb[16].mxu0 %vm522_vm2, %v789_v7 }
 0x17b   : > { %7955 = vmatprep.subr.msk.bf16.mxu0 %vm9072_vm3, %v7953_v21  ;;  %7340 = vmatprep.mubr.msk.f32.mxu1 %vm522_vm2, %v9047_v40 }
 0x17c   : > { %7368 = vmatprep.mubr.msk.f32.mxu0 %vm522_vm2, %v791_v13  ;;  %7958 = vmatpush3.bf16.xpose.msk.msra.mxu0 %vm9072_vm3, %v7953_v21 }
 0x17d   : > { %7961 = vmatprep.subr.msk.bf16.mxu0 %vm9072_vm3, %v7959_v22  ;;  %v1260_v25 = vpop.permute.xlu0 %1259  ;;  %v1262_v26 = vpop.permute.xlu1 %1261 }
 0x17e   : > { %7341 = vmatmul.mubr.msk.f32.gmra.mrb[2].mxu1 %vm522_vm2, %v9045_v39  ;;  %7369 = vmatmul.mubr.msk.f32.gmra.mrb[18].mxu0 %vm522_vm2, %v793_v12 }
 0x17f   : > { %7409 = vmatprep.mubr.msk.f32.mxu0 %vm522_vm2, %v1256_v23 }
 0x184   : > { %7964 = vmatpush3.bf16.xpose.msk.msra.mxu0 %vm9072_vm3, %v7959_v22 }
 0x18b   : > { %7410 = vmatmul.mubr.msk.f32.vlgmr.msra.gmra.mrb[20].mxu0 %vm522_vm2, %v1258_v24  ;;  %v6641_v24 = vld [vmem:[%s10589_s5 + $0x38] sm:$0xff] }
 0x18c   : > { %7412 = vmatprep.mubr.msk.f32.mxu0 %vm522_vm2, %v1260_v25 }
 0x18f   : > { %7413 = vmatmul.mubr.msk.f32.gmra.mrb[22].mxu0 %vm522_vm2, %v1262_v26 }
 0x24d   : > { %v7339_v61 = vpop.f32.mrb[0].mxu1  ;;  %v7367_v62 = vpop.f32.mrb[16].mxu0 }
 0x24e   : > { %v615_v0 = vadd.f32 %v7339_v61, %v507_v59  ;;  %v609_v1 = vpop.f32.mrb[1].mxu1  ;;  %v884_v2 = vpop.f32.mrb[17].mxu0  ;;  %v890_v22 = vadd.f32 %v7367_v62, %v6639_v20 }
 0x24f   : > { %v610_v3 = vadd.f32 %v609_v1, %v506_v60  ;;  %v885_v4 = vadd.f32 %v6638_v63, %v884_v2 }
 0x250   : > { %v631_v5 = vsel %vm282_vm0, %v615_v0, -inf  ;;  %v906_v26 = vsel %vm282_vm0, %v890_v22, -inf }
 0x251   : > { %v7370_v7 = vpop.f32.mrb[18].mxu0  ;;  %632 = vmax.xlane.f32.xlu1 %v631_v5  ;;  %v7342_v8 = vpop.f32.mrb[2].mxu1  ;;  %v628_v10 = vsel %vm282_vm0, %v610_v3, -inf  ;;  %v903_v16 = vsel %vm282_vm0, %v885_v4, -inf }
 0x252   : > { %v619_v12 = vpop.f32.mrb[3].mxu1  ;;  %v894_v13 = vpop.f32.mrb[19].mxu0  ;;  %629 = vmax.xlane.f32.xlu0 %v628_v10  ;;  %v625_v17 = vadd.f32 %v7342_v8, %v509_v11  ;;  %v900_v25 = vadd.f32 %v7370_v7, %v6641_v24 }
 0x253   : > { %v9177_v14 = vadd.f32 %v619_v12, %v508_v6  ;;  %v9179_v15 = vadd.f32 %v6640_v9, %v894_v13 }
 0x254   : > { %v637_v23 = vsel %vm282_vm0, %v625_v17, -inf  ;;  %v912_v29 = vsel %vm282_vm0, %v900_v25, -inf }
 0x255   : > { %904 = vmax.xlane.f32.xlu1 %v903_v16  ;;  %v634_v19 = vsel %vm282_vm0, %v9177_v14, -inf  ;;  %v909_v21 = vsel %vm282_vm0, %v9179_v15, -inf }
 0x256   : > { %635 = vmax.xlane.f32.xlu0 %v634_v19 }
 0x259   : > { %910 = vmax.xlane.f32.xlu1 %v909_v21 }
 0x25a   : > { %638 = vmax.xlane.f32.xlu0 %v637_v23 }
 0x25e   : > { %v9194_v27 = vpop.f32.mrb[20].mxu0  ;;  %907 = vmax.xlane.f32.xlu0 %v906_v26 }
 0x25f   : > { %v9196_v28 = vpop.f32.mrb[21].mxu0 }
 0x262   : > { %v9199_v30 = vpop.f32.mrb[22].mxu0  ;;  %913 = vmax.xlane.f32.xlu0 %v912_v29 }
 0x263   : > { %v9201_v31 = vpop.f32.mrb[23].mxu0 }
 0x26a   : > { %8335 = vrot.lane.b32.xlu1 %v9023_v33, %s8907_s19 }
 0x2de   : > { %v633_v32 = vpop.xlane.xlu1 %632 }
 0x2df   : > { %v641_v35 = vsub.f32 %v615_v0, %v633_v32  ;;  %v630_v36 = vpop.xlane.xlu0 %629 }
 0x2e0   : > { %v640_v18 = vsub.f32 %v610_v3, %v630_v36 }
 0x2e1   : > { %v646_v47 = vmul.f32 1.442695, %v641_v35  ;;  %v6662_v35 = vld [vmem:[%s10589_s5 + $0x40] sm:$0xff] }
 0x2e2   : > { %v644_v49 = vmul.f32 1.442695, %v640_v18  ;;  %v905_v50 = vpop.xlane.xlu1 %904 }
 0x2e3   : > { %8624 = vpow2.f32 %v646_v47  ;;  %v915_v52 = vsub.f32 %v885_v4, %v905_v50  ;;  %v636_v53 = vpop.xlane.xlu0 %635  ;;  %v6665_v47 = vld [vmem:[%s10589_s5 + $0x58] sm:$0xff]  ;;  %v6663_v50 = vld [vmem:[%s10589_s5 + $0x48] sm:$0xff] }
 0x2e4   : > { %8626 = vpow2.f32 %v644_v49  ;;  %v642_v23 = vsub.f32 %v9177_v14, %v636_v53 }
 0x2e5   : > { %v919_v56 = vmul.f32 1.442695, %v915_v52 }
 0x2e6   : > { %v911_v57 = vpop.xlane.xlu1 %910  ;;  %v648_v24 = vmul.f32 1.442695, %v642_v23 }
 0x2e7   : > { %8628 = vpow2.f32 %v919_v56  ;;  %v639_v59 = vpop.xlane.xlu0 %638 }
 0x2e8   : > { %v643_v60 = vsub.f32 %v625_v17, %v639_v59 }
 0x2ea   : > { %v8336_v61 = vpop.permute.xlu1 %8335  ;;  %v650_v6 = vmul.f32 1.442695, %v643_v60 }
 0x2eb   : > { %v8338_v62 = vunpack.i.h.bf16 %v8336_v61  ;;  %v8337_v63 = vunpack.i.l.bf16 %v8336_v61  ;;  %v908_v1 = vpop.xlane.xlu0 %907 }
 0x2ec   : > { %v916_v2 = vsub.f32 %v890_v22, %v908_v1 }
 0x2ed   : > { %v9205_v0 = vpop.eup %8624  ;;  %v7925_v3 = vpack.c.bf16 %v8338_v62, %v8337_v63 }
 0x2ee   : > { %v9207_v5 = vpop.eup %8626  ;;  %v921_v7 = vmul.f32 1.442695, %v916_v2  ;;  %v655_v4 = vsel %vm282_vm0, %v9205_v0, 0.0 }
 0x2ef   : > { %7926 = vmatprep.subr.bf16.mxu1 %v7925_v3  ;;  %656 = vadd.xlane.f32.xlu0 %v655_v4  ;;  %v914_v8 = vpop.xlane.xlu0 %913  ;;  %v652_v9 = vsel %vm282_vm0, %v9207_v5, 0.0 }
 0x2f0   : > { %8630 = vpow2.f32 %v921_v7  ;;  %v918_v10 = vsub.f32 %v900_v25, %v914_v8  ;;  %7928 = vmatpush3.bf16.msra.mxu1 %v7925_v3  ;;  %653 = vadd.xlane.f32.xlu1 %v652_v9  ;;  %v917_v25 = vsub.f32 %v9179_v15, %v911_v57 }
 0x2f1   : > { %v9213_v11 = vpop.eup %8628  ;;  %8632 = vpow2.f32 %v650_v6 }
 0x2f2   : > { %v925_v12 = vmul.f32 1.442695, %v918_v10  ;;  %v927_v13 = vsel %vm282_vm0, %v9213_v11, 0.0  ;;  %v923_v26 = vmul.f32 1.442695, %v917_v25 }
 0x2f4   : > { %928 = vadd.xlane.f32.xlu1 %v927_v13  ;;  %8634 = vpow2.f32 %v925_v12 }
 0x2f5   : > { %8636 = vpow2.f32 %v648_v24 }
 0x2f6   : > { %8638 = vpow2.f32 %v923_v26 }
 0x2fa   : > { %v9217_v16 = vpop.eup %8630 }
 0x2fb   : > { %v930_v17 = vsel %vm282_vm0, %v9217_v16, 0.0  ;;  %v9221_v19 = vpop.eup %8632 }
 0x2fc   : > { %931 = vadd.xlane.f32.xlu0 %v930_v17  ;;  %v661_v20 = vsel %vm282_vm0, %v9221_v19, 0.0 }
 0x2fe   : > { %v9225_v21 = vpop.eup %8634 }
 0x2ff   : > { %v936_v22 = vsel %vm282_vm0, %v9225_v21, 0.0  ;;  %v9239_v29 = vpop.eup %8636 }
 0x300   : > { %662 = vadd.xlane.f32.xlu0 %v661_v20  ;;  %v658_v14 = vsel %vm282_vm0, %v9239_v29, 0.0  ;;  %v9245_v15 = vpop.eup %8638 }
 0x301   : > { %v933_v32 = vsel %vm282_vm0, %v9245_v15, 0.0 }
 0x304   : > { %937 = vadd.xlane.f32.xlu0 %v936_v22 }
 0x305   : > { %8345 = vrot.lane.b32.xlu1 %v9023_v33, %s8908_s20 }
 0x31a   : > { %8340 = vrot.lane.b32.xlu0 %v9033_v37, %s8907_s19 }
 0x31e   : > { %8355 = vrot.lane.b32.xlu0 %v9023_v33, %s8909_s22 }
 0x322   : > { %1631 = vrot.lane.b32.xlu0 %v9025_v34, %s8910_s23  ;;  %v9255_v34 = vadd.f32 %v6662_v35, %v9196_v28  ;;  %v9273_v28 = vadd.f32 %v9199_v30, %v6665_v47 }
 0x324   : > { %v1372_v18 = vsel %vm282_vm0, %v9255_v34, -inf }
 0x326   : > { %1635 = vrot.lane.b32.xlu0 %v9047_v40, %s8910_s23  ;;  %v6664_v40 = vld [vmem:[%s10589_s5 + $0x50] sm:$0xff] }
 0x327   : > { %v9263_v36 = vadd.f32 %v6664_v40, %v9201_v31  ;;  %v1381_v31 = vsel %vm282_vm0, %v9273_v28, -inf }
 0x329   : > { %659 = vadd.xlane.f32.xlu1 %v658_v14  ;;  %v1378_v49 = vsel %vm282_vm0, %v9263_v36, -inf }
 0x32d   : > { %934 = vadd.xlane.f32.xlu1 %v933_v32 }
 0x33e   : > { %8350 = vrot.lane.b32.xlu1 %v9033_v37, %s8908_s20 }
 0x342   : > { %8360 = vrot.lane.b32.xlu1 %v9033_v37, %s8909_s22 }
 0x345   : > { %1373 = vmax.xlane.f32.xlu0 %v1372_v18 }
 0x346   : > { %1633 = vrot.lane.b32.xlu1 %v9039_v38, %s8910_s23  ;;  %v9285_v38 = vadd.f32 %v9194_v27, %v6663_v50 }
 0x348   : > { %v1375_v30 = vsel %vm282_vm0, %v9285_v38, -inf }
 0x349   : > { %1379 = vmax.xlane.f32.xlu0 %v1378_v49 }
 0x34a   : > { %1637 = vrot.lane.b32.xlu1 %v9045_v39, %s8910_s23 }
 0x34d   : > { %1382 = vmax.xlane.f32.xlu0 %v1381_v31 }
 0x36e   : > { %1376 = vmax.xlane.f32.xlu1 %v1375_v30 }
 0x37c   : > { %v657_v53 = vpop.xlane.xlu0 %656 }
 0x37d   : > { %v654_v52 = vpop.xlane.xlu1 %653 }
 0x37e   : > { %8640 = vrcp.f32 %v654_v52 }
 0x37f   : > { %8642 = vrcp.f32 %v657_v53 }
 0x381   : > { %v929_v59 = vpop.xlane.xlu1 %928 }
 0x382   : > { %8644 = vrcp.f32 %v929_v59 }
 0x385   : > { %v8346_v62 = vpop.permute.xlu1 %8345 }
 0x386   : > { %v8348_v63 = vunpack.i.h.bf16 %v8346_v62  ;;  %v8347_v1 = vunpack.i.l.bf16 %v8346_v62 }
 0x388   : > { %v8641_v56 = vpop.eup %8640  ;;  %v7945_v10 = vpack.c.bf16 %v8348_v63, %v8347_v1 }
 0x389   : > { %v932_v39 = vpop.xlane.xlu0 %931  ;;  %v668_v57 = vmul.f32 %v8641_v56, %v9207_v5  ;;  %v8643_v7 = vpop.eup %8642 }
 0x38a   : > { %v669_v5 = vmul.f32 %v8643_v7, %v9205_v0  ;;  %v9343_v7 = vmul.f32 0.35355338, %v9134_v42 }
 0x38b   : > { %7351 = vmatprep.mubr.msk.f32.mxu1 %vm282_vm0, %v668_v57  ;;  %v9317_v57 = vmul.f32 0.35355338, %v9132_v41 }
 0x38c   : > { %v8645_v22 = vpop.eup %8644 }
 0x38d   : > { %v663_v60 = vpop.xlane.xlu0 %662  ;;  %v943_v31 = vmul.f32 %v8645_v22, %v9213_v11 }
 0x38e   : > { %8646 = vrcp.f32 %v663_v60 }
 0x391   : > { %v938_v61 = vpop.xlane.xlu0 %937 }
 0x395   : > { %v8341_v27 = vpop.permute.xlu0 %8340 }
 0x396   : > { %v8343_v2 = vunpack.i.h.bf16 %v8341_v27  ;;  %v8342_v3 = vunpack.i.l.bf16 %v8341_v27 }
 0x398   : > { %v7929_v6 = vpack.c.bf16 %v8343_v2, %v8342_v3  ;;  %v8647_v25 = vpop.eup %8646 }
 0x399   : > { %v8356_v4 = vpop.permute.xlu0 %8355  ;;  %v671_v47 = vmul.f32 %v8647_v25, %v9221_v19 }
 0x39a   : > { %v8358_v8 = vunpack.i.h.bf16 %v8356_v4  ;;  %v8357_v9 = vunpack.i.l.bf16 %v8356_v4  ;;  %7930 = vmatprep.subr.bf16.mxu1 %v7929_v6 }
 0x39b   : > { %7932 = vmatpush3.bf16.msra.mxu1 %v7929_v6 }
 0x39c   : > { %v7973_v12 = vpack.c.bf16 %v8358_v8, %v8357_v9  ;;  %7946 = vmatprep.subr.bf16.mxu1 %v7945_v10  ;;  %v9363_v9 = vld [vmem:[%s10587_s3 + $0x8] sm:$0xff] }
 0x39d   : > { %v1632_v13 = vpop.permute.xlu0 %1631 }
 0x39e   : > { %7352 = vmatmul.mubr.msk.f32.vlgmr.msra.gmra.mrb[4].mxu1 %vm282_vm0, %v669_v5  ;;  %7975 = vmatprep.subr.msk.bf16.mxu0 %vm9072_vm3, %v7973_v12 }
 0x39f   : > { %7445 = vmatprep.mubr.msk.f32.mxu0 %vm522_vm2, %v1632_v13  ;;  %7948 = vmatpush3.bf16.msra.mxu1 %v7945_v10  ;;  %v9380_v10 = vmul.f32 0.35355338, %v9141_v44 }
 0x3a0   : > { %7978 = vmatpush3.bf16.xpose.msk.msra.mxu0 %vm9072_vm3, %v7973_v12 }
 0x3a1   : > { %v1636_v56 = vpop.permute.xlu0 %1635 }
 0x3b6   : > { %v660_v17 = vpop.xlane.xlu1 %659 }
 0x3b7   : > { %8648 = vrcp.f32 %v660_v17 }
 0x3b8   : > { %8650 = vrcp.f32 %v932_v39 }
 0x3ba   : > { %v935_v0 = vpop.xlane.xlu1 %934 }
 0x3bb   : > { %8652 = vrcp.f32 %v935_v0 }
 0x3bc   : > { %8654 = vrcp.f32 %v938_v61 }
 0x3be   : > { %v8351_v20 = vpop.permute.xlu1 %8350 }
 0x3bf   : > { %v8353_v23 = vunpack.i.h.bf16 %v8351_v20  ;;  %v8352_v24 = vunpack.i.l.bf16 %v8351_v20 }
 0x3c1   : > { %v8649_v26 = vpop.eup %8648  ;;  %v7949_v14 = vpack.c.bf16 %v8353_v23, %v8352_v24 }
 0x3c2   : > { %v8361_v32 = vpop.permute.xlu1 %8360  ;;  %v670_v35 = vmul.f32 %v8649_v26, %v9239_v29  ;;  %v8651_v49 = vpop.eup %8650 }
 0x3c3   : > { %v8363_v40 = vunpack.i.h.bf16 %v8361_v32  ;;  %v8362_v18 = vunpack.i.l.bf16 %v8361_v32  ;;  %7950 = vmatprep.subr.bf16.mxu1 %v7949_v14  ;;  %v944_v52 = vmul.f32 %v8651_v49, %v9217_v16 }
 0x3c4   : > { %7354 = vmatprep.mubr.msk.f32.mxu1 %vm282_vm0, %v670_v35  ;;  %7952 = vmatpush3.bf16.msra.mxu1 %v7949_v14 }
 0x3c5   : > { %v8653_v50 = vpop.eup %8652  ;;  %v7979_v30 = vpack.c.bf16 %v8363_v40, %v8362_v18  ;;  %7355 = vmatmul.mubr.msk.f32.gmra.mrb[6].mxu1 %vm282_vm0, %v671_v47  ;;  %7385 = vmatprep.subr.mxu1 %v9363_v9 }
 0x3c6   : > { %7379 = vmatprep.mubr.msk.f32.mxu1 %vm282_vm0, %v943_v31  ;;  %v8655_v29 = vpop.eup %8654  ;;  %v945_v19 = vmul.f32 %v8653_v50, %v9245_v15  ;;  %v1634_v53 = vpop.permute.xlu1 %1633 }
 0x3c7   : > { %7981 = vmatprep.subr.msk.bf16.mxu0 %vm9072_vm3, %v7979_v30  ;;  %v946_v11 = vmul.f32 %v8655_v29, %v9225_v21  ;;  %v6683_v29 = vld [vmem:[%s10589_s5 + $0x68] sm:$0xff] }
 0x3c8   : > { %7984 = vmatpush3.bf16.xpose.msk.msra.mxu0 %vm9072_vm3, %v7979_v30 }
 0x3c9   : > { %7380 = vmatmul.mubr.msk.f32.vlgmr.msra.gmra.mrb[8].mxu1 %vm282_vm0, %v944_v52 }
 0x3ca   : > { %7382 = vmatprep.mubr.msk.f32.mxu1 %vm282_vm0, %v945_v19  ;;  %v1638_v16 = vpop.permute.xlu1 %1637  ;;  %7386 = vmatpush3.msra.mxu1 %v9363_v9 }
 0x3cd   : > { %7383 = vmatmul.mubr.msk.f32.gmra.mrb[10].mxu1 %vm282_vm0, %v946_v11 }
 0x3cf   : > { %7446 = vmatmul.mubr.msk.f32.vlgmr.msra.gmra.mrb[24].mxu0 %vm522_vm2, %v1634_v53  ;;  %v6682_v53 = vld [vmem:[%s10589_s5 + $0x60] sm:$0xff] }
 0x3d0   : > { %7448 = vmatprep.mubr.msk.f32.mxu0 %vm522_vm2, %v1636_v56 }
 0x3d2   : > { %v1374_v39 = vpop.xlane.xlu0 %1373 }
 0x3d3   : > { %v1384_v15 = vsub.f32 %v9255_v34, %v1374_v39  ;;  %7449 = vmatmul.mubr.msk.f32.gmra.mrb[26].mxu0 %vm522_vm2, %v1638_v16 }
 0x3d4   : > { %7481 = vmatprep.mubr.msk.f32.mxu0 %vm522_vm2, %v9317_v57 }
 0x3d5   : > { %v1388_v21 = vmul.f32 1.442695, %v1384_v15 }
 0x3d6   : > { %v1380_v59 = vpop.xlane.xlu0 %1379 }
 0x3d7   : > { %8656 = vpow2.f32 %v1388_v21  ;;  %v1386_v60 = vsub.f32 %v9263_v36, %v1380_v59 }
 0x3d9   : > { %v1392_v61 = vmul.f32 1.442695, %v1386_v60 }
 0x3da   : > { %v1383_v63 = vpop.xlane.xlu0 %1382 }
 0x3db   : > { %8658 = vpow2.f32 %v1392_v61  ;;  %v1387_v36 = vsub.f32 %v9273_v28, %v1383_v63  ;;  %v6684_v63 = vld [vmem:[%s10589_s5 + $0x70] sm:$0xff] }
 0x3dd   : > { %v1394_v3 = vmul.f32 1.442695, %v1387_v36 }
 0x3e1   : > { %v9324_v62 = vpop.eup %8656 }
 0x3e2   : > { %v1396_v41 = vsel %vm282_vm0, %v9324_v62, 0.0 }
 0x3e3   : > { %1397 = vadd.xlane.f32.xlu1 %v1396_v41 }
 0x3e5   : > { %v9328_v27 = vpop.eup %8658 }
 0x3e6   : > { %v1402_v34 = vsel %vm282_vm0, %v9328_v27, 0.0 }
 0x3e7   : > { %1403 = vadd.xlane.f32.xlu1 %v1402_v34 }
 0x3f8   : > { %8365 = vrot.lane.b32.xlu1 %v9023_v33, %s8911_s10 }
 0x3fb   : > { %v1377_v1 = vpop.xlane.xlu1 %1376 }
 0x3fc   : > { %v1385_v2 = vsub.f32 %v9285_v38, %v1377_v1  ;;  %8375 = vrot.lane.b32.xlu1 %v9139_v43, %s8903_s15  ;;  %v9350_v38 = vmul.f32 0.35355338, %v9143_v45  ;;  %v9370_v45 = vld [vmem:[%s10587_s3] sm:$0xff] }
 0x3fd   : > { %7393 = vmatprep.subr.mxu1 %v9370_v45 }
 0x3fe   : > { %v1390_v6 = vmul.f32 1.442695, %v1385_v2 }
 0x400   : > { %8660 = vpow2.f32 %v1390_v6  ;;  %8380 = vrot.lane.b32.xlu1 %v9147_v46, %s8903_s15 }
 0x401   : > { %8662 = vpow2.f32 %v1394_v3 }
 0x404   : > { %8390 = vrot.lane.b32.xlu1 %v9147_v46, %s8902_s14 }
 0x408   : > { %2306 = vrot.lane.b32.xlu1 %v9343_v7, %s8904_s16 }
 0x40a   : > { %v9347_v28 = vpop.eup %8660 }
 0x40b   : > { %v1399_v4 = vsel %vm282_vm0, %v9347_v28, 0.0  ;;  %v9354_v8 = vpop.eup %8662 }
 0x40c   : > { %1400 = vadd.xlane.f32.xlu0 %v1399_v4  ;;  %2310 = vrot.lane.b32.xlu1 %v9350_v38, %s8904_s16  ;;  %v1405_v42 = vsel %vm282_vm0, %v9354_v8, 0.0  ;;  %v6685_v4 = vld [vmem:[%s10589_s5 + $0x78] sm:$0xff] }
 0x410   : > { %1406 = vadd.xlane.f32.xlu0 %v1405_v42 }
 0x426   : > { %8370 = vrot.lane.b32.xlu0 %v9033_v37, %s8911_s10 }
 0x42a   : > { %8385 = vrot.lane.b32.xlu0 %v9139_v43, %s8902_s14 }
 0x42e   : > { %2304 = vrot.lane.b32.xlu0 %v9317_v57, %s8904_s16 }
 0x432   : > { %2308 = vrot.lane.b32.xlu0 %v9380_v10, %s8904_s16 }
 0x470   : > { %v1398_v5 = vpop.xlane.xlu1 %1397 }
 0x471   : > { %v9384_v12 = vpop.f32.mrb[4].mxu1  ;;  %8664 = vrcp.f32 %v1398_v5 }
 0x472   : > { %v762_v13 = vpop.f32.mrb[5].mxu1 }
 0x474   : > { %v1404_v17 = vpop.xlane.xlu1 %1403 }
 0x478   : > { %v8366_v0 = vpop.permute.xlu1 %8365 }
 0x479   : > { %v8368_v18 = vunpack.i.h.bf16 %v8366_v0  ;;  %v8367_v47 = vunpack.i.l.bf16 %v8366_v0 }
 0x47b   : > { %v7965_v30 = vpack.c.bf16 %v8368_v18, %v8367_v47 }
 0x47c   : > { %v8376_v20 = vpop.permute.xlu1 %8375 }
 0x47d   : > { %v8378_v22 = vunpack.i.h.bf16 %v8376_v20  ;;  %v8377_v23 = vunpack.i.l.bf16 %v8376_v20 }
 0x47f   : > { %v7993_v24 = vpack.c.bf16 %v8378_v22, %v8377_v23 }
 0x480   : > { %v8381_v25 = vpop.permute.xlu1 %8380 }
 0x481   : > { %v8383_v26 = vunpack.i.h.bf16 %v8381_v25  ;;  %v8382_v14 = vunpack.i.l.bf16 %v8381_v25  ;;  %7995 = vmatprep.subr.msk.bf16.mxu0 %vm9072_vm3, %v7993_v24 }
 0x482   : > { %7998 = vmatpush3.bf16.xpose.msk.msra.mxu0 %vm9072_vm3, %v7993_v24 }
 0x483   : > { %v7999_v44 = vpack.c.bf16 %v8383_v26, %v8382_v14 }
 0x484   : > { %v8391_v56 = vpop.permute.xlu1 %8390 }
 0x485   : > { %8001 = vmatprep.subr.msk.bf16.mxu0 %vm9072_vm3, %v7999_v44  ;;  %v8393_v61 = vunpack.i.h.bf16 %v8391_v56  ;;  %v8392_v36 = vunpack.i.l.bf16 %v8391_v56 }
 0x487   : > { %v8019_v22 = vpack.c.bf16 %v8393_v61, %v8392_v36 }
 0x48a   : > { %8004 = vmatpush3.bf16.xpose.msk.msra.mxu0 %vm9072_vm3, %v7999_v44 }
 0x491   : > { %7482 = vmatmul.mubr.msk.f32.vlgmr.msra.gmra.mrb[28].mxu0 %vm522_vm2, %v9343_v7 }
 0x492   : > { %7484 = vmatprep.mubr.msk.f32.mxu0 %vm522_vm2, %v9380_v10 }
 0x495   : > { %7485 = vmatmul.mubr.msk.f32.gmra.mrb[30].mxu0 %vm522_vm2, %v9350_v38 }
 0x498   : > { %v9400_v32 = vpop.f32.mrb[6].mxu1 }
 0x499   : > { %v1401_v35 = vpop.xlane.xlu0 %1400  ;;  %v772_v40 = vpop.f32.mrb[7].mxu1 }
 0x49a   : > { %8666 = vrcp.f32 %v1401_v35 }
 0x49b   : > { %8668 = vrcp.f32 %v1404_v17 }
 0x49c   : > { %v7381_v49 = vpop.f32.mrb[8].mxu1 }
 0x49d   : > { %v1407_v31 = vpop.xlane.xlu0 %1406  ;;  %v1037_v50 = vpop.f32.mrb[9].mxu1 }
 0x49e   : > { %7387 = vmatprep.mubr.msk.f32.mxu1 %vm522_vm2, %v1037_v50  ;;  %8670 = vrcp.f32 %v1407_v31 }
 0x49f   : > { %7388 = vmatmul.mubr.msk.f32.vlgmr.msra.gmra.mrb[12].mxu1 %vm522_vm2, %v7381_v49 }
 0x4a0   : > { %7394 = vmatpush3.msra.mxu1 %v9370_v45  ;;  %v7384_v52 = vpop.f32.mrb[10].mxu1 }
 0x4a1   : > { %7966 = vmatprep.subr.bf16.mxu1 %v7965_v30  ;;  %v8371_v19 = vpop.permute.xlu0 %8370  ;;  %v1047_v11 = vpop.f32.mrb[11].mxu1 }
 0x4a2   : > { %7390 = vmatprep.mubr.msk.f32.mxu1 %vm522_vm2, %v1047_v11  ;;  %v7447_v16 = vpop.f32.mrb[24].mxu0  ;;  %v8373_v39 = vunpack.i.h.bf16 %v8371_v19  ;;  %v8372_v15 = vunpack.i.l.bf16 %v8371_v19 }
 0x4a3   : > { %v9412_v21 = vadd.f32 %v7447_v16, %v6683_v29  ;;  %7391 = vmatmul.mubr.msk.f32.gmra.mrb[14].mxu1 %vm522_vm2, %v7384_v52  ;;  %v1729_v59 = vpop.f32.mrb[25].mxu0 }
 0x4a4   : > { %v9415_v60 = vadd.f32 %v6682_v53, %v1729_v59  ;;  %7395 = vmatprep.mubr.msk.f32.mxu1 %vm522_vm2, %v762_v13  ;;  %v7969_v5 = vpack.c.bf16 %v8373_v39, %v8372_v15  ;;  %v8665_v13 = vpop.eup %8664 }
 0x4a5   : > { %v8386_v41 = vpop.permute.xlu0 %8385  ;;  %v1751_v34 = vsel %vm282_vm0, %v9412_v21, -inf  ;;  %v8667_v25 = vpop.eup %8666 }
 0x4a6   : > { %v8388_v1 = vunpack.i.h.bf16 %v8386_v41  ;;  %v8387_v2 = vunpack.i.l.bf16 %v8386_v41  ;;  %1752 = vmax.xlane.f32.xlu1 %v1751_v34  ;;  %v7450_v3 = vpop.f32.mrb[26].mxu0  ;;  %v1748_v6 = vsel %vm282_vm0, %v9415_v60, -inf  ;;  %v8669_v26 = vpop.eup %8668  ;;  %v1413_v14 = vmul.f32 %v8667_v25, %v9347_v28 }
 0x4a7   : > { %v1739_v42 = vpop.f32.mrb[27].mxu0  ;;  %1749 = vmax.xlane.f32.xlu0 %v1748_v6  ;;  %7396 = vmatmul.mubr.msk.f32.vlgmr.msra.gmra.mrb[12].mxu1 %vm522_vm2, %v9384_v12  ;;  %v1745_v23 = vadd.f32 %v7450_v3, %v6685_v4  ;;  %v1412_v12 = vmul.f32 %v8665_v13, %v9324_v62  ;;  %v6704_v6 = vld [vmem:[%s10589_s5 + $0x88] sm:$0xff]  ;;  %v6705_v4 = vld [vmem:[%s10589_s5 + $0x90] sm:$0xff] }
 0x4a8   : > { %v8013_v17 = vpack.c.bf16 %v8388_v1, %v8387_v2  ;;  %v1740_v0 = vadd.f32 %v6684_v63, %v1739_v42  ;;  %7968 = vmatpush3.bf16.msra.mxu1 %v7965_v30  ;;  %7398 = vmatprep.mubr.msk.f32.mxu1 %vm522_vm2, %v772_v40  ;;  %v8671_v35 = vpop.eup %8670  ;;  %v1414_v40 = vmul.f32 %v8669_v26, %v9328_v27  ;;  %v9458_v27 = vld [vmem:[%s10587_s3 + $0x10] sm:$0xff]  ;;  %v6720_v26 = vld [vmem:[%s10589_s5 + $0xa8] sm:$0xff] }
 0x4a9   : > { %7970 = vmatprep.subr.bf16.mxu1 %v7969_v5  ;;  %v2305_v20 = vpop.permute.xlu0 %2304  ;;  %v1757_v44 = vsel %vm282_vm0, %v1745_v23, -inf  ;;  %v1415_v62 = vmul.f32 %v8671_v35, %v9354_v8  ;;  %v6721_v35 = vld [vmem:[%s10589_s5 + $0xb0] sm:$0xff] }
 0x4aa   : > { %8015 = vmatprep.subr.msk.bf16.mxu0 %vm9072_vm3, %v8013_v17  ;;  %7509 = vmatprep.mubr.msk.f32.mxu0 %vm522_vm2, %v2305_v20  ;;  %v1754_v24 = vsel %vm282_vm0, %v1740_v0, -inf  ;;  %v6706_v20 = vld [vmem:[%s10589_s5 + $0x98] sm:$0xff] }
 0x4ab   : > { %8018 = vmatpush3.bf16.xpose.msk.msra.mxu0 %vm9072_vm3, %v8013_v17  ;;  %1755 = vmax.xlane.f32.xlu0 %v1754_v24 }
 0x4ac   : > { %7399 = vmatmul.mubr.msk.f32.gmra.mrb[14].mxu1 %vm522_vm2, %v9400_v32  ;;  %8021 = vmatprep.subr.msk.bf16.mxu0 %vm9072_vm3, %v8019_v22  ;;  %v2307_v32 = vpop.permute.xlu1 %2306 }
 0x4ad   : > { %7972 = vmatpush3.bf16.msra.mxu1 %v7969_v5  ;;  %7423 = vmatprep.mubr.msk.f32.mxu1 %vm282_vm0, %v1412_v12  ;;  %v2309_v18 = vpop.permute.xlu0 %2308 }
 0x4ae   : > { %7429 = vmatprep.subr.mxu1 %v9458_v27 }
 0x4af   : > { %1758 = vmax.xlane.f32.xlu0 %v1757_v44 }
 0x4b0   : > { %7424 = vmatmul.mubr.msk.f32.vlgmr.msra.gmra.mrb[16].mxu1 %vm282_vm0, %v1413_v14  ;;  %v2311_v28 = vpop.permute.xlu1 %2310 }
 0x4b1   : > { %7426 = vmatprep.mubr.msk.f32.mxu1 %vm282_vm0, %v1414_v40  ;;  %7430 = vmatpush3.msra.mxu1 %v9458_v27 }
 0x4b3   : > { %8024 = vmatpush3.bf16.xpose.msk.msra.mxu0 %vm9072_vm3, %v8019_v22  ;;  %v6719_v22 = vld [vmem:[%s10589_s5 + $0xa0] sm:$0xff] }
 0x4b4   : > { %7427 = vmatmul.mubr.msk.f32.gmra.mrb[18].mxu1 %vm282_vm0, %v1415_v62 }
 0x4ba   : > { %7510 = vmatmul.mubr.msk.f32.vlgmr.msra.gmra.mrb[32].mxu0 %vm522_vm2, %v2307_v32 }
 0x4bb   : > { %7512 = vmatprep.mubr.msk.f32.mxu0 %vm522_vm2, %v2309_v18 }
 0x4be   : > { %7513 = vmatmul.mubr.msk.f32.gmra.mrb[34].mxu0 %vm522_vm2, %v2311_v28  ;;  %v6722_v28 = vld [vmem:[%s10589_s5 + $0xb8] sm:$0xff] }
 0x533   : > { %v1753_v8 = vpop.xlane.xlu1 %1752 }
 0x534   : > { %v1761_v47 = vsub.f32 %v9412_v21, %v1753_v8  ;;  %v1750_v49 = vpop.xlane.xlu0 %1749 }
 0x535   : > { %v1760_v31 = vsub.f32 %v9415_v60, %v1750_v49 }
 0x536   : > { %v1766_v50 = vmul.f32 1.442695, %v1761_v47 }
 0x537   : > { %v1764_v30 = vmul.f32 1.442695, %v1760_v31 }
 0x538   : > { %8672 = vpow2.f32 %v1766_v50  ;;  %v1756_v52 = vpop.xlane.xlu0 %1755 }
 0x539   : > { %8674 = vpow2.f32 %v1764_v30  ;;  %v1762_v29 = vsub.f32 %v1740_v0, %v1756_v52 }
 0x53b   : > { %v1768_v19 = vmul.f32 1.442695, %v1762_v29 }
 0x53c   : > { %v1759_v11 = vpop.xlane.xlu0 %1758 }
 0x53d   : > { %8676 = vpow2.f32 %v1768_v19  ;;  %v1763_v53 = vsub.f32 %v1745_v23, %v1759_v11 }
 0x53f   : > { %v1770_v56 = vmul.f32 1.442695, %v1763_v53 }
 0x541   : > { %8678 = vpow2.f32 %v1770_v56 }
 0x542   : > { %v9464_v16 = vpop.eup %8672 }
 0x543   : > { %v9466_v39 = vpop.eup %8674  ;;  %v1775_v15 = vsel %vm282_vm0, %v9464_v16, 0.0 }
 0x544   : > { %1776 = vadd.xlane.f32.xlu0 %v1775_v15  ;;  %v1772_v21 = vsel %vm282_vm0, %v9466_v39, 0.0 }
 0x545   : > { %1773 = vadd.xlane.f32.xlu1 %v1772_v21 }
 0x547   : > { %v9472_v59 = vpop.eup %8676 }
 0x548   : > { %v1778_v60 = vsel %vm282_vm0, %v9472_v59, 0.0 }
 0x549   : > { %1779 = vadd.xlane.f32.xlu1 %v1778_v60 }
 0x54b   : > { %v9476_v61 = vpop.eup %8678 }
 0x54c   : > { %v1781_v41 = vsel %vm282_vm0, %v9476_v61, 0.0 }
 0x54d   : > { %1782 = vadd.xlane.f32.xlu0 %v1781_v41 }
 0x55a   : > { %8395 = vrot.lane.b32.xlu1 %v9023_v33, %s8912_s24  ;;  %v6703_v33 = vld [vmem:[%s10589_s5 + $0x80] sm:$0xff] }
 0x55e   : > { %8405 = vrot.lane.b32.xlu1 %v9139_v43, %s8905_s17 }
 0x562   : > { %8410 = vrot.lane.b32.xlu1 %v9147_v46, %s8905_s17 }
 0x563   : > { %8400 = vrot.lane.b32.xlu0 %v9033_v37, %s8912_s24 }
 0x564   : > { %v7483_v34 = vpop.f32.mrb[28].mxu0 }
 0x565   : > { %v2127_v63 = vpop.f32.mrb[29].mxu0  ;;  %v9509_v13 = vadd.f32 %v7483_v34, %v6704_v6 }
 0x566   : > { %2775 = vrot.lane.b32.xlu1 %v9343_v7, %s8906_s18  ;;  %v9499_v3 = vadd.f32 %v6703_v33, %v2127_v63 }
 0x567   : > { %2773 = vrot.lane.b32.xlu0 %v9317_v57, %s8906_s18  ;;  %v2149_v25 = vsel %vm282_vm0, %v9509_v13, -inf }
 0x568   : > { %v7486_v36 = vpop.f32.mrb[30].mxu0  ;;  %v2146_v0 = vsel %vm282_vm0, %v9499_v3, -inf }
 0x569   : > { %v2137_v1 = vpop.f32.mrb[31].mxu0  ;;  %v9523_v23 = vadd.f32 %v7486_v36, %v6706_v20 }
 0x56a   : > { %2779 = vrot.lane.b32.xlu1 %v9350_v38, %s8906_s18  ;;  %v9511_v17 = vadd.f32 %v6705_v4, %v2137_v1 }
 0x56b   : > { %2777 = vrot.lane.b32.xlu0 %v9380_v10, %s8906_s18  ;;  %v2155_v18 = vsel %vm282_vm0, %v9523_v23, -inf }
 0x56c   : > { %v2152_v12 = vsel %vm282_vm0, %v9511_v17, -inf }
 0x583   : > { %v7425_v37 = vpop.f32.mrb[16].mxu1 }
 0x584   : > { %v1506_v2 = vpop.f32.mrb[17].mxu1 }
 0x585   : > { %7431 = vmatprep.mubr.msk.f32.mxu1 %vm522_vm2, %v1506_v2 }
 0x586   : > { %7432 = vmatmul.mubr.msk.f32.vlgmr.msra.gmra.mrb[12].mxu1 %vm522_vm2, %v7425_v37 }
 0x587   : > { %v7428_v42 = vpop.f32.mrb[18].mxu1 }
 0x588   : > { %v1516_v5 = vpop.f32.mrb[19].mxu1 }
 0x589   : > { %7434 = vmatprep.mubr.msk.f32.mxu1 %vm522_vm2, %v1516_v5 }
 0x58a   : > { %7435 = vmatmul.mubr.msk.f32.gmra.mrb[14].mxu1 %vm522_vm2, %v7428_v42  ;;  %2147 = vmax.xlane.f32.xlu0 %v2146_v0  ;;  %v9563_v0 = vld [vmem:[%s10587_s3 + $0x18] sm:$0xff] }
 0x58d   : > { %v7511_v24 = vpop.f32.mrb[32].mxu0 }
 0x58e   : > { %v2402_v14 = vpop.f32.mrb[33].mxu0  ;;  %2150 = vmax.xlane.f32.xlu1 %v2149_v25  ;;  %2153 = vmax.xlane.f32.xlu0 %v2152_v12  ;;  %v9537_v40 = vadd.f32 %v7511_v24, %v6720_v26 }
 0x58f   : > { %v9532_v44 = vadd.f32 %v6719_v22, %v2402_v14 }
 0x590   : > { %v2424_v50 = vsel %vm282_vm0, %v9537_v40, -inf }
 0x591   : > { %v7514_v62 = vpop.f32.mrb[34].mxu0  ;;  %v2421_v32 = vsel %vm282_vm0, %v9532_v44, -inf }
 0x592   : > { %v2412_v8 = vpop.f32.mrb[35].mxu0  ;;  %2422 = vmax.xlane.f32.xlu1 %v2421_v32  ;;  %2156 = vmax.xlane.f32.xlu0 %v2155_v18  ;;  %v9548_v49 = vadd.f32 %v7514_v62, %v6722_v28 }
 0x593   : > { %v9546_v47 = vadd.f32 %v6721_v35, %v2412_v8 }
 0x594   : > { %v2430_v30 = vsel %vm282_vm0, %v9548_v49, -inf }
 0x595   : > { %v2427_v31 = vsel %vm282_vm0, %v9546_v47, -inf }
 0x596   : > { %2428 = vmax.xlane.f32.xlu1 %v2427_v31  ;;  %2425 = vmax.xlane.f32.xlu0 %v2424_v50 }
 0x59a   : > { %2431 = vmax.xlane.f32.xlu0 %v2430_v30 }
 0x5a7   : > { %8415 = vrot.lane.b32.xlu1 %v9139_v43, %s8907_s19 }
 0x5d1   : > { %v1777_v29 = vpop.xlane.xlu0 %1776 }
 0x5d2   : > { %v1774_v52 = vpop.xlane.xlu1 %1773 }
 0x5d3   : > { %8680 = vrcp.f32 %v1774_v52 }
 0x5d4   : > { %8682 = vrcp.f32 %v1777_v29 }
 0x5d6   : > { %v1780_v19 = vpop.xlane.xlu1 %1779 }
 0x5d7   : > { %8684 = vrcp.f32 %v1780_v19 }
 0x5da   : > { %v8396_v11 = vpop.permute.xlu1 %8395  ;;  %v1783_v53 = vpop.xlane.xlu0 %1782 }
 0x5db   : > { %v8398_v56 = vunpack.i.h.bf16 %v8396_v11  ;;  %v8397_v15 = vunpack.i.l.bf16 %v8396_v11  ;;  %8686 = vrcp.f32 %v1783_v53 }
 0x5dd   : > { %v8681_v21 = vpop.eup %8680  ;;  %v7985_v60 = vpack.c.bf16 %v8398_v56, %v8397_v15 }
 0x5de   : > { %v8406_v41 = vpop.permute.xlu1 %8405  ;;  %v8401_v34 = vpop.permute.xlu0 %8400  ;;  %v1788_v63 = vmul.f32 %v8681_v21, %v9466_v39 }
 0x5df   : > { %v8408_v36 = vunpack.i.h.bf16 %v8406_v41  ;;  %v8407_v1 = vunpack.i.l.bf16 %v8406_v41  ;;  %v8403_v33 = vunpack.i.h.bf16 %v8401_v34  ;;  %v8402_v37 = vunpack.i.l.bf16 %v8401_v34  ;;  %7986 = vmatprep.subr.bf16.mxu1 %v7985_v60  ;;  %v8683_v4 = vpop.eup %8682 }
 0x5e0   : > { %7988 = vmatpush3.bf16.msra.mxu1 %v7985_v60  ;;  %7459 = vmatprep.mubr.msk.f32.mxu1 %vm282_vm0, %v1788_v63  ;;  %v1789_v24 = vmul.f32 %v8683_v4, %v9464_v16 }
 0x5e1   : > { %v8033_v2 = vpack.c.bf16 %v8408_v36, %v8407_v1  ;;  %v7989_v6 = vpack.c.bf16 %v8403_v33, %v8402_v37  ;;  %v8685_v20 = vpop.eup %8684 }
 0x5e2   : > { %v8411_v42 = vpop.permute.xlu1 %8410  ;;  %v2774_v5 = vpop.permute.xlu0 %2773  ;;  %v1790_v26 = vmul.f32 %v8685_v20, %v9472_v59 }
 0x5e3   : > { %v8413_v39 = vunpack.i.h.bf16 %v8411_v42  ;;  %v8412_v22 = vunpack.i.l.bf16 %v8411_v42  ;;  %7990 = vmatprep.subr.bf16.mxu1 %v7989_v6  ;;  %8035 = vmatprep.subr.msk.bf16.mxu0 %vm9072_vm3, %v8033_v2 }
 0x5e4   : > { %7553 = vmatprep.mubr.msk.f32.mxu0 %vm522_vm2, %v2774_v5  ;;  %7992 = vmatpush3.bf16.msra.mxu1 %v7989_v6 }
 0x5e5   : > { %v8039_v25 = vpack.c.bf16 %v8413_v39, %v8412_v22  ;;  %8038 = vmatpush3.bf16.xpose.msk.msra.mxu0 %vm9072_vm3, %v8033_v2  ;;  %7465 = vmatprep.subr.mxu1 %v9563_v0  ;;  %v8687_v12 = vpop.eup %8686 }
 0x5e6   : > { %v1791_v16 = vmul.f32 %v8687_v12, %v9476_v61  ;;  %v2776_v14 = vpop.permute.xlu1 %2775  ;;  %v2778_v35 = vpop.permute.xlu0 %2777 }
 0x5e7   : > { %7460 = vmatmul.mubr.msk.f32.vlgmr.msra.gmra.mrb[20].mxu1 %vm282_vm0, %v1789_v24  ;;  %8041 = vmatprep.subr.msk.bf16.mxu0 %vm9072_vm3, %v8039_v25 }
 0x5e8   : > { %7462 = vmatprep.mubr.msk.f32.mxu1 %vm282_vm0, %v1790_v26  ;;  %7466 = vmatpush3.msra.mxu1 %v9563_v0 }
 0x5ea   : > { %v2780_v59 = vpop.permute.xlu1 %2779 }
 0x5eb   : > { %7463 = vmatmul.mubr.msk.f32.gmra.mrb[22].mxu1 %vm282_vm0, %v1791_v16 }
 0x5ed   : > { %8044 = vmatpush3.bf16.xpose.msk.msra.mxu0 %vm9072_vm3, %v8039_v25 }
 0x5f4   : > { %7554 = vmatmul.mubr.msk.f32.vlgmr.msra.gmra.mrb[36].mxu0 %vm522_vm2, %v2776_v14 }
 0x5f5   : > { %7556 = vmatprep.mubr.msk.f32.mxu0 %vm522_vm2, %v2778_v35 }
 0x5f8   : > { %7557 = vmatmul.mubr.msk.f32.gmra.mrb[38].mxu0 %vm522_vm2, %v2780_v59 }
 0x617   : > { %v2148_v62 = vpop.xlane.xlu0 %2147 }
 0x618   : > { %v2158_v32 = vsub.f32 %v9499_v3, %v2148_v62 }
 0x61a   : > { %v2162_v18 = vmul.f32 1.442695, %v2158_v32 }
 0x61b   : > { %v2151_v28 = vpop.xlane.xlu1 %2150  ;;  %v2154_v61 = vpop.xlane.xlu0 %2153 }
 0x61c   : > { %8688 = vpow2.f32 %v2162_v18  ;;  %v2159_v8 = vsub.f32 %v9509_v13, %v2151_v28  ;;  %v2160_v31 = vsub.f32 %v9511_v17, %v2154_v61  ;;  %v6744_v28 = vld [vmem:[%s10589_s5 + $0xc8] sm:$0xff] }
 0x61e   : > { %v2164_v50 = vmul.f32 1.442695, %v2159_v8  ;;  %v2166_v30 = vmul.f32 1.442695, %v2160_v31  ;;  %v6743_v8 = vld [vmem:[%s10589_s5 + $0xc0] sm:$0xff] }
 0x61f   : > { %v2423_v52 = vpop.xlane.xlu1 %2422  ;;  %v2157_v29 = vpop.xlane.xlu0 %2156 }
 0x620   : > { %8690 = vpow2.f32 %v2164_v50  ;;  %v2433_v19 = vsub.f32 %v9532_v44, %v2423_v52  ;;  %v2161_v11 = vsub.f32 %v9523_v23, %v2157_v29 }
 0x621   : > { %8692 = vpow2.f32 %v2166_v30 }
 0x622   : > { %v2437_v53 = vmul.f32 1.442695, %v2433_v19  ;;  %v2168_v3 = vmul.f32 1.442695, %v2161_v11 }
 0x623   : > { %v2429_v56 = vpop.xlane.xlu1 %2428  ;;  %v2426_v15 = vpop.xlane.xlu0 %2425 }
 0x624   : > { %8694 = vpow2.f32 %v2437_v53  ;;  %v2434_v21 = vsub.f32 %v9537_v40, %v2426_v15  ;;  %v2435_v24 = vsub.f32 %v9546_v47, %v2429_v56  ;;  %v6745_v56 = vld [vmem:[%s10589_s5 + $0xd0] sm:$0xff] }
 0x625   : > { %8696 = vpow2.f32 %v2168_v3 }
 0x626   : > { %v8689_v13 = vpop.eup %8688  ;;  %v2439_v17 = vmul.f32 1.442695, %v2434_v21  ;;  %v2441_v25 = vmul.f32 1.442695, %v2435_v24 }
 0x627   : > { %v8416_v60 = vpop.permute.xlu1 %8415  ;;  %v2432_v41 = vpop.xlane.xlu0 %2431  ;;  %v2170_v34 = vsel %vm282_vm0, %v8689_v13, 0.0 }
 0x628   : > { %v8418_v63 = vunpack.i.h.bf16 %v8416_v60  ;;  %v8417_v36 = vunpack.i.l.bf16 %v8416_v60  ;;  %v2436_v44 = vsub.f32 %v9548_v49, %v2432_v41  ;;  %2171 = vadd.xlane.f32.xlu1 %v2170_v34  ;;  %8698 = vpow2.f32 %v2439_v17  ;;  %v6746_v60 = vld [vmem:[%s10589_s5 + $0xd8] sm:$0xff] }
 0x62a   : > { %v9593_v23 = vpop.eup %8690  ;;  %v2443_v1 = vmul.f32 1.442695, %v2436_v44  ;;  %v8005_v33 = vpack.c.bf16 %v8418_v63, %v8417_v36 }
 0x62b   : > { %v9595_v37 = vpop.eup %8692  ;;  %v2173_v40 = vsel %vm282_vm0, %v9593_v23, 0.0 }
 0x62c   : > { %8700 = vpow2.f32 %v2443_v1  ;;  %2174 = vadd.xlane.f32.xlu0 %v2173_v40  ;;  %v2176_v2 = vsel %vm282_vm0, %v9595_v37, 0.0  ;;  %8006 = vmatprep.subr.bf16.mxu1 %v8005_v33 }
 0x62d   : > { %2177 = vadd.xlane.f32.xlu1 %v2176_v2  ;;  %8702 = vpow2.f32 %v2441_v25 }
 0x62e   : > { %v9601_v6 = vpop.eup %8694 }
 0x62f   : > { %v9603_v49 = vpop.eup %8696  ;;  %v2445_v4 = vsel %vm282_vm0, %v9601_v6, 0.0 }
 0x630   : > { %v2179_v42 = vsel %vm282_vm0, %v9603_v49, 0.0 }
 0x631   : > { %2446 = vadd.xlane.f32.xlu1 %v2445_v4  ;;  %2180 = vadd.xlane.f32.xlu0 %v2179_v42 }
 0x632   : > { %v9609_v5 = vpop.eup %8698 }
 0x633   : > { %v2448_v20 = vsel %vm282_vm0, %v9609_v5, 0.0 }
 0x635   : > { %2449 = vadd.xlane.f32.xlu0 %v2448_v20 }
 0x636   : > { %v9613_v39 = vpop.eup %8700 }
 0x637   : > { %v2454_v22 = vsel %vm282_vm0, %v9613_v39, 0.0  ;;  %v9628_v12 = vpop.eup %8702 }
 0x638   : > { %v2451_v26 = vsel %vm282_vm0, %v9628_v12, 0.0 }
 0x639   : > { %2455 = vadd.xlane.f32.xlu0 %v2454_v22 }
 0x642   : > { %8425 = vrot.lane.b32.xlu1 %v9139_v43, %s8908_s20 }
 0x64f   : > { %8420 = vrot.lane.b32.xlu0 %v9147_v46, %s8907_s19 }
 0x653   : > { %8435 = vrot.lane.b32.xlu0 %v9139_v43, %s8909_s22 }
 0x657   : > { %3149 = vrot.lane.b32.xlu0 %v9317_v57, %s8910_s23 }
 0x65b   : > { %3153 = vrot.lane.b32.xlu0 %v9380_v10, %s8910_s23 }
 0x666   : > { %2452 = vadd.xlane.f32.xlu1 %v2451_v26 }
 0x677   : > { %8430 = vrot.lane.b32.xlu1 %v9147_v46, %s8908_s20 }
 0x67b   : > { %8440 = vrot.lane.b32.xlu1 %v9147_v46, %s8909_s22 }
 0x67f   : > { %3151 = vrot.lane.b32.xlu1 %v9343_v7, %s8910_s23 }
 0x683   : > { %3155 = vrot.lane.b32.xlu1 %v9350_v38, %s8910_s23 }
 0x6b5   : > { %v2172_v57 = vpop.xlane.xlu1 %2171 }
 0x6b6   : > { %8704 = vrcp.f32 %v2172_v57 }
 0x6b9   : > { %v2175_v10 = vpop.xlane.xlu0 %2174 }
 0x6ba   : > { %v7461_v47 = vpop.f32.mrb[20].mxu1  ;;  %v2178_v16 = vpop.xlane.xlu1 %2177  ;;  %8706 = vrcp.f32 %v2175_v10 }
 0x6bb   : > { %v1882_v14 = vpop.f32.mrb[21].mxu1  ;;  %8708 = vrcp.f32 %v2178_v16 }
 0x6bc   : > { %7467 = vmatprep.mubr.msk.f32.mxu1 %vm522_vm2, %v1882_v14 }
 0x6bd   : > { %7468 = vmatmul.mubr.msk.f32.vlgmr.msra.gmra.mrb[12].mxu1 %vm522_vm2, %v7461_v47 }
 0x6be   : > { %v2181_v35 = vpop.xlane.xlu0 %2180  ;;  %8008 = vmatpush3.bf16.msra.mxu1 %v8005_v33  ;;  %v7464_v59 = vpop.f32.mrb[22].mxu1 }
 0x6bf   : > { %v1892_v32 = vpop.f32.mrb[23].mxu1  ;;  %v2447_v18 = vpop.xlane.xlu1 %2446  ;;  %8710 = vrcp.f32 %v2181_v35 }
 0x6c0   : > { %v8705_v62 = vpop.eup %8704  ;;  %7470 = vmatprep.mubr.msk.f32.mxu1 %vm522_vm2, %v1892_v32  ;;  %8712 = vrcp.f32 %v2447_v18 }
 0x6c1   : > { %v2186_v7 = vmul.f32 %v8705_v62, %v8689_v13  ;;  %7471 = vmatmul.mubr.msk.f32.gmra.mrb[14].mxu1 %vm522_vm2, %v7464_v59 }
 0x6c2   : > { %v2450_v38 = vpop.xlane.xlu0 %2449 }
 0x6c3   : > { %7495 = vmatprep.mubr.msk.f32.mxu1 %vm282_vm0, %v2186_v7  ;;  %v8426_v31 = vpop.permute.xlu1 %8425  ;;  %8714 = vrcp.f32 %v2450_v38 }
 0x6c4   : > { %v8428_v19 = vunpack.i.h.bf16 %v8426_v31  ;;  %v8427_v11 = vunpack.i.l.bf16 %v8426_v31  ;;  %v8707_v36 = vpop.eup %8706 }
 0x6c5   : > { %v8709_v42 = vpop.eup %8708  ;;  %v2187_v20 = vmul.f32 %v8707_v36, %v9593_v23 }
 0x6c6   : > { %v2456_v61 = vpop.xlane.xlu0 %2455  ;;  %v8025_v1 = vpack.c.bf16 %v8428_v19, %v8427_v11  ;;  %v2188_v10 = vmul.f32 %v8709_v42, %v9595_v37 }
 0x6c7   : > { %v7555_v50 = vpop.f32.mrb[36].mxu0 }
 0x6c8   : > { %v9651_v30 = vadd.f32 %v7555_v50, %v6744_v28  ;;  %v2871_v52 = vpop.f32.mrb[37].mxu0  ;;  %v8880_v50 = vld [vmem:[#allocation2 + $0x40] sm:$0xff] }
 0x6c9   : > { %v9653_v29 = vadd.f32 %v6743_v8, %v2871_v52  ;;  %v8711_v24 = vpop.eup %8710  ;;  %v9701_v52 = vmul.f32 0.35355338, %v8880_v50 }
 0x6ca   : > { %v8421_v53 = vpop.permute.xlu0 %8420  ;;  %v2893_v3 = vsel %vm282_vm0, %v9651_v30, -inf  ;;  %v8713_v26 = vpop.eup %8712  ;;  %v2189_v23 = vmul.f32 %v8711_v24, %v9603_v49 }
 0x6cb   : > { %v8423_v15 = vunpack.i.h.bf16 %v8421_v53  ;;  %v8422_v21 = vunpack.i.l.bf16 %v8421_v53  ;;  %v7558_v13 = vpop.f32.mrb[38].mxu0  ;;  %2894 = vmax.xlane.f32.xlu1 %v2893_v3  ;;  %v2890_v17 = vsel %vm282_vm0, %v9653_v29, -inf  ;;  %v2461_v47 = vmul.f32 %v8713_v26, %v9601_v6 }
 0x6cc   : > { %v2881_v41 = vpop.f32.mrb[39].mxu0  ;;  %2891 = vmax.xlane.f32.xlu0 %v2890_v17  ;;  %v9667_v33 = vadd.f32 %v7558_v13, %v6746_v60 }
 0x6cd   : > { %v9665_v34 = vadd.f32 %v6745_v56, %v2881_v41  ;;  %v8009_v63 = vpack.c.bf16 %v8423_v15, %v8422_v21  ;;  %v8715_v62 = vpop.eup %8714 }
 0x6ce   : > { %v8436_v44 = vpop.permute.xlu0 %8435  ;;  %v2899_v57 = vsel %vm282_vm0, %v9667_v33, -inf  ;;  %v2462_v6 = vmul.f32 %v8715_v62, %v9609_v5 }
 0x6cf   : > { %v8438_v40 = vunpack.i.h.bf16 %v8436_v44  ;;  %v8437_v2 = vunpack.i.l.bf16 %v8436_v44  ;;  %8010 = vmatprep.subr.bf16.mxu1 %v8009_v63  ;;  %v2896_v4 = vsel %vm282_vm0, %v9665_v34, -inf }
 0x6d0   : > { %2897 = vmax.xlane.f32.xlu0 %v2896_v4  ;;  %8012 = vmatpush3.bf16.msra.mxu1 %v8009_v63  ;;  %v8883_v4 = vld [vmem:[#allocation2 + $0x58] sm:$0xff] }
 0x6d1   : > { %v8053_v22 = vpack.c.bf16 %v8438_v40, %v8437_v2  ;;  %8026 = vmatprep.subr.bf16.mxu1 %v8025_v1  ;;  %v8882_v2 = vld [vmem:[#allocation2 + $0x50] sm:$0xff] }
 0x6d2   : > { %v3150_v25 = vpop.permute.xlu0 %3149  ;;  %v8459_v42 = vpack.i.bf16 %v8883_v4, %v8882_v2 }
 0x6d3   : > { %7496 = vmatmul.mubr.msk.f32.vlgmr.msra.gmra.mrb[24].mxu1 %vm282_vm0, %v2187_v20  ;;  %8055 = vmatprep.subr.msk.bf16.mxu0 %vm9072_vm3, %v8053_v22 }
 0x6d4   : > { %7589 = vmatprep.mubr.msk.f32.mxu0 %vm522_vm2, %v3150_v25  ;;  %2900 = vmax.xlane.f32.xlu0 %v2899_v57  ;;  %v9753_v57 = vmul.f32 0.35355338, %v8883_v4 }
 0x6d5   : > { %7498 = vmatprep.mubr.msk.f32.mxu1 %vm282_vm0, %v2188_v10  ;;  %8028 = vmatpush3.bf16.msra.mxu1 %v8025_v1 }
 0x6d6   : > { %8058 = vmatpush3.bf16.xpose.msk.msra.mxu0 %vm9072_vm3, %v8053_v22  ;;  %v9739_v22 = vld [vmem:[%s10588_s4] ss:$0 sm:$0xff] }
 0x6d7   : > { %7499 = vmatmul.mubr.msk.f32.gmra.mrb[26].mxu1 %vm282_vm0, %v2189_v23  ;;  %v9756_v23 = vmul.f32 0.35355338, %v8882_v2 }
 0x6d8   : > { %7523 = vmatprep.mubr.msk.f32.mxu1 %vm282_vm0, %v2461_v47 }
 0x6f3   : > { %v2453_v16 = vpop.xlane.xlu1 %2452 }
 0x6f4   : > { %8716 = vrcp.f32 %v2453_v16 }
 0x6f5   : > { %8718 = vrcp.f32 %v2456_v61 }
 0x6f7   : > { %v8431_v37 = vpop.permute.xlu1 %8430 }
 0x6f8   : > { %v8433_v14 = vunpack.i.h.bf16 %v8431_v37  ;;  %v8432_v35 = vunpack.i.l.bf16 %v8431_v37 }
 0x6fa   : > { %v8029_v59 = vpack.c.bf16 %v8433_v14, %v8432_v35 }
 0x6fb   : > { %v8441_v32 = vpop.permute.xlu1 %8440 }
 0x6fc   : > { %v8443_v49 = vunpack.i.h.bf16 %v8441_v32  ;;  %v8442_v18 = vunpack.i.l.bf16 %v8441_v32  ;;  %8030 = vmatprep.subr.bf16.mxu1 %v8029_v59 }
 0x6fd   : > { %8032 = vmatpush3.bf16.msra.mxu1 %v8029_v59 }
 0x6fe   : > { %v8717_v7 = vpop.eup %8716  ;;  %v8059_v28 = vpack.c.bf16 %v8443_v49, %v8442_v18  ;;  %7529 = vmatprep.subr.mxu1 %v9363_v9 }
 0x6ff   : > { %v8719_v38 = vpop.eup %8718  ;;  %v2463_v8 = vmul.f32 %v8717_v7, %v9628_v12  ;;  %v3152_v5 = vpop.permute.xlu1 %3151 }
 0x700   : > { %7524 = vmatmul.mubr.msk.f32.vlgmr.msra.gmra.mrb[28].mxu1 %vm282_vm0, %v2462_v6  ;;  %8061 = vmatprep.subr.msk.bf16.mxu0 %vm9072_vm3, %v8059_v28  ;;  %v2464_v61 = vmul.f32 %v8719_v38, %v9613_v39  ;;  %v3154_v12 = vpop.permute.xlu0 %3153  ;;  %v6763_v38 = vld [vmem:[%s10589_s5 + $0xe0] sm:$0xff] }
 0x701   : > { %7526 = vmatprep.mubr.msk.f32.mxu1 %vm282_vm0, %v2463_v8  ;;  %8064 = vmatpush3.bf16.xpose.msk.msra.mxu0 %vm9072_vm3, %v8059_v28  ;;  %v6764_v28 = vld [vmem:[%s10589_s5 + $0xe8] sm:$0xff] }
 0x702   : > { %7530 = vmatpush3.msra.mxu1 %v9363_v9 }
 0x703   : > { %7537 = vmatprep.subr.mxu1 %v9370_v45  ;;  %v3156_v31 = vpop.permute.xlu1 %3155 }
 0x704   : > { %7527 = vmatmul.mubr.msk.f32.gmra.mrb[30].mxu1 %vm282_vm0, %v2464_v61 }
 0x708   : > { %7590 = vmatmul.mubr.msk.f32.vlgmr.msra.gmra.mrb[40].mxu0 %vm522_vm2, %v3152_v5 }
 0x709   : > { %7592 = vmatprep.mubr.msk.f32.mxu0 %vm522_vm2, %v3154_v12 }
 0x70c   : > { %7593 = vmatmul.mubr.msk.f32.gmra.mrb[42].mxu0 %vm522_vm2, %v3156_v31  ;;  %v6765_v31 = vld [vmem:[%s10589_s5 + $0xf0] sm:$0xff] }
 0x70d   : > { %7625 = vmatprep.mubr.msk.f32.mxu0 %vm522_vm2, %v9701_v52 }
 0x758   : > { %v2895_v9 = vpop.xlane.xlu1 %2894 }
 0x759   : > { %v2903_v39 = vsub.f32 %v9651_v30, %v2895_v9  ;;  %v2892_v19 = vpop.xlane.xlu0 %2891 }
 0x75a   : > { %v2902_v11 = vsub.f32 %v9653_v29, %v2892_v19 }
 0x75b   : > { %v2908_v53 = vmul.f32 1.442695, %v2903_v39  ;;  %v6766_v39 = vld [vmem:[%s10589_s5 + $0xf8] sm:$0xff] }
 0x75c   : > { %v2906_v3 = vmul.f32 1.442695, %v2902_v11 }
 0x75d   : > { %8720 = vpow2.f32 %v2908_v53  ;;  %v2898_v56 = vpop.xlane.xlu0 %2897 }
 0x75e   : > { %8722 = vpow2.f32 %v2906_v3  ;;  %v2904_v15 = vsub.f32 %v9665_v34, %v2898_v56 }
 0x760   : > { %v2910_v21 = vmul.f32 1.442695, %v2904_v15 }
 0x761   : > { %v2901_v13 = vpop.xlane.xlu0 %2900 }
 0x762   : > { %8724 = vpow2.f32 %v2910_v21  ;;  %v2905_v17 = vsub.f32 %v9667_v33, %v2901_v13  ;;  %v8881_v33 = vld [vmem:[#allocation2 + $0x48] sm:$0xff] }
 0x763   : > { %v8454_v40 = vpack.i.bf16 %v8881_v33, %v8880_v50  ;;  %v9734_v20 = vmul.f32 0.35355338, %v8881_v33 }
 0x764   : > { %v2912_v60 = vmul.f32 1.442695, %v2905_v17 }
 0x766   : > { %8726 = vpow2.f32 %v2912_v60 }
 0x767   : > { %v9710_v41 = vpop.eup %8720 }
 0x768   : > { %v9712_v30 = vpop.eup %8722  ;;  %v2917_v29 = vsel %vm282_vm0, %v9710_v41, 0.0 }
 0x769   : > { %2918 = vadd.xlane.f32.xlu0 %v2917_v29  ;;  %v2914_v63 = vsel %vm282_vm0, %v9712_v30, 0.0 }
 0x76a   : > { %2915 = vadd.xlane.f32.xlu1 %v2914_v63 }
 0x76c   : > { %v9718_v34 = vpop.eup %8724 }
 0x76d   : > { %v2920_v36 = vsel %vm282_vm0, %v9718_v34, 0.0 }
 0x76e   : > { %2921 = vadd.xlane.f32.xlu1 %v2920_v36 }
 0x770   : > { %v9722_v44 = vpop.eup %8726 }
 0x771   : > { %v2923_v1 = vsel %vm282_vm0, %v9722_v44, 0.0 }
 0x772   : > { %2924 = vadd.xlane.f32.xlu0 %v2923_v1 }
 0x77f   : > { %8445 = vrot.lane.b32.xlu1 %v9139_v43, %s8911_s10 }
 0x783   : > { %8455 = vrot.lane.b32.xlu1 %v8454_v40, %s8903_s15 }
 0x787   : > { %8460 = vrot.lane.b32.xlu1 %v8459_v42, %s8903_s15 }
 0x788   : > { %8450 = vrot.lane.b32.xlu0 %v9147_v46, %s8911_s10 }
 0x78b   : > { %8470 = vrot.lane.b32.xlu1 %v8459_v42, %s8902_s14 }
 0x78c   : > { %8465 = vrot.lane.b32.xlu0 %v8454_v40, %s8902_s14 }
 0x78f   : > { %3816 = vrot.lane.b32.xlu1 %v9734_v20, %s8904_s16 }
 0x790   : > { %3814 = vrot.lane.b32.xlu0 %v9701_v52, %s8904_s16  ;;  %v7469_v24 = vpop.f32.mrb[12].mxu1 }
 0x791   : > { %v2009_v25 = vadd.f32 %v7469_v24, %v9739_v22  ;;  %v1979_v26 = vpop.f32.mrb[13].mxu1 }
 0x792   : > { %v2008_v10 = vadd.f32 %v9739_v22, %v1979_v26 }
 0x793   : > { %2013 = vst.msk [vmem:[%s9748_s25 + $0x8] sm:$0xff] %vm282_vm0, %v2009_v25  ;;  %3820 = vrot.lane.b32.xlu1 %v9753_v57, %s8904_s16 }
 0x794   : > { %2012 = vst.msk [vmem:[%s9748_s25] sm:$0xff] %vm282_vm0, %v2008_v10  ;;  %3818 = vrot.lane.b32.xlu0 %v9756_v23, %s8904_s16  ;;  %v7472_v47 = vpop.f32.mrb[14].mxu1 }
 0x795   : > { %v2011_v16 = vadd.f32 %v7472_v47, %v9739_v22  ;;  %v1989_v37 = vpop.f32.mrb[15].mxu1 }
 0x796   : > { %v2010_v14 = vadd.f32 %v9739_v22, %v1989_v37 }
 0x797   : > { %2015 = vst.msk [vmem:[%s9748_s25 + $0x18] sm:$0xff] %vm282_vm0, %v2011_v16 }
 0x798   : > { %2014 = vst.msk [vmem:[%s9748_s25 + $0x10] sm:$0xff] %vm282_vm0, %v2010_v14 }
 0x7a6   : > { %v7497_v35 = vpop.f32.mrb[24].mxu1 }
 0x7a7   : > { %v2280_v59 = vpop.f32.mrb[25].mxu1 }
 0x7aa   : > { %v7500_v62 = vpop.f32.mrb[26].mxu1 }
 0x7ab   : > { %v2290_v32 = vpop.f32.mrb[27].mxu1 }
 0x7d3   : > { %v7525_v49 = vpop.f32.mrb[28].mxu1 }
 0x7d4   : > { %v2555_v18 = vpop.f32.mrb[29].mxu1 }
 0x7d5   : > { %7531 = vmatprep.mubr.msk.f32.mxu1 %vm522_vm2, %v2555_v18 }
 0x7d6   : > { %7532 = vmatmul.mubr.msk.f32.vlgmr.msra.gmra.mrb[32].mxu1 %vm522_vm2, %v7525_v49 }
 0x7d7   : > { %v7528_v7 = vpop.f32.mrb[30].mxu1  ;;  %7538 = vmatpush3.msra.mxu1 %v9370_v45 }
 0x7d8   : > { %v2565_v6 = vpop.f32.mrb[31].mxu1 }
 0x7d9   : > { %7534 = vmatprep.mubr.msk.f32.mxu1 %vm522_vm2, %v2565_v6 }
 0x7da   : > { %7535 = vmatmul.mubr.msk.f32.gmra.mrb[34].mxu1 %vm522_vm2, %v7528_v7 }
 0x7db   : > { %7539 = vmatprep.mubr.msk.f32.mxu1 %vm522_vm2, %v2280_v59  ;;  %v7591_v8 = vpop.f32.mrb[40].mxu0 }
 0x7dc   : > { %v9784_v61 = vadd.f32 %v7591_v8, %v6764_v28  ;;  %v3247_v5 = vpop.f32.mrb[41].mxu0 }
 0x7dd   : > { %v9786_v45 = vadd.f32 %v6763_v38, %v3247_v5 }
 0x7de   : > { %7540 = vmatmul.mubr.msk.f32.vlgmr.msra.gmra.mrb[32].mxu1 %vm522_vm2, %v7497_v35  ;;  %v3269_v12 = vsel %vm282_vm0, %v9784_v61, -inf }
 0x7df   : > { %3270 = vmax.xlane.f32.xlu1 %v3269_v12  ;;  %7542 = vmatprep.mubr.msk.f32.mxu1 %vm522_vm2, %v2290_v32  ;;  %v7594_v50 = vpop.f32.mrb[42].mxu0  ;;  %v3266_v9 = vsel %vm282_vm0, %v9786_v45, -inf }
 0x7e0   : > { %v3257_v19 = vpop.f32.mrb[43].mxu0  ;;  %3267 = vmax.xlane.f32.xlu0 %v3266_v9  ;;  %v9803_v53 = vadd.f32 %v7594_v50, %v6766_v39 }
 0x7e1   : > { %v9800_v11 = vadd.f32 %v6765_v31, %v3257_v19 }
 0x7e2   : > { %7543 = vmatmul.mubr.msk.f32.gmra.mrb[34].mxu1 %vm522_vm2, %v7500_v62  ;;  %v3275_v56 = vsel %vm282_vm0, %v9803_v53, -inf }
 0x7e3   : > { %v3272_v3 = vsel %vm282_vm0, %v9800_v11, -inf }
 0x7e4   : > { %3273 = vmax.xlane.f32.xlu0 %v3272_v3 }
 0x7e8   : > { %3276 = vmax.xlane.f32.xlu0 %v3275_v56 }
 0x7f6   : > { %v2919_v21 = vpop.xlane.xlu0 %2918 }
 0x7f7   : > { %v2916_v15 = vpop.xlane.xlu1 %2915 }
 0x7f8   : > { %8728 = vrcp.f32 %v2916_v15 }
 0x7f9   : > { %8730 = vrcp.f32 %v2919_v21 }
 0x7fb   : > { %v2922_v13 = vpop.xlane.xlu1 %2921 }
 0x7fc   : > { %8732 = vrcp.f32 %v2922_v13 }
 0x7ff   : > { %v8446_v17 = vpop.permute.xlu1 %8445  ;;  %v2925_v60 = vpop.xlane.xlu0 %2924 }
 0x800   : > { %v8448_v29 = vunpack.i.h.bf16 %v8446_v17  ;;  %v8447_v63 = vunpack.i.l.bf16 %v8446_v17  ;;  %8734 = vrcp.f32 %v2925_v60 }
 0x802   : > { %v8729_v36 = vpop.eup %8728  ;;  %v8045_v1 = vpack.c.bf16 %v8448_v29, %v8447_v63 }
 0x803   : > { %v8456_v33 = vpop.permute.xlu1 %8455  ;;  %v8451_v40 = vpop.permute.xlu0 %8450  ;;  %v2930_v2 = vmul.f32 %v8729_v36, %v9712_v30 }
 0x804   : > { %v8458_v4 = vunpack.i.h.bf16 %v8456_v33  ;;  %v8457_v42 = vunpack.i.l.bf16 %v8456_v33  ;;  %v8453_v24 = vunpack.i.h.bf16 %v8451_v40  ;;  %v8452_v25 = vunpack.i.l.bf16 %v8451_v40  ;;  %8046 = vmatprep.subr.bf16.mxu1 %v8045_v1  ;;  %v8731_v47 = vpop.eup %8730 }
 0x805   : > { %8048 = vmatpush3.bf16.msra.mxu1 %v8045_v1  ;;  %7567 = vmatprep.mubr.msk.f32.mxu1 %vm282_vm0, %v2930_v2  ;;  %v2931_v59 = vmul.f32 %v8731_v47, %v9710_v41  ;;  %v3537_v2 = vld [vmem:[%s10589_s5 + $0x8] sm:$0xff]  ;;  %v3538_v47 = vld [vmem:[%s10589_s5 + $0x10] sm:$0xff] }
 0x806   : > { %v8073_v26 = vpack.c.bf16 %v8458_v4, %v8457_v42  ;;  %v8049_v10 = vpack.c.bf16 %v8453_v24, %v8452_v25  ;;  %v8733_v37 = vpop.eup %8732  ;;  %v3536_v4 = vld [vmem:[%s10589_s5] sm:$0xff] }
 0x807   : > { %v8461_v16 = vpop.permute.xlu1 %8460  ;;  %v8466_v30 = vpop.permute.xlu0 %8465  ;;  %v2932_v49 = vmul.f32 %v8733_v37, %v9718_v34 }
 0x808   : > { %v8463_v14 = vunpack.i.h.bf16 %v8461_v16  ;;  %v8462_v35 = vunpack.i.l.bf16 %v8461_v16  ;;  %8050 = vmatprep.subr.bf16.mxu1 %v8049_v10  ;;  %8075 = vmatprep.subr.msk.bf16.mxu0 %vm9072_vm3, %v8073_v26  ;;  %v8468_v18 = vunpack.i.h.bf16 %v8466_v30  ;;  %v8467_v7 = vunpack.i.l.bf16 %v8466_v30 }
 0x809   : > { %8052 = vmatpush3.bf16.msra.mxu1 %v8049_v10  ;;  %8078 = vmatpush3.bf16.xpose.msk.msra.mxu0 %vm9072_vm3, %v8073_v26 }
 0x80a   : > { %v8079_v62 = vpack.c.bf16 %v8463_v14, %v8462_v35  ;;  %7573 = vmatprep.subr.mxu1 %v9458_v27  ;;  %v8735_v32 = vpop.eup %8734  ;;  %v8093_v41 = vpack.c.bf16 %v8468_v18, %v8467_v7  ;;  %v3539_v14 = vld [vmem:[%s10589_s5 + $0x18] sm:$0xff]  ;;  %v6795_v18 = vld [vmem:[%s10589_s5 + $0x20] sm:$0xff] }
 0x80b   : > { %v2933_v6 = vmul.f32 %v8735_v32, %v9722_v44  ;;  %v8471_v28 = vpop.permute.xlu1 %8470 }
 0x80c   : > { %7568 = vmatmul.mubr.msk.f32.vlgmr.msra.gmra.mrb[36].mxu1 %vm282_vm0, %v2931_v59  ;;  %8081 = vmatprep.subr.msk.bf16.mxu0 %vm9072_vm3, %v8079_v62  ;;  %v8473_v34 = vunpack.i.h.bf16 %v8471_v28  ;;  %v8472_v38 = vunpack.i.l.bf16 %v8471_v28 }
 0x80d   : > { %7570 = vmatprep.mubr.msk.f32.mxu1 %vm282_vm0, %v2932_v49  ;;  %7574 = vmatpush3.msra.mxu1 %v9458_v27  ;;  %v3815_v27 = vpop.permute.xlu0 %3814  ;;  %v6796_v49 = vld [vmem:[%s10589_s5 + $0x28] sm:$0xff] }
 0x80e   : > { %v8099_v8 = vpack.c.bf16 %v8473_v34, %v8472_v38  ;;  %v6798_v34 = vld [vmem:[%s10589_s5 + $0x38] sm:$0xff] }
 0x80f   : > { %v3817_v44 = vpop.permute.xlu1 %3816 }
 0x810   : > { %7571 = vmatmul.mubr.msk.f32.gmra.mrb[38].mxu1 %vm282_vm0, %v2933_v6 }
 0x811   : > { %8084 = vmatpush3.bf16.xpose.msk.msra.mxu0 %vm9072_vm3, %v8079_v62  ;;  %v3819_v5 = vpop.permute.xlu0 %3818 }
 0x812   : > { %8095 = vmatprep.subr.msk.bf16.mxu0 %vm9072_vm3, %v8093_v41 }
 0x813   : > { %v3821_v12 = vpop.permute.xlu1 %3820 }
 0x818   : > { %7626 = vmatmul.mubr.msk.f32.vlgmr.msra.gmra.mrb[44].mxu0 %vm522_vm2, %v9734_v20 }
 0x819   : > { %7628 = vmatprep.mubr.msk.f32.mxu0 %vm522_vm2, %v9756_v23  ;;  %8098 = vmatpush3.bf16.xpose.msk.msra.mxu0 %vm9072_vm3, %v8093_v41 }
 0x81a   : > { %8101 = vmatprep.subr.msk.bf16.mxu0 %vm9072_vm3, %v8099_v8 }
 0x81c   : > { %7629 = vmatmul.mubr.msk.f32.gmra.mrb[46].mxu0 %vm522_vm2, %v9753_v57 }
 0x81d   : > { %7653 = vmatprep.mubr.msk.f32.mxu0 %vm522_vm2, %v3815_v27 }
 0x821   : > { %8104 = vmatpush3.bf16.xpose.msk.msra.mxu0 %vm9072_vm3, %v8099_v8  ;;  %v6797_v8 = vld [vmem:[%s10589_s5 + $0x30] sm:$0xff] }
 0x828   : > { %7654 = vmatmul.mubr.msk.f32.vlgmr.msra.gmra.mrb[48].mxu0 %vm522_vm2, %v3817_v44 }
 0x829   : > { %7656 = vmatprep.mubr.msk.f32.mxu0 %vm522_vm2, %v3819_v5 }
 0x82c   : > { %7657 = vmatmul.mubr.msk.f32.gmra.mrb[50].mxu0 %vm522_vm2, %v3821_v12 }
 0x86c   : > { %v3271_v31 = vpop.xlane.xlu1 %3270 }
 0x86d   : > { %v3279_v50 = vsub.f32 %v9784_v61, %v3271_v31  ;;  %v3268_v9 = vpop.xlane.xlu0 %3267 }
 0x86e   : > { %v3278_v39 = vsub.f32 %v9786_v45, %v3268_v9 }
 0x86f   : > { %v3284_v19 = vmul.f32 1.442695, %v3279_v50 }
 0x870   : > { %v3282_v3 = vmul.f32 1.442695, %v3278_v39 }
 0x871   : > { %8736 = vpow2.f32 %v3284_v19  ;;  %v3274_v56 = vpop.xlane.xlu0 %3273 }
 0x872   : > { %8738 = vpow2.f32 %v3282_v3  ;;  %v3280_v15 = vsub.f32 %v9800_v11, %v3274_v56 }
 0x874   : > { %v3286_v21 = vmul.f32 1.442695, %v3280_v15 }
 0x875   : > { %v3277_v13 = vpop.xlane.xlu0 %3276 }
 0x876   : > { %8740 = vpow2.f32 %v3286_v21  ;;  %v3281_v17 = vsub.f32 %v9803_v53, %v3277_v13 }
 0x878   : > { %v3288_v60 = vmul.f32 1.442695, %v3281_v17 }
 0x87a   : > { %8742 = vpow2.f32 %v3288_v60 }
 0x87b   : > { %v9849_v29 = vpop.eup %8736 }
 0x87c   : > { %v9851_v61 = vpop.eup %8738  ;;  %v3293_v45 = vsel %vm282_vm0, %v9849_v29, 0.0 }
 0x87d   : > { %3294 = vadd.xlane.f32.xlu0 %v3293_v45  ;;  %v3290_v63 = vsel %vm282_vm0, %v9851_v61, 0.0 }
 0x87e   : > { %3291 = vadd.xlane.f32.xlu1 %v3290_v63 }
 0x880   : > { %v9857_v11 = vpop.eup %8740 }
 0x881   : > { %v3296_v36 = vsel %vm282_vm0, %v9857_v11, 0.0 }
 0x882   : > { %3297 = vadd.xlane.f32.xlu1 %v3296_v36 }
 0x884   : > { %v9861_v53 = vpop.eup %8742 }
 0x885   : > { %v3299_v1 = vsel %vm282_vm0, %v9861_v53, 0.0 }
 0x886   : > { %3300 = vadd.xlane.f32.xlu0 %v3299_v1 }
 0x893   : > { %8475 = vrot.lane.b32.xlu1 %v9139_v43, %s8912_s24 }
 0x897   : > { %8485 = vrot.lane.b32.xlu1 %v9149_v48, %s8905_s17 }
 0x89b   : > { %8490 = vrot.lane.b32.xlu1 %v9151_v51, %s8905_s17 }
 0x89c   : > { %8480 = vrot.lane.b32.xlu0 %v9147_v46, %s8912_s24 }
 0x89f   : > { %4284 = vrot.lane.b32.xlu1 %v9734_v20, %s8906_s18 }
 0x8a0   : > { %4282 = vrot.lane.b32.xlu0 %v9701_v52, %s8906_s18 }
 0x8a3   : > { %4288 = vrot.lane.b32.xlu1 %v9753_v57, %s8906_s18 }
 0x8a4   : > { %4286 = vrot.lane.b32.xlu0 %v9756_v23, %s8906_s18 }
 0x8df   : > { %v7569_v43 = vpop.f32.mrb[36].mxu1 }
 0x8e0   : > { %v3024_v33 = vpop.f32.mrb[37].mxu1 }
 0x8e1   : > { %7575 = vmatprep.mubr.msk.f32.mxu1 %vm522_vm2, %v3024_v33 }
 0x8e2   : > { %7576 = vmatmul.mubr.msk.f32.vlgmr.msra.gmra.mrb[32].mxu1 %vm522_vm2, %v7569_v43 }
 0x8e3   : > { %v7572_v40 = vpop.f32.mrb[38].mxu1 }
 0x8e4   : > { %v3034_v46 = vpop.f32.mrb[39].mxu1 }
 0x8e5   : > { %7578 = vmatprep.mubr.msk.f32.mxu1 %vm522_vm2, %v3034_v46 }
 0x8e6   : > { %7579 = vmatmul.mubr.msk.f32.gmra.mrb[34].mxu1 %vm522_vm2, %v7572_v40 }
 0x8eb   : > { %v7627_v42 = vpop.f32.mrb[44].mxu0 }
 0x8ec   : > { %v9891_v24 = vadd.f32 %v7627_v42, %v3537_v2  ;;  %v3638_v25 = vpop.f32.mrb[45].mxu0 }
 0x8ed   : > { %v9893_v26 = vadd.f32 %v3638_v25, %v3536_v4 }
 0x8ee   : > { %v3660_v10 = vsel %vm282_vm0, %v9891_v24, -inf }
 0x8ef   : > { %v7630_v16 = vpop.f32.mrb[46].mxu0  ;;  %3661 = vmax.xlane.f32.xlu1 %v3660_v10  ;;  %v3657_v37 = vsel %vm282_vm0, %v9893_v26, -inf }
 0x8f0   : > { %v3648_v35 = vpop.f32.mrb[47].mxu0  ;;  %3658 = vmax.xlane.f32.xlu0 %v3657_v37  ;;  %v9907_v59 = vadd.f32 %v7630_v16, %v3539_v14 }
 0x8f1   : > { %v9905_v30 = vadd.f32 %v3648_v35, %v3538_v47 }
 0x8f2   : > { %v3666_v32 = vsel %vm282_vm0, %v9907_v59, -inf }
 0x8f3   : > { %v3663_v62 = vsel %vm282_vm0, %v9905_v30, -inf }
 0x8f4   : > { %3664 = vmax.xlane.f32.xlu0 %v3663_v62 }
 0x8f8   : > { %3667 = vmax.xlane.f32.xlu0 %v3666_v32 }
 0x8fb   : > { %v7655_v7 = vpop.f32.mrb[48].mxu0 }
 0x8fc   : > { %v9919_v6 = vadd.f32 %v7655_v7, %v6796_v49  ;;  %v3912_v41 = vpop.f32.mrb[49].mxu0 }
 0x8fd   : > { %v9921_v28 = vadd.f32 %v6795_v18, %v3912_v41 }
 0x8fe   : > { %v3934_v38 = vsel %vm282_vm0, %v9919_v6, -inf }
 0x8ff   : > { %v7658_v27 = vpop.f32.mrb[50].mxu0  ;;  %3935 = vmax.xlane.f32.xlu0 %v3934_v38  ;;  %v3931_v44 = vsel %vm282_vm0, %v9921_v28, -inf }
 0x900   : > { %v9933_v5 = vadd.f32 %v7658_v27, %v6798_v34  ;;  %v3922_v12 = vpop.f32.mrb[51].mxu0  ;;  %3932 = vmax.xlane.f32.xlu1 %v3931_v44 }
 0x901   : > { %v9935_v31 = vadd.f32 %v6797_v8, %v3922_v12 }
 0x902   : > { %v3940_v50 = vsel %vm282_vm0, %v9933_v5, -inf }
 0x903   : > { %3941 = vmax.xlane.f32.xlu0 %v3940_v50  ;;  %v3937_v9 = vsel %vm282_vm0, %v9935_v31, -inf }
 0x904   : > { %3938 = vmax.xlane.f32.xlu1 %v3937_v9 }
 0x90a   : > { %v3295_v19 = vpop.xlane.xlu0 %3294 }
 0x90b   : > { %v3292_v39 = vpop.xlane.xlu1 %3291 }
 0x90c   : > { %8744 = vrcp.f32 %v3292_v39 }
 0x90d   : > { %8746 = vrcp.f32 %v3295_v19 }
 0x90f   : > { %v3298_v3 = vpop.xlane.xlu1 %3297 }
 0x910   : > { %8748 = vrcp.f32 %v3298_v3 }
 0x913   : > { %v8476_v56 = vpop.permute.xlu1 %8475  ;;  %v3301_v15 = vpop.xlane.xlu0 %3300 }
 0x914   : > { %v8478_v21 = vunpack.i.h.bf16 %v8476_v56  ;;  %v8477_v13 = vunpack.i.l.bf16 %v8476_v56  ;;  %8750 = vrcp.f32 %v3301_v15 }
 0x915   : > { %8495 = vrot.lane.b32.xlu1 %v9149_v48, %s8907_s19 }
 0x916   : > { %v8745_v17 = vpop.eup %8744  ;;  %v8065_v60 = vpack.c.bf16 %v8478_v21, %v8477_v13 }
 0x917   : > { %v8486_v45 = vpop.permute.xlu1 %8485  ;;  %v8481_v63 = vpop.permute.xlu0 %8480  ;;  %v3306_v36 = vmul.f32 %v8745_v17, %v9851_v61 }
 0x918   : > { %v8488_v1 = vunpack.i.h.bf16 %v8486_v45  ;;  %v8487_v43 = vunpack.i.l.bf16 %v8486_v45  ;;  %v8483_v33 = vunpack.i.h.bf16 %v8481_v63  ;;  %v8482_v40 = vunpack.i.l.bf16 %v8481_v63  ;;  %8066 = vmatprep.subr.bf16.mxu1 %v8065_v60  ;;  %v8747_v4 = vpop.eup %8746 }
 0x919   : > { %8068 = vmatpush3.bf16.msra.mxu1 %v8065_v60  ;;  %7603 = vmatprep.mubr.msk.f32.mxu1 %vm282_vm0, %v3306_v36  ;;  %v3307_v61 = vmul.f32 %v8747_v4, %v9849_v29 }
 0x91a   : > { %v8113_v46 = vpack.c.bf16 %v8488_v1, %v8487_v43  ;;  %v8069_v2 = vpack.c.bf16 %v8483_v33, %v8482_v40  ;;  %v8749_v10 = vpop.eup %8748 }
 0x91b   : > { %v8491_v42 = vpop.permute.xlu1 %8490  ;;  %v4283_v25 = vpop.permute.xlu0 %4282  ;;  %v3308_v35 = vmul.f32 %v8749_v10, %v9857_v11 }
 0x91c   : > { %v8493_v47 = vunpack.i.h.bf16 %v8491_v42  ;;  %v8492_v16 = vunpack.i.l.bf16 %v8491_v42  ;;  %8070 = vmatprep.subr.bf16.mxu1 %v8069_v2  ;;  %8115 = vmatprep.subr.msk.bf16.mxu0 %vm9072_vm3, %v8113_v46 }
 0x91d   : > { %7697 = vmatprep.mubr.msk.f32.mxu0 %vm522_vm2, %v4283_v25  ;;  %8072 = vmatpush3.bf16.msra.mxu1 %v8069_v2 }
 0x91e   : > { %v8119_v37 = vpack.c.bf16 %v8493_v47, %v8492_v16  ;;  %8118 = vmatpush3.bf16.xpose.msk.msra.mxu0 %vm9072_vm3, %v8113_v46  ;;  %7609 = vmatprep.subr.mxu1 %v9563_v0  ;;  %v8751_v14 = vpop.eup %8750 }
 0x91f   : > { %v3309_v29 = vmul.f32 %v8751_v14, %v9861_v53  ;;  %v4285_v62 = vpop.permute.xlu1 %4284  ;;  %v4287_v32 = vpop.permute.xlu0 %4286  ;;  %v6821_v14 = vld [vmem:[%s10589_s5 + $0x50] sm:$0xff] }
 0x920   : > { %7604 = vmatmul.mubr.msk.f32.vlgmr.msra.gmra.mrb[40].mxu1 %vm282_vm0, %v3307_v61  ;;  %8121 = vmatprep.subr.msk.bf16.mxu0 %vm9072_vm3, %v8119_v37 }
 0x921   : > { %7606 = vmatprep.mubr.msk.f32.mxu1 %vm282_vm0, %v3308_v35  ;;  %7610 = vmatpush3.msra.mxu1 %v9563_v0 }
 0x923   : > { %v4289_v11 = vpop.permute.xlu1 %4288 }
 0x924   : > { %7607 = vmatmul.mubr.msk.f32.gmra.mrb[42].mxu1 %vm282_vm0, %v3309_v29 }
 0x926   : > { %8124 = vmatpush3.bf16.xpose.msk.msra.mxu0 %vm9072_vm3, %v8119_v37 }
 0x92d   : > { %7698 = vmatmul.mubr.msk.f32.vlgmr.msra.gmra.mrb[52].mxu0 %vm522_vm2, %v4285_v62  ;;  %v6822_v62 = vld [vmem:[%s10589_s5 + $0x58] sm:$0xff] }
 0x92e   : > { %7700 = vmatprep.mubr.msk.f32.mxu0 %vm522_vm2, %v4287_v32 }
 0x931   : > { %7701 = vmatmul.mubr.msk.f32.gmra.mrb[54].mxu0 %vm522_vm2, %v4289_v11 }
 0x97c   : > { %v3662_v49 = vpop.xlane.xlu1 %3661 }
 0x97d   : > { %v3670_v18 = vsub.f32 %v9891_v24, %v3662_v49  ;;  %v3659_v0 = vpop.xlane.xlu0 %3658 }
 0x97e   : > { %v3669_v53 = vsub.f32 %v9893_v26, %v3659_v0  ;;  %v6820_v0 = vld [vmem:[%s10589_s5 + $0x48] sm:$0xff] }
 0x97f   : > { %v3675_v7 = vmul.f32 1.442695, %v3670_v18 }
 0x980   : > { %v3673_v41 = vmul.f32 1.442695, %v3669_v53 }
 0x981   : > { %8752 = vpow2.f32 %v3675_v7  ;;  %v3665_v34 = vpop.xlane.xlu0 %3664 }
 0x982   : > { %8754 = vpow2.f32 %v3673_v41  ;;  %v3671_v38 = vsub.f32 %v9905_v30, %v3665_v34 }
 0x984   : > { %v3677_v8 = vmul.f32 1.442695, %v3671_v38 }
 0x985   : > { %v3668_v27 = vpop.xlane.xlu0 %3667 }
 0x986   : > { %8756 = vpow2.f32 %v3677_v8  ;;  %v3672_v44 = vsub.f32 %v9907_v59, %v3668_v27 }
 0x988   : > { %v3679_v12 = vmul.f32 1.442695, %v3672_v44 }
 0x98a   : > { %8758 = vpow2.f32 %v3679_v12 }
 0x98b   : > { %v9969_v50 = vpop.eup %8752 }
 0x98c   : > { %v9971_v24 = vpop.eup %8754  ;;  %v3936_v9 = vpop.xlane.xlu0 %3935  ;;  %v3684_v26 = vsel %vm282_vm0, %v9969_v50, 0.0 }
 0x98d   : > { %v3944_v39 = vsub.f32 %v9919_v6, %v3936_v9  ;;  %v3933_v19 = vpop.xlane.xlu1 %3932  ;;  %3685 = vadd.xlane.f32.xlu0 %v3684_v26  ;;  %v3681_v30 = vsel %vm282_vm0, %v9971_v24, 0.0 }
 0x98e   : > { %v3943_v3 = vsub.f32 %v9921_v28, %v3933_v19  ;;  %3682 = vadd.xlane.f32.xlu1 %v3681_v30 }
 0x98f   : > { %v3949_v59 = vmul.f32 1.442695, %v3944_v39 }
 0x990   : > { %v9979_v56 = vpop.eup %8756  ;;  %v3947_v15 = vmul.f32 1.442695, %v3943_v3  ;;  %v3942_v21 = vpop.xlane.xlu0 %3941 }
 0x991   : > { %8760 = vpow2.f32 %v3949_v59  ;;  %v3946_v13 = vsub.f32 %v9933_v5, %v3942_v21  ;;  %v3939_v17 = vpop.xlane.xlu1 %3938  ;;  %v3687_v6 = vsel %vm282_vm0, %v9979_v56, 0.0 }
 0x992   : > { %8762 = vpow2.f32 %v3947_v15  ;;  %3688 = vadd.xlane.f32.xlu1 %v3687_v6  ;;  %v3945_v42 = vsub.f32 %v9935_v31, %v3939_v17 }
 0x993   : > { %v3953_v60 = vmul.f32 1.442695, %v3946_v13 }
 0x994   : > { %v9984_v45 = vpop.eup %8758  ;;  %v3951_v25 = vmul.f32 1.442695, %v3945_v42 }
 0x995   : > { %8764 = vpow2.f32 %v3953_v60  ;;  %v8496_v28 = vpop.permute.xlu1 %8495  ;;  %v3690_v63 = vsel %vm282_vm0, %v9984_v45, 0.0 }
 0x996   : > { %v8498_v36 = vunpack.i.h.bf16 %v8496_v28  ;;  %v8497_v1 = vunpack.i.l.bf16 %v8496_v28  ;;  %3691 = vadd.xlane.f32.xlu0 %v3690_v63  ;;  %8766 = vpow2.f32 %v3951_v25 }
 0x998   : > { %v8085_v43 = vpack.c.bf16 %v8498_v36, %v8497_v1 }
 0x99a   : > { %8086 = vmatprep.subr.bf16.mxu1 %v8085_v43 }
 0x99b   : > { %v9988_v5 = vpop.eup %8760 }
 0x99c   : > { %v9990_v33 = vpop.eup %8762  ;;  %v3958_v40 = vsel %vm282_vm0, %v9988_v5, 0.0 }
 0x99d   : > { %3959 = vadd.xlane.f32.xlu0 %v3958_v40  ;;  %v3955_v46 = vsel %vm282_vm0, %v9990_v33, 0.0 }
 0x99e   : > { %3956 = vadd.xlane.f32.xlu1 %v3955_v46 }
 0x99f   : > { %v9996_v2 = vpop.eup %8764 }
 0x9a0   : > { %v3964_v4 = vsel %vm282_vm0, %v9996_v2, 0.0  ;;  %v10011_v10 = vpop.eup %8766 }
 0x9a1   : > { %3965 = vadd.xlane.f32.xlu0 %v3964_v4  ;;  %v3961_v47 = vsel %vm282_vm0, %v10011_v10, 0.0 }
 0x9af   : > { %8505 = vrot.lane.b32.xlu1 %v9149_v48, %s8908_s20 }
 0x9b7   : > { %8500 = vrot.lane.b32.xlu0 %v9151_v51, %s8907_s19 }
 0x9bb   : > { %8515 = vrot.lane.b32.xlu0 %v9149_v48, %s8909_s22 }
 0x9bf   : > { %4657 = vrot.lane.b32.xlu0 %v9701_v52, %s8910_s23 }
 0x9c3   : > { %4661 = vrot.lane.b32.xlu0 %v9756_v23, %s8910_s23 }
 0x9d3   : > { %3962 = vadd.xlane.f32.xlu1 %v3961_v47 }
 0x9e4   : > { %8510 = vrot.lane.b32.xlu1 %v9151_v51, %s8908_s20 }
 0x9e8   : > { %8520 = vrot.lane.b32.xlu1 %v9151_v51, %s8909_s22 }
 0x9ec   : > { %4659 = vrot.lane.b32.xlu1 %v9734_v20, %s8910_s23  ;;  %v6819_v20 = vld [vmem:[%s10589_s5 + $0x40] sm:$0xff] }
 0x9f0   : > { %4663 = vrot.lane.b32.xlu1 %v9753_v57, %s8910_s23 }
 0x9f3   : > { %v7605_v52 = vpop.f32.mrb[40].mxu1 }
 0x9f4   : > { %v3400_v23 = vpop.f32.mrb[41].mxu1 }
 0x9f5   : > { %7611 = vmatprep.mubr.msk.f32.mxu1 %vm522_vm2, %v3400_v23 }
 0x9f6   : > { %7612 = vmatmul.mubr.msk.f32.vlgmr.msra.gmra.mrb[32].mxu1 %vm522_vm2, %v7605_v52 }
 0x9f7   : > { %8088 = vmatpush3.bf16.msra.mxu1 %v8085_v43  ;;  %v7608_v31 = vpop.f32.mrb[42].mxu1 }
 0x9f8   : > { %v3410_v16 = vpop.f32.mrb[43].mxu1 }
 0x9f9   : > { %7614 = vmatprep.mubr.msk.f32.mxu1 %vm522_vm2, %v3410_v16 }
 0x9fa   : > { %7615 = vmatmul.mubr.msk.f32.gmra.mrb[34].mxu1 %vm522_vm2, %v7608_v31 }
 0xa00   : > { %v7699_v61 = vpop.f32.mrb[52].mxu0 }
 0xa01   : > { %v4380_v37 = vpop.f32.mrb[53].mxu0  ;;  %v10051_v7 = vadd.f32 %v7699_v61, %v6820_v0  ;;  %v8886_v0 = vld [vmem:[#allocation2 + $0x60] sm:$0xff] }
 0xa02   : > { %v10030_v57 = vadd.f32 %v6819_v20, %v4380_v37 }
 0xa03   : > { %v4402_v41 = vsel %vm282_vm0, %v10051_v7, -inf }
 0xa04   : > { %v7702_v35 = vpop.f32.mrb[54].mxu0  ;;  %v4399_v29 = vsel %vm282_vm0, %v10030_v57, -inf }
 0xa05   : > { %v4390_v32 = vpop.f32.mrb[55].mxu0  ;;  %4400 = vmax.xlane.f32.xlu0 %v4399_v29  ;;  %v10042_v49 = vadd.f32 %v7702_v35, %v6822_v62  ;;  %v10089_v62 = vld [vmem:[%s10587_s3] sm:$0xff] }
 0xa06   : > { %v10040_v11 = vadd.f32 %v6821_v14, %v4390_v32  ;;  %v10074_v14 = vld [vmem:[%s10587_s3 + $0x8] sm:$0xff] }
 0xa07   : > { %v4408_v53 = vsel %vm282_vm0, %v10042_v49, -inf }
 0xa08   : > { %v4405_v18 = vsel %vm282_vm0, %v10040_v11, -inf }
 0xa09   : > { %4406 = vmax.xlane.f32.xlu0 %v4405_v18 }
 0xa0d   : > { %4409 = vmax.xlane.f32.xlu0 %v4408_v53 }
 0xa14   : > { %4403 = vmax.xlane.f32.xlu1 %v4402_v41 }
 0xa1a   : > { %v3686_v38 = vpop.xlane.xlu0 %3685 }
 0xa1b   : > { %v3683_v34 = vpop.xlane.xlu1 %3682 }
 0xa1c   : > { %8768 = vrcp.f32 %v3683_v34 }
 0xa1d   : > { %8770 = vrcp.f32 %v3686_v38 }
 0xa1f   : > { %v3689_v44 = vpop.xlane.xlu1 %3688 }
 0xa20   : > { %8772 = vrcp.f32 %v3689_v44 }
 0xa23   : > { %v3692_v27 = vpop.xlane.xlu0 %3691 }
 0xa24   : > { %8774 = vrcp.f32 %v3692_v27 }
 0xa26   : > { %v8769_v8 = vpop.eup %8768 }
 0xa27   : > { %v3697_v12 = vmul.f32 %v8769_v8, %v9971_v24  ;;  %v8771_v17 = vpop.eup %8770 }
 0xa28   : > { %v3698_v36 = vmul.f32 %v8771_v17, %v9969_v50  ;;  %v8888_v17 = vld [vmem:[#allocation2 + $0x70] sm:$0xff] }
 0xa29   : > { %7639 = vmatprep.mubr.msk.f32.mxu1 %vm282_vm0, %v3697_v12 }
 0xa2a   : > { %v3960_v9 = vpop.xlane.xlu0 %3959  ;;  %v8773_v60 = vpop.eup %8772 }
 0xa2b   : > { %v3957_v26 = vpop.xlane.xlu1 %3956  ;;  %v3699_v46 = vmul.f32 %v8773_v60, %v9979_v56 }
 0xa2c   : > { %8776 = vrcp.f32 %v3957_v26 }
 0xa2d   : > { %8778 = vrcp.f32 %v3960_v9 }
 0xa2e   : > { %v3966_v39 = vpop.xlane.xlu0 %3965  ;;  %v8775_v43 = vpop.eup %8774 }
 0xa2f   : > { %v8506_v19 = vpop.permute.xlu1 %8505  ;;  %v3700_v50 = vmul.f32 %v8775_v43, %v9984_v45 }
 0xa30   : > { %v8508_v3 = vunpack.i.h.bf16 %v8506_v19  ;;  %v8507_v59 = vunpack.i.l.bf16 %v8506_v19 }
 0xa32   : > { %v8501_v30 = vpop.permute.xlu0 %8500  ;;  %v8105_v24 = vpack.c.bf16 %v8508_v3, %v8507_v59 }
 0xa33   : > { %v8503_v15 = vunpack.i.h.bf16 %v8501_v30  ;;  %v8502_v21 = vunpack.i.l.bf16 %v8501_v30 }
 0xa35   : > { %v8089_v13 = vpack.c.bf16 %v8503_v15, %v8502_v21  ;;  %v8887_v21 = vld [vmem:[#allocation2 + $0x68] sm:$0xff] }
 0xa36   : > { %v8516_v6 = vpop.permute.xlu0 %8515  ;;  %v8777_v4 = vpop.eup %8776 }
 0xa37   : > { %v8518_v28 = vunpack.i.h.bf16 %v8516_v6  ;;  %v8517_v63 = vunpack.i.l.bf16 %v8516_v6  ;;  %8090 = vmatprep.subr.bf16.mxu1 %v8089_v13  ;;  %v3971_v42 = vmul.f32 %v8777_v4, %v9990_v33  ;;  %v8779_v31 = vpop.eup %8778  ;;  %v8889_v6 = vld [vmem:[#allocation2 + $0x78] sm:$0xff] }
 0xa38   : > { %8092 = vmatpush3.bf16.msra.mxu1 %v8089_v13  ;;  %v3972_v33 = vmul.f32 %v8779_v31, %v9988_v5  ;;  %v8534_v13 = vpack.i.bf16 %v8887_v21, %v8886_v0  ;;  %v8539_v60 = vpack.i.bf16 %v8889_v6, %v8888_v17 }
 0xa39   : > { %v8133_v1 = vpack.c.bf16 %v8518_v28, %v8517_v63  ;;  %8106 = vmatprep.subr.bf16.mxu1 %v8105_v24 }
 0xa3a   : > { %v4658_v40 = vpop.permute.xlu0 %4657 }
 0xa3b   : > { %7640 = vmatmul.mubr.msk.f32.vlgmr.msra.gmra.mrb[44].mxu1 %vm282_vm0, %v3698_v36  ;;  %8135 = vmatprep.subr.msk.bf16.mxu0 %vm9072_vm3, %v8133_v1 }
 0xa3c   : > { %7733 = vmatprep.mubr.msk.f32.mxu0 %vm522_vm2, %v4658_v40  ;;  %7642 = vmatprep.mubr.msk.f32.mxu1 %vm282_vm0, %v3699_v46 }
 0xa3d   : > { %8108 = vmatpush3.bf16.msra.mxu1 %v8105_v24  ;;  %8138 = vmatpush3.bf16.xpose.msk.msra.mxu0 %vm9072_vm3, %v8133_v1  ;;  %v10125_v24 = vmul.f32 0.35355338, %v8887_v21  ;;  %v10130_v1 = vmul.f32 0.35355338, %v8889_v6 }
 0xa3e   : > { %v4662_v32 = vpop.permute.xlu0 %4661 }
 0xa3f   : > { %7643 = vmatmul.mubr.msk.f32.gmra.mrb[46].mxu1 %vm282_vm0, %v3700_v50 }
 0xa40   : > { %7667 = vmatprep.mubr.msk.f32.mxu1 %vm282_vm0, %v3971_v42  ;;  %v10150_v42 = vmul.f32 0.35355338, %v8888_v17  ;;  %v6841_v17 = vld [vmem:[%s10589_s5 + $0x70] sm:$0xff] }
 0xa60   : > { %v3963_v56 = vpop.xlane.xlu1 %3962 }
 0xa61   : > { %8780 = vrcp.f32 %v3963_v56 }
 0xa62   : > { %8782 = vrcp.f32 %v3966_v39 }
 0xa64   : > { %v8511_v25 = vpop.permute.xlu1 %8510 }
 0xa65   : > { %v8513_v47 = vunpack.i.h.bf16 %v8511_v25  ;;  %v8512_v52 = vunpack.i.l.bf16 %v8511_v25 }
 0xa67   : > { %v8109_v23 = vpack.c.bf16 %v8513_v47, %v8512_v52 }
 0xa68   : > { %v8521_v16 = vpop.permute.xlu1 %8520 }
 0xa69   : > { %v8523_v20 = vunpack.i.h.bf16 %v8521_v16  ;;  %v8522_v61 = vunpack.i.l.bf16 %v8521_v16  ;;  %8110 = vmatprep.subr.bf16.mxu1 %v8109_v23 }
 0xa6a   : > { %8112 = vmatpush3.bf16.msra.mxu1 %v8109_v23 }
 0xa6b   : > { %v8781_v45 = vpop.eup %8780  ;;  %v8139_v37 = vpack.c.bf16 %v8523_v20, %v8522_v61  ;;  %7673 = vmatprep.subr.mxu1 %v10074_v14 }
 0xa6c   : > { %v8783_v35 = vpop.eup %8782  ;;  %v3973_v29 = vmul.f32 %v8781_v45, %v10011_v10  ;;  %v4660_v10 = vpop.permute.xlu1 %4659 }
 0xa6d   : > { %7668 = vmatmul.mubr.msk.f32.vlgmr.msra.gmra.mrb[48].mxu1 %vm282_vm0, %v3972_v33  ;;  %8141 = vmatprep.subr.msk.bf16.mxu0 %vm9072_vm3, %v8139_v37  ;;  %v3974_v5 = vmul.f32 %v8783_v35, %v9996_v2  ;;  %v10095_v2 = vmul.f32 0.35355338, %v8886_v0 }
 0xa6e   : > { %7670 = vmatprep.mubr.msk.f32.mxu1 %vm282_vm0, %v3973_v29  ;;  %8144 = vmatpush3.bf16.xpose.msk.msra.mxu0 %vm9072_vm3, %v8139_v37 }
 0xa6f   : > { %7674 = vmatpush3.msra.mxu1 %v10074_v14 }
 0xa70   : > { %7681 = vmatprep.subr.mxu1 %v10089_v62  ;;  %v4664_v18 = vpop.permute.xlu1 %4663 }
 0xa71   : > { %7671 = vmatmul.mubr.msk.f32.gmra.mrb[50].mxu1 %vm282_vm0, %v3974_v5 }
 0xa75   : > { %7734 = vmatmul.mubr.msk.f32.vlgmr.msra.gmra.mrb[56].mxu0 %vm522_vm2, %v4660_v10 }
 0xa76   : > { %7736 = vmatprep.mubr.msk.f32.mxu0 %vm522_vm2, %v4662_v32 }
 0xa79   : > { %7737 = vmatmul.mubr.msk.f32.gmra.mrb[58].mxu0 %vm522_vm2, %v4664_v18 }
 0xa7a   : > { %7769 = vmatprep.mubr.msk.f32.mxu0 %vm522_vm2, %v10095_v2 }
 0xa92   : > { %v4401_v53 = vpop.xlane.xlu0 %4400 }
 0xa93   : > { %v4411_v41 = vsub.f32 %v10030_v57, %v4401_v53 }
 0xa95   : > { %v4415_v34 = vmul.f32 1.442695, %v4411_v41 }
 0xa96   : > { %v4407_v38 = vpop.xlane.xlu0 %4406 }
 0xa97   : > { %8784 = vpow2.f32 %v4415_v34  ;;  %v4413_v8 = vsub.f32 %v10040_v11, %v4407_v38 }
 0xa99   : > { %v4419_v27 = vmul.f32 1.442695, %v4413_v8  ;;  %v6840_v8 = vld [vmem:[%s10589_s5 + $0x68] sm:$0xff] }
 0xa9a   : > { %v4410_v44 = vpop.xlane.xlu0 %4409 }
 0xa9b   : > { %8786 = vpow2.f32 %v4419_v27  ;;  %v4414_v12 = vsub.f32 %v10042_v49, %v4410_v44  ;;  %v6839_v44 = vld [vmem:[%s10589_s5 + $0x60] sm:$0xff] }
 0xa9d   : > { %v4421_v57 = vmul.f32 1.442695, %v4414_v12 }
 0xaa1   : > { %v10103_v9 = vpop.eup %8784  ;;  %v4404_v26 = vpop.xlane.xlu1 %4403 }
 0xaa2   : > { %v4412_v39 = vsub.f32 %v10051_v7, %v4404_v26  ;;  %v4423_v19 = vsel %vm282_vm0, %v10103_v9, 0.0 }
 0xaa3   : > { %4424 = vadd.xlane.f32.xlu1 %v4423_v19 }
 0xaa4   : > { %v4417_v30 = vmul.f32 1.442695, %v4412_v39 }
 0xaa5   : > { %v10108_v3 = vpop.eup %8786 }
 0xaa6   : > { %8788 = vpow2.f32 %v4417_v30  ;;  %v4429_v11 = vsel %vm282_vm0, %v10108_v3, 0.0 }
 0xaa7   : > { %4430 = vadd.xlane.f32.xlu1 %v4429_v11  ;;  %8790 = vpow2.f32 %v4421_v57 }
 0xab0   : > { %v10112_v49 = vpop.eup %8788 }
 0xab1   : > { %v4426_v59 = vsel %vm282_vm0, %v10112_v49, 0.0  ;;  %v10116_v7 = vpop.eup %8790 }
 0xab2   : > { %4427 = vadd.xlane.f32.xlu0 %v4426_v59  ;;  %v4432_v15 = vsel %vm282_vm0, %v10116_v7, 0.0 }
 0xab6   : > { %4433 = vadd.xlane.f32.xlu0 %v4432_v15 }
 0xab8   : > { %8525 = vrot.lane.b32.xlu1 %v9149_v48, %s8911_s10 }
 0xabc   : > { %8535 = vrot.lane.b32.xlu1 %v8534_v13, %s8903_s15 }
 0xac0   : > { %8540 = vrot.lane.b32.xlu1 %v8539_v60, %s8903_s15 }
 0xac4   : > { %8550 = vrot.lane.b32.xlu1 %v8539_v60, %s8902_s14 }
 0xac8   : > { %5324 = vrot.lane.b32.xlu1 %v10125_v24, %s8904_s16 }
 0xac9   : > { %v7613_v28 = vpop.f32.mrb[32].mxu1 }
 0xaca   : > { %v3521_v63 = vadd.f32 %v7613_v28, %v9739_v22  ;;  %v3497_v36 = vpop.f32.mrb[33].mxu1 }
 0xacb   : > { %v3520_v43 = vadd.f32 %v9739_v22, %v3497_v36 }
 0xacc   : > { %3525 = vst.msk [vmem:[%s9748_s25 + $0x28] sm:$0xff] %vm282_vm0, %v3521_v63  ;;  %5328 = vrot.lane.b32.xlu1 %v10130_v1, %s8904_s16  ;;  %8530 = vrot.lane.b32.xlu0 %v9151_v51, %s8911_s10 }
 0xacd   : > { %3524 = vst.msk [vmem:[%s9748_s25 + $0x20] sm:$0xff] %vm282_vm0, %v3520_v43  ;;  %v7616_v40 = vpop.f32.mrb[34].mxu1 }
 0xace   : > { %v3523_v46 = vadd.f32 %v7616_v40, %v9739_v22  ;;  %v3507_v4 = vpop.f32.mrb[35].mxu1 }
 0xacf   : > { %v3522_v50 = vadd.f32 %v9739_v22, %v3507_v4 }
 0xad0   : > { %3527 = vst.msk [vmem:[%s9748_s25 + $0x38] sm:$0xff] %vm282_vm0, %v3523_v46  ;;  %8545 = vrot.lane.b32.xlu0 %v8534_v13, %s8902_s14 }
 0xad1   : > { %3526 = vst.msk [vmem:[%s9748_s25 + $0x30] sm:$0xff] %vm282_vm0, %v3522_v50 }
 0xad4   : > { %5322 = vrot.lane.b32.xlu0 %v10095_v2, %s8904_s16 }
 0xad8   : > { %5326 = vrot.lane.b32.xlu0 %v10150_v42, %s8904_s16 }
 0xb0e   : > { %v7641_v56 = vpop.f32.mrb[44].mxu1 }
 0xb0f   : > { %v3791_v25 = vpop.f32.mrb[45].mxu1 }
 0xb12   : > { %v10154_v47 = vpop.f32.mrb[46].mxu1 }
 0xb13   : > { %v3801_v52 = vpop.f32.mrb[47].mxu1 }
 0xb30   : > { %v4425_v22 = vpop.xlane.xlu1 %4424 }
 0xb31   : > { %8792 = vrcp.f32 %v4425_v22 }
 0xb34   : > { %v4431_v23 = vpop.xlane.xlu1 %4430 }
 0xb38   : > { %v8526_v31 = vpop.permute.xlu1 %8525 }
 0xb39   : > { %v8528_v45 = vunpack.i.h.bf16 %v8526_v31  ;;  %v8527_v33 = vunpack.i.l.bf16 %v8526_v31 }
 0xb3b   : > { %v8125_v0 = vpack.c.bf16 %v8528_v45, %v8527_v33  ;;  %v8793_v15 = vpop.eup %8792 }
 0xb3c   : > { %v8536_v16 = vpop.permute.xlu1 %8535  ;;  %v4439_v50 = vmul.f32 %v8793_v15, %v10103_v9 }
 0xb3d   : > { %v8538_v20 = vunpack.i.h.bf16 %v8536_v16  ;;  %v8537_v61 = vunpack.i.l.bf16 %v8536_v16 }
 0xb3f   : > { %v8153_v37 = vpack.c.bf16 %v8538_v20, %v8537_v61  ;;  %v4428_v35 = vpop.xlane.xlu0 %4427 }
 0xb40   : > { %v8541_v29 = vpop.permute.xlu1 %8540  ;;  %v7669_v5 = vpop.f32.mrb[48].mxu1  ;;  %8794 = vrcp.f32 %v4428_v35 }
 0xb41   : > { %v8543_v10 = vunpack.i.h.bf16 %v8541_v29  ;;  %v8542_v32 = vunpack.i.l.bf16 %v8541_v29  ;;  %8155 = vmatprep.subr.msk.bf16.mxu0 %vm9072_vm3, %v8153_v37  ;;  %v4065_v18 = vpop.f32.mrb[49].mxu1  ;;  %8796 = vrcp.f32 %v4431_v23 }
 0xb42   : > { %8158 = vmatpush3.bf16.xpose.msk.msra.mxu0 %vm9072_vm3, %v8153_v37  ;;  %7675 = vmatprep.mubr.msk.f32.mxu1 %vm522_vm2, %v4065_v18 }
 0xb43   : > { %v8159_v53 = vpack.c.bf16 %v8543_v10, %v8542_v32  ;;  %v4434_v41 = vpop.xlane.xlu0 %4433  ;;  %7676 = vmatmul.mubr.msk.f32.vlgmr.msra.gmra.mrb[52].mxu1 %vm522_vm2, %v7669_v5 }
 0xb44   : > { %7682 = vmatpush3.msra.mxu1 %v10089_v62  ;;  %v7672_v34 = vpop.f32.mrb[50].mxu1  ;;  %8798 = vrcp.f32 %v4434_v41  ;;  %v8551_v30 = vpop.permute.xlu1 %8550 }
 0xb45   : > { %8126 = vmatprep.subr.bf16.mxu1 %v8125_v0  ;;  %8161 = vmatprep.subr.msk.bf16.mxu0 %vm9072_vm3, %v8159_v53  ;;  %v4075_v38 = vpop.f32.mrb[51].mxu1  ;;  %v8553_v36 = vunpack.i.h.bf16 %v8551_v30  ;;  %v8552_v43 = vunpack.i.l.bf16 %v8551_v30 }
 0xb46   : > { %7678 = vmatprep.mubr.msk.f32.mxu1 %vm522_vm2, %v4075_v38 }
 0xb47   : > { %v8531_v27 = vpop.permute.xlu0 %8530  ;;  %7679 = vmatmul.mubr.msk.f32.gmra.mrb[54].mxu1 %vm522_vm2, %v7672_v34  ;;  %v8179_v23 = vpack.c.bf16 %v8553_v36, %v8552_v43 }
 0xb48   : > { %v8533_v12 = vunpack.i.h.bf16 %v8531_v27  ;;  %v8532_v26 = vunpack.i.l.bf16 %v8531_v27  ;;  %7683 = vmatprep.mubr.msk.f32.mxu1 %vm522_vm2, %v3791_v25  ;;  %v7735_v39 = vpop.f32.mrb[56].mxu0  ;;  %v6842_v25 = vld [vmem:[%s10589_s5 + $0x78] sm:$0xff]  ;;  %v5325_v45 = vpop.permute.xlu1 %5324 }
 0xb49   : > { %v10174_v19 = vadd.f32 %v7735_v39, %v6840_v8  ;;  %v4755_v57 = vpop.f32.mrb[57].mxu0 }
 0xb4a   : > { %v8129_v11 = vpack.c.bf16 %v8533_v12, %v8532_v26  ;;  %v10176_v59 = vadd.f32 %v6839_v44, %v4755_v57  ;;  %8164 = vmatpush3.bf16.xpose.msk.msra.mxu0 %vm9072_vm3, %v8159_v53 }
 0xb4b   : > { %v8546_v21 = vpop.permute.xlu0 %8545  ;;  %7684 = vmatmul.mubr.msk.f32.vlgmr.msra.gmra.mrb[52].mxu1 %vm522_vm2, %v7641_v56  ;;  %v4777_v13 = vsel %vm282_vm0, %v10174_v19, -inf  ;;  %v8795_v56 = vpop.eup %8794 }
 0xb4c   : > { %v8548_v6 = vunpack.i.h.bf16 %v8546_v21  ;;  %v8547_v60 = vunpack.i.l.bf16 %v8546_v21  ;;  %8128 = vmatpush3.bf16.msra.mxu1 %v8125_v0  ;;  %4778 = vmax.xlane.f32.xlu1 %v4777_v13  ;;  %v7738_v28 = vpop.f32.mrb[58].mxu0  ;;  %v4774_v63 = vsel %vm282_vm0, %v10176_v59, -inf  ;;  %v8797_v22 = vpop.eup %8796  ;;  %v4440_v9 = vmul.f32 %v8795_v56, %v10112_v49  ;;  %v10213_v49 = vld [vmem:[%s10587_s3 + $0x10] sm:$0xff]  ;;  %v6859_v21 = vld [vmem:[%s10589_s5 + $0x80] sm:$0xff] }
 0xb4d   : > { %7686 = vmatprep.mubr.msk.f32.mxu1 %vm522_vm2, %v3801_v52  ;;  %8130 = vmatprep.subr.bf16.mxu1 %v8129_v11  ;;  %v4765_v40 = vpop.f32.mrb[59].mxu0  ;;  %v4771_v31 = vadd.f32 %v7738_v28, %v6842_v25  ;;  %v4441_v16 = vmul.f32 %v8797_v22, %v10108_v3  ;;  %v5329_v37 = vpop.permute.xlu1 %5328  ;;  %v6861_v28 = vld [vmem:[%s10589_s5 + $0x90] sm:$0xff] }
 0xb4e   : > { %v8173_v46 = vpack.c.bf16 %v8548_v6, %v8547_v60  ;;  %v4766_v4 = vadd.f32 %v6841_v17, %v4765_v40  ;;  %4775 = vmax.xlane.f32.xlu0 %v4774_v63  ;;  %v6860_v60 = vld [vmem:[%s10589_s5 + $0x88] sm:$0xff]  ;;  %v6862_v40 = vld [vmem:[%s10589_s5 + $0x98] sm:$0xff] }
 0xb4f   : > { %7687 = vmatmul.mubr.msk.f32.gmra.mrb[54].mxu1 %vm522_vm2, %v10154_v47  ;;  %v8799_v47 = vpop.eup %8798  ;;  %v5323_v20 = vpop.permute.xlu0 %5322  ;;  %v4783_v61 = vsel %vm282_vm0, %v4771_v31, -inf }
 0xb50   : > { %8132 = vmatpush3.bf16.msra.mxu1 %v8129_v11  ;;  %7711 = vmatprep.mubr.msk.f32.mxu1 %vm282_vm0, %v4439_v50  ;;  %v4780_v52 = vsel %vm282_vm0, %v4766_v4, -inf  ;;  %v4442_v3 = vmul.f32 %v8799_v47, %v10116_v7 }
 0xb51   : > { %7770 = vmatmul.mubr.msk.f32.vlgmr.msra.gmra.mrb[60].mxu0 %vm522_vm2, %v10125_v24  ;;  %8175 = vmatprep.subr.msk.bf16.mxu0 %vm9072_vm3, %v8173_v46 }
 0xb52   : > { %7772 = vmatprep.mubr.msk.f32.mxu0 %vm522_vm2, %v10150_v42  ;;  %8178 = vmatpush3.bf16.xpose.msk.msra.mxu0 %vm9072_vm3, %v8173_v46  ;;  %v6875_v46 = vld [vmem:[%s10589_s5 + $0xa0] sm:$0xff] }
 0xb53   : > { %4781 = vmax.xlane.f32.xlu0 %v4780_v52  ;;  %8181 = vmatprep.subr.msk.bf16.mxu0 %vm9072_vm3, %v8179_v23  ;;  %v5327_v33 = vpop.permute.xlu0 %5326  ;;  %v6876_v52 = vld [vmem:[%s10589_s5 + $0xa8] sm:$0xff] }
 0xb54   : > { %7712 = vmatmul.mubr.msk.f32.vlgmr.msra.gmra.mrb[56].mxu1 %vm282_vm0, %v4440_v9  ;;  %7717 = vmatprep.subr.mxu1 %v10213_v49  ;;  %v6877_v9 = vld [vmem:[%s10589_s5 + $0xb0] sm:$0xff] }
 0xb55   : > { %7714 = vmatprep.mubr.msk.f32.mxu1 %vm282_vm0, %v4441_v16  ;;  %7773 = vmatmul.mubr.msk.f32.gmra.mrb[62].mxu0 %vm522_vm2, %v10130_v1 }
 0xb56   : > { %7797 = vmatprep.mubr.msk.f32.mxu0 %vm522_vm2, %v5323_v20  ;;  %7718 = vmatpush3.msra.mxu1 %v10213_v49 }
 0xb57   : > { %4784 = vmax.xlane.f32.xlu0 %v4783_v61 }
 0xb58   : > { %7715 = vmatmul.mubr.msk.f32.gmra.mrb[58].mxu1 %vm282_vm0, %v4442_v3  ;;  %v6878_v3 = vld [vmem:[%s10589_s5 + $0xb8] sm:$0xff] }
 0xb5a   : > { %8184 = vmatpush3.bf16.xpose.msk.msra.mxu0 %vm9072_vm3, %v8179_v23 }
 0xb61   : > { %7798 = vmatmul.mubr.msk.f32.vlgmr.msra.gmra.mrb[64].mxu0 %vm522_vm2, %v5325_v45 }
 0xb62   : > { %7800 = vmatprep.mubr.msk.f32.mxu0 %vm522_vm2, %v5327_v33 }
 0xb65   : > { %7801 = vmatmul.mubr.msk.f32.gmra.mrb[66].mxu0 %vm522_vm2, %v5329_v37 }
 0xbd9   : > { %v4779_v35 = vpop.xlane.xlu1 %4778 }
 0xbda   : > { %v4787_v7 = vsub.f32 %v10174_v19, %v4779_v35 }
 0xbdb   : > { %v4776_v29 = vpop.xlane.xlu0 %4775 }
 0xbdc   : > { %v4792_v5 = vmul.f32 1.442695, %v4787_v7  ;;  %v4786_v10 = vsub.f32 %v10176_v59, %v4776_v29 }
 0xbde   : > { %8800 = vpow2.f32 %v4792_v5  ;;  %v4790_v32 = vmul.f32 1.442695, %v4786_v10 }
 0xbe0   : > { %8802 = vpow2.f32 %v4790_v32  ;;  %v4782_v18 = vpop.xlane.xlu0 %4781 }
 0xbe1   : > { %v4788_v0 = vsub.f32 %v4766_v4, %v4782_v18 }
 0xbe3   : > { %v4794_v53 = vmul.f32 1.442695, %v4788_v0 }
 0xbe4   : > { %v4785_v41 = vpop.xlane.xlu0 %4784 }
 0xbe5   : > { %8804 = vpow2.f32 %v4794_v53  ;;  %v4789_v34 = vsub.f32 %v4771_v31, %v4785_v41 }
 0xbe7   : > { %v4796_v38 = vmul.f32 1.442695, %v4789_v34 }
 0xbe8   : > { %v10231_v8 = vpop.eup %8800 }
 0xbe9   : > { %8806 = vpow2.f32 %v4796_v38  ;;  %v4801_v27 = vsel %vm282_vm0, %v10231_v8, 0.0 }
 0xbea   : > { %v10235_v44 = vpop.eup %8802  ;;  %4802 = vadd.xlane.f32.xlu0 %v4801_v27 }
 0xbeb   : > { %v4798_v12 = vsel %vm282_vm0, %v10235_v44, 0.0 }
 0xbec   : > { %4799 = vadd.xlane.f32.xlu1 %v4798_v12 }
 0xbef   : > { %v10239_v26 = vpop.eup %8804 }
 0xbf0   : > { %v4804_v39 = vsel %vm282_vm0, %v10239_v26, 0.0 }
 0xbf1   : > { %4805 = vadd.xlane.f32.xlu1 %v4804_v39 }
 0xbf3   : > { %v10243_v19 = vpop.eup %8806 }
 0xbf4   : > { %v4807_v57 = vsel %vm282_vm0, %v10243_v19, 0.0 }
 0xbf5   : > { %4808 = vadd.xlane.f32.xlu0 %v4807_v57 }
 0xc02   : > { %8555 = vrot.lane.b32.xlu1 %v9149_v48, %s8912_s24 }
 0xc06   : > { %8565 = vrot.lane.b32.xlu1 %v9153_v55, %s8905_s17 }
 0xc0a   : > { %8570 = vrot.lane.b32.xlu1 %v9155_v58, %s8905_s17 }
 0xc0b   : > { %8560 = vrot.lane.b32.xlu0 %v9151_v51, %s8912_s24 }
 0xc0e   : > { %5792 = vrot.lane.b32.xlu1 %v10125_v24, %s8906_s18 }
 0xc0f   : > { %5790 = vrot.lane.b32.xlu0 %v10095_v2, %s8906_s18 }
 0xc12   : > { %5796 = vrot.lane.b32.xlu1 %v10130_v1, %s8906_s18 }
 0xc13   : > { %5794 = vrot.lane.b32.xlu0 %v10150_v42, %s8906_s18 }
 0xc24   : > { %v7771_v48 = vpop.f32.mrb[60].mxu0 }
 0xc25   : > { %v5146_v30 = vpop.f32.mrb[61].mxu0  ;;  %v10278_v63 = vadd.f32 %v7771_v48, %v6860_v60 }
 0xc26   : > { %v10268_v6 = vadd.f32 %v6859_v21, %v5146_v30 }
 0xc27   : > { %v7713_v11 = vpop.f32.mrb[56].mxu1  ;;  %v5168_v25 = vsel %vm282_vm0, %v10278_v63, -inf }
 0xc28   : > { %v4533_v59 = vpop.f32.mrb[57].mxu1  ;;  %v7774_v15 = vpop.f32.mrb[62].mxu0  ;;  %v5165_v43 = vsel %vm282_vm0, %v10268_v6, -inf }
 0xc29   : > { %7719 = vmatprep.mubr.msk.f32.mxu1 %vm522_vm2, %v4533_v59  ;;  %v5156_v51 = vpop.f32.mrb[63].mxu0  ;;  %v10290_v50 = vadd.f32 %v7774_v15, %v6862_v40 }
 0xc2a   : > { %7720 = vmatmul.mubr.msk.f32.vlgmr.msra.gmra.mrb[52].mxu1 %vm522_vm2, %v7713_v11  ;;  %v10280_v36 = vadd.f32 %v6861_v28, %v5156_v51 }
 0xc2b   : > { %v7716_v13 = vpop.f32.mrb[58].mxu1  ;;  %v5174_v61 = vsel %vm282_vm0, %v10290_v50, -inf }
 0xc2c   : > { %v4543_v17 = vpop.f32.mrb[59].mxu1  ;;  %v5171_v22 = vsel %vm282_vm0, %v10280_v36, -inf }
 0xc2d   : > { %7722 = vmatprep.mubr.msk.f32.mxu1 %vm522_vm2, %v4543_v17 }
 0xc2e   : > { %7723 = vmatmul.mubr.msk.f32.gmra.mrb[54].mxu1 %vm522_vm2, %v7716_v13 }
 0xc32   : > { %5166 = vmax.xlane.f32.xlu0 %v5165_v43  ;;  %v10336_v43 = vld [vmem:[%s10587_s3 + $0x18] sm:$0xff] }
 0xc34   : > { %v7799_v4 = vpop.f32.mrb[64].mxu0 }
 0xc35   : > { %v5420_v56 = vpop.f32.mrb[65].mxu0  ;;  %v10306_v16 = vadd.f32 %v7799_v4, %v6876_v52 }
 0xc36   : > { %v10299_v23 = vadd.f32 %v6875_v46, %v5420_v56  ;;  %5169 = vmax.xlane.f32.xlu1 %v5168_v25  ;;  %5172 = vmax.xlane.f32.xlu0 %v5171_v22 }
 0xc37   : > { %v5442_v35 = vsel %vm282_vm0, %v10306_v16, -inf }
 0xc38   : > { %v7802_v31 = vpop.f32.mrb[66].mxu0  ;;  %v5439_v47 = vsel %vm282_vm0, %v10299_v23, -inf }
 0xc39   : > { %v5430_v20 = vpop.f32.mrb[67].mxu0  ;;  %v10317_v37 = vadd.f32 %v7802_v31, %v6878_v3 }
 0xc3a   : > { %v10313_v45 = vadd.f32 %v6877_v9, %v5430_v20  ;;  %5440 = vmax.xlane.f32.xlu1 %v5439_v47  ;;  %5175 = vmax.xlane.f32.xlu0 %v5174_v61 }
 0xc3b   : > { %v5448_v7 = vsel %vm282_vm0, %v10317_v37, -inf }
 0xc3c   : > { %v5445_v33 = vsel %vm282_vm0, %v10313_v45, -inf }
 0xc3e   : > { %5446 = vmax.xlane.f32.xlu1 %v5445_v33  ;;  %5443 = vmax.xlane.f32.xlu0 %v5442_v35 }
 0xc42   : > { %5449 = vmax.xlane.f32.xlu0 %v5448_v7 }
 0xc4f   : > { %8575 = vrot.lane.b32.xlu1 %v9153_v55, %s8907_s19 }
 0xc77   : > { %v4803_v5 = vpop.xlane.xlu0 %4802 }
 0xc79   : > { %v4800_v29 = vpop.xlane.xlu1 %4799 }
 0xc7a   : > { %8808 = vrcp.f32 %v4800_v29 }
 0xc7b   : > { %8810 = vrcp.f32 %v4803_v5 }
 0xc7e   : > { %v4806_v10 = vpop.xlane.xlu1 %4805 }
 0xc7f   : > { %8812 = vrcp.f32 %v4806_v10 }
 0xc82   : > { %v8556_v32 = vpop.permute.xlu1 %8555  ;;  %v4809_v18 = vpop.xlane.xlu0 %4808 }
 0xc83   : > { %v8558_v0 = vunpack.i.h.bf16 %v8556_v32  ;;  %v8557_v53 = vunpack.i.l.bf16 %v8556_v32  ;;  %8814 = vrcp.f32 %v4809_v18 }
 0xc84   : > { %v8809_v41 = vpop.eup %8808 }
 0xc85   : > { %v8145_v34 = vpack.c.bf16 %v8558_v0, %v8557_v53  ;;  %v4814_v38 = vmul.f32 %v8809_v41, %v10235_v44  ;;  %v8811_v15 = vpop.eup %8810 }
 0xc86   : > { %v8566_v27 = vpop.permute.xlu1 %8565  ;;  %v8561_v12 = vpop.permute.xlu0 %8560  ;;  %v4815_v44 = vmul.f32 %v8811_v15, %v10231_v8 }
 0xc87   : > { %v8568_v39 = vunpack.i.h.bf16 %v8566_v27  ;;  %v8567_v57 = vunpack.i.l.bf16 %v8566_v27  ;;  %v8563_v48 = vunpack.i.h.bf16 %v8561_v12  ;;  %v8562_v30 = vunpack.i.l.bf16 %v8561_v12  ;;  %8146 = vmatprep.subr.bf16.mxu1 %v8145_v34  ;;  %7747 = vmatprep.mubr.msk.f32.mxu1 %vm282_vm0, %v4814_v38 }
 0xc88   : > { %8148 = vmatpush3.bf16.msra.mxu1 %v8145_v34 }
 0xc89   : > { %v8193_v11 = vpack.c.bf16 %v8568_v39, %v8567_v57  ;;  %v8149_v59 = vpack.c.bf16 %v8563_v48, %v8562_v30  ;;  %v8813_v13 = vpop.eup %8812 }
 0xc8a   : > { %v8571_v51 = vpop.permute.xlu1 %8570  ;;  %v5791_v21 = vpop.permute.xlu0 %5790  ;;  %v4816_v46 = vmul.f32 %v8813_v13, %v10239_v26 }
 0xc8b   : > { %v8573_v17 = vunpack.i.h.bf16 %v8571_v51  ;;  %v8572_v60 = vunpack.i.l.bf16 %v8571_v51  ;;  %8150 = vmatprep.subr.bf16.mxu1 %v8149_v59  ;;  %8195 = vmatprep.subr.msk.bf16.mxu0 %vm9072_vm3, %v8193_v11 }
 0xc8c   : > { %7841 = vmatprep.mubr.msk.f32.mxu0 %vm522_vm2, %v5791_v21  ;;  %8152 = vmatpush3.bf16.msra.mxu1 %v8149_v59 }
 0xc8d   : > { %v8199_v28 = vpack.c.bf16 %v8573_v17, %v8572_v60  ;;  %8198 = vmatpush3.bf16.xpose.msk.msra.mxu0 %vm9072_vm3, %v8193_v11  ;;  %7753 = vmatprep.subr.mxu1 %v10336_v43  ;;  %v8815_v40 = vpop.eup %8814 }
 0xc8e   : > { %v4817_v8 = vmul.f32 %v8815_v40, %v10243_v19  ;;  %v5793_v4 = vpop.permute.xlu1 %5792  ;;  %v5795_v56 = vpop.permute.xlu0 %5794 }
 0xc8f   : > { %7748 = vmatmul.mubr.msk.f32.vlgmr.msra.gmra.mrb[60].mxu1 %vm282_vm0, %v4815_v44  ;;  %8201 = vmatprep.subr.msk.bf16.mxu0 %vm9072_vm3, %v8199_v28 }
 0xc90   : > { %7750 = vmatprep.mubr.msk.f32.mxu1 %vm282_vm0, %v4816_v46  ;;  %7754 = vmatpush3.msra.mxu1 %v10336_v43 }
 0xc92   : > { %v5797_v26 = vpop.permute.xlu1 %5796 }
 0xc93   : > { %7751 = vmatmul.mubr.msk.f32.gmra.mrb[62].mxu1 %vm282_vm0, %v4817_v8 }
 0xc95   : > { %8204 = vmatpush3.bf16.xpose.msk.msra.mxu0 %vm9072_vm3, %v8199_v28 }
 0xc9c   : > { %7842 = vmatmul.mubr.msk.f32.vlgmr.msra.gmra.mrb[68].mxu0 %vm522_vm2, %v5793_v4 }
 0xc9d   : > { %7844 = vmatprep.mubr.msk.f32.mxu0 %vm522_vm2, %v5795_v56 }
 0xca0   : > { %7845 = vmatmul.mubr.msk.f32.gmra.mrb[70].mxu0 %vm522_vm2, %v5797_v26  ;;  %v6900_v26 = vld [vmem:[%s10589_s5 + $0xc8] sm:$0xff] }
 0xcbf   : > { %v5167_v25 = vpop.xlane.xlu0 %5166 }
 0xcc0   : > { %v5177_v22 = vsub.f32 %v10268_v6, %v5167_v25 }
 0xcc2   : > { %v5181_v52 = vmul.f32 1.442695, %v5177_v22  ;;  %v6899_v22 = vld [vmem:[%s10589_s5 + $0xc0] sm:$0xff] }
 0xcc3   : > { %v5170_v9 = vpop.xlane.xlu1 %5169  ;;  %v5173_v19 = vpop.xlane.xlu0 %5172 }
 0xcc4   : > { %8816 = vpow2.f32 %v5181_v52  ;;  %v5178_v31 = vsub.f32 %v10278_v63, %v5170_v9  ;;  %v5179_v47 = vsub.f32 %v10280_v36, %v5173_v19 }
 0xcc6   : > { %v5183_v20 = vmul.f32 1.442695, %v5178_v31  ;;  %v5185_v61 = vmul.f32 1.442695, %v5179_v47 }
 0xcc7   : > { %v5441_v3 = vpop.xlane.xlu1 %5440  ;;  %v5176_v33 = vpop.xlane.xlu0 %5175 }
 0xcc8   : > { %8818 = vpow2.f32 %v5183_v20  ;;  %v5451_v35 = vsub.f32 %v10299_v23, %v5441_v3  ;;  %v5180_v7 = vsub.f32 %v10290_v50, %v5176_v33 }
 0xcc9   : > { %8820 = vpow2.f32 %v5185_v61 }
 0xcca   : > { %v5455_v29 = vmul.f32 1.442695, %v5451_v35  ;;  %v5187_v6 = vmul.f32 1.442695, %v5180_v7  ;;  %v6901_v35 = vld [vmem:[%s10589_s5 + $0xd0] sm:$0xff] }
 0xccb   : > { %v5447_v5 = vpop.xlane.xlu1 %5446  ;;  %v5444_v10 = vpop.xlane.xlu0 %5443 }
 0xccc   : > { %8822 = vpow2.f32 %v5455_v29  ;;  %v5452_v32 = vsub.f32 %v10306_v16, %v5444_v10  ;;  %v5453_v21 = vsub.f32 %v10313_v45, %v5447_v5  ;;  %v6902_v10 = vld [vmem:[%s10589_s5 + $0xd8] sm:$0xff] }
 0xccd   : > { %8824 = vpow2.f32 %v5187_v6 }
 0xcce   : > { %v8817_v63 = vpop.eup %8816  ;;  %v5457_v36 = vmul.f32 1.442695, %v5452_v32  ;;  %v5459_v13 = vmul.f32 1.442695, %v5453_v21 }
 0xccf   : > { %v8576_v18 = vpop.permute.xlu1 %8575  ;;  %v5450_v0 = vpop.xlane.xlu0 %5449  ;;  %v5189_v53 = vsel %vm282_vm0, %v8817_v63, 0.0 }
 0xcd0   : > { %v8578_v41 = vunpack.i.h.bf16 %v8576_v18  ;;  %v8577_v34 = vunpack.i.l.bf16 %v8576_v18  ;;  %v5454_v23 = vsub.f32 %v10317_v37, %v5450_v0  ;;  %5190 = vadd.xlane.f32.xlu1 %v5189_v53  ;;  %8826 = vpow2.f32 %v5457_v36 }
 0xcd2   : > { %v10360_v50 = vpop.eup %8818  ;;  %v8165_v38 = vpack.c.bf16 %v8578_v41, %v8577_v34  ;;  %v5461_v27 = vmul.f32 1.442695, %v5454_v23 }
 0xcd3   : > { %v10362_v12 = vpop.eup %8820  ;;  %v5192_v16 = vsel %vm282_vm0, %v10360_v50, 0.0 }
 0xcd4   : > { %8828 = vpow2.f32 %v5461_v27  ;;  %5193 = vadd.xlane.f32.xlu0 %v5192_v16  ;;  %v5195_v39 = vsel %vm282_vm0, %v10362_v12, 0.0  ;;  %8166 = vmatprep.subr.bf16.mxu1 %v8165_v38 }
 0xcd5   : > { %5196 = vadd.xlane.f32.xlu1 %v5195_v39  ;;  %8830 = vpow2.f32 %v5459_v13 }
 0xcd6   : > { %v10368_v57 = vpop.eup %8822 }
 0xcd7   : > { %v10370_v37 = vpop.eup %8824  ;;  %v5463_v48 = vsel %vm282_vm0, %v10368_v57, 0.0 }
 0xcd8   : > { %v5198_v30 = vsel %vm282_vm0, %v10370_v37, 0.0 }
 0xcd9   : > { %5464 = vadd.xlane.f32.xlu1 %v5463_v48  ;;  %5199 = vadd.xlane.f32.xlu0 %v5198_v30 }
 0xcda   : > { %v10376_v11 = vpop.eup %8826 }
 0xcdb   : > { %v5466_v59 = vsel %vm282_vm0, %v10376_v11, 0.0 }
 0xcdd   : > { %5467 = vadd.xlane.f32.xlu0 %v5466_v59 }
 0xcde   : > { %v10380_v15 = vpop.eup %8828 }
 0xcdf   : > { %v5472_v51 = vsel %vm282_vm0, %v10380_v15, 0.0  ;;  %v10395_v17 = vpop.eup %8830 }
 0xce0   : > { %v5469_v60 = vsel %vm282_vm0, %v10395_v17, 0.0 }
 0xce1   : > { %5473 = vadd.xlane.f32.xlu0 %v5472_v51 }
 0xcea   : > { %8585 = vrot.lane.b32.xlu1 %v9153_v55, %s8908_s20 }
 0xcf7   : > { %8580 = vrot.lane.b32.xlu0 %v9155_v58, %s8907_s19 }
 0xcfb   : > { %8595 = vrot.lane.b32.xlu0 %v9153_v55, %s8909_s22 }
 0xcff   : > { %6165 = vrot.lane.b32.xlu0 %v10095_v2, %s8910_s23 }
 0xd03   : > { %6169 = vrot.lane.b32.xlu0 %v10150_v42, %s8910_s23 }
 0xd0e   : > { %5470 = vadd.xlane.f32.xlu1 %v5469_v60 }
 0xd1f   : > { %8590 = vrot.lane.b32.xlu1 %v9155_v58, %s8908_s20 }
 0xd23   : > { %8600 = vrot.lane.b32.xlu1 %v9155_v58, %s8909_s22 }
 0xd27   : > { %6167 = vrot.lane.b32.xlu1 %v10125_v24, %s8910_s23 }
 0xd2b   : > { %6171 = vrot.lane.b32.xlu1 %v10130_v1, %s8910_s23 }
 0xd5d   : > { %v5191_v2 = vpop.xlane.xlu1 %5190 }
 0xd5e   : > { %8832 = vrcp.f32 %v5191_v2 }
 0xd61   : > { %v5194_v42 = vpop.xlane.xlu0 %5193 }
 0xd62   : > { %v7749_v45 = vpop.f32.mrb[60].mxu1  ;;  %v5197_v44 = vpop.xlane.xlu1 %5196  ;;  %8834 = vrcp.f32 %v5194_v42 }
 0xd63   : > { %v4908_v28 = vpop.f32.mrb[61].mxu1  ;;  %8836 = vrcp.f32 %v5197_v44 }
 0xd64   : > { %7755 = vmatprep.mubr.msk.f32.mxu1 %vm522_vm2, %v4908_v28 }
 0xd65   : > { %7756 = vmatmul.mubr.msk.f32.vlgmr.msra.gmra.mrb[52].mxu1 %vm522_vm2, %v7749_v45 }
 0xd66   : > { %v5200_v40 = vpop.xlane.xlu0 %5199  ;;  %8168 = vmatpush3.bf16.msra.mxu1 %v8165_v38  ;;  %v7752_v46 = vpop.f32.mrb[62].mxu1 }
 0xd67   : > { %v4918_v4 = vpop.f32.mrb[63].mxu1  ;;  %v5465_v56 = vpop.xlane.xlu1 %5464  ;;  %8838 = vrcp.f32 %v5200_v40 }
 0xd68   : > { %v8833_v8 = vpop.eup %8832  ;;  %7758 = vmatprep.mubr.msk.f32.mxu1 %vm522_vm2, %v4918_v4  ;;  %8840 = vrcp.f32 %v5465_v56 }
 0xd69   : > { %v5205_v24 = vmul.f32 %v8833_v8, %v8817_v63  ;;  %7759 = vmatmul.mubr.msk.f32.gmra.mrb[54].mxu1 %vm522_vm2, %v7752_v46 }
 0xd6a   : > { %v5468_v1 = vpop.xlane.xlu0 %5467 }
 0xd6b   : > { %7783 = vmatprep.mubr.msk.f32.mxu1 %vm282_vm0, %v5205_v24  ;;  %v8586_v52 = vpop.permute.xlu1 %8585  ;;  %8842 = vrcp.f32 %v5468_v1 }
 0xd6c   : > { %v8588_v20 = vunpack.i.h.bf16 %v8586_v52  ;;  %v8587_v61 = vunpack.i.l.bf16 %v8586_v52  ;;  %v8835_v18 = vpop.eup %8834 }
 0xd6d   : > { %v8837_v27 = vpop.eup %8836  ;;  %v5206_v16 = vmul.f32 %v8835_v18, %v10360_v50 }
 0xd6e   : > { %v5474_v25 = vpop.xlane.xlu0 %5473  ;;  %v8185_v0 = vpack.c.bf16 %v8588_v20, %v8587_v61  ;;  %v5207_v21 = vmul.f32 %v8837_v27, %v10362_v12 }
 0xd6f   : > { %v7843_v9 = vpop.f32.mrb[68].mxu0 }
 0xd70   : > { %v10418_v19 = vadd.f32 %v7843_v9, %v6900_v26  ;;  %v5888_v31 = vpop.f32.mrb[69].mxu0 }
 0xd71   : > { %v10420_v47 = vadd.f32 %v6899_v22, %v5888_v31  ;;  %v8839_v48 = vpop.eup %8838 }
 0xd72   : > { %v8581_v3 = vpop.permute.xlu0 %8580  ;;  %v5910_v33 = vsel %vm282_vm0, %v10418_v19, -inf  ;;  %v8841_v59 = vpop.eup %8840  ;;  %v5208_v50 = vmul.f32 %v8839_v48, %v10370_v37 }
 0xd73   : > { %v8583_v7 = vunpack.i.h.bf16 %v8581_v3  ;;  %v8582_v29 = vunpack.i.l.bf16 %v8581_v3  ;;  %v7846_v6 = vpop.f32.mrb[70].mxu0  ;;  %5911 = vmax.xlane.f32.xlu1 %v5910_v33  ;;  %v5907_v5 = vsel %vm282_vm0, %v10420_v47, -inf  ;;  %v5479_v13 = vmul.f32 %v8841_v59, %v10368_v57 }
 0xd74   : > { %v5898_v32 = vpop.f32.mrb[71].mxu0  ;;  %5908 = vmax.xlane.f32.xlu0 %v5907_v5  ;;  %v10434_v41 = vadd.f32 %v7846_v6, %v6902_v10  ;;  %v10496_v10 = vld [vmem:[%s10588_s4] ss:$0 sm:$0xff] }
 0xd75   : > { %v8169_v63 = vpack.c.bf16 %v8583_v7, %v8582_v29  ;;  %v10432_v36 = vadd.f32 %v6901_v35, %v5898_v32  ;;  %v8843_v44 = vpop.eup %8842 }
 0xd76   : > { %v8596_v53 = vpop.permute.xlu0 %8595  ;;  %v5916_v51 = vsel %vm282_vm0, %v10434_v41, -inf  ;;  %v5480_v57 = vmul.f32 %v8843_v44, %v10376_v11 }
 0xd77   : > { %v8598_v34 = vunpack.i.h.bf16 %v8596_v53  ;;  %v8597_v23 = vunpack.i.l.bf16 %v8596_v53  ;;  %8170 = vmatprep.subr.bf16.mxu1 %v8169_v63  ;;  %v5913_v38 = vsel %vm282_vm0, %v10432_v36, -inf }
 0xd78   : > { %5914 = vmax.xlane.f32.xlu0 %v5913_v38  ;;  %8172 = vmatpush3.bf16.msra.mxu1 %v8169_v63 }
 0xd79   : > { %v8213_v39 = vpack.c.bf16 %v8598_v34, %v8597_v23  ;;  %8186 = vmatprep.subr.bf16.mxu1 %v8185_v0 }
 0xd7a   : > { %v6166_v30 = vpop.permute.xlu0 %6165 }
 0xd7b   : > { %7784 = vmatmul.mubr.msk.f32.vlgmr.msra.gmra.mrb[64].mxu1 %vm282_vm0, %v5206_v16  ;;  %8215 = vmatprep.subr.msk.bf16.mxu0 %vm9072_vm3, %v8213_v39 }
 0xd7c   : > { %7877 = vmatprep.mubr.msk.f32.mxu0 %vm522_vm2, %v6166_v30  ;;  %5917 = vmax.xlane.f32.xlu0 %v5916_v51  ;;  %v8893_v30 = vld [vmem:[%s10587_s3] sm:$0xff]  ;;  %v6920_v51 = vld [vmem:[%s10589_s5 + $0xe8] sm:$0xff] }
 0xd7d   : > { %7786 = vmatprep.mubr.msk.f32.mxu1 %vm282_vm0, %v5207_v21  ;;  %8188 = vmatpush3.bf16.msra.mxu1 %v8185_v0  ;;  %v6919_v21 = vld [vmem:[%s10589_s5 + $0xe0] sm:$0xff] }
 0xd7e   : > { %8218 = vmatpush3.bf16.xpose.msk.msra.mxu0 %vm9072_vm3, %v8213_v39 }
 0xd7f   : > { %7787 = vmatmul.mubr.msk.f32.gmra.mrb[66].mxu1 %vm282_vm0, %v5208_v50 }
 0xd80   : > { %7811 = vmatprep.mubr.msk.f32.mxu1 %vm282_vm0, %v5479_v13 }
 0xd9b   : > { %v5471_v60 = vpop.xlane.xlu1 %5470 }
 0xd9c   : > { %8844 = vrcp.f32 %v5471_v60 }
 0xd9d   : > { %8846 = vrcp.f32 %v5474_v25 }
 0xd9f   : > { %v8591_v12 = vpop.permute.xlu1 %8590 }
 0xda0   : > { %v8593_v2 = vunpack.i.h.bf16 %v8591_v12  ;;  %v8592_v42 = vunpack.i.l.bf16 %v8591_v12 }
 0xda2   : > { %v8189_v45 = vpack.c.bf16 %v8593_v2, %v8592_v42  ;;  %v6922_v2 = vld [vmem:[%s10589_s5 + $0xf8] sm:$0xff] }
 0xda3   : > { %v8601_v28 = vpop.permute.xlu1 %8600 }
 0xda4   : > { %v8603_v37 = vunpack.i.h.bf16 %v8601_v28  ;;  %v8602_v40 = vunpack.i.l.bf16 %v8601_v28  ;;  %8190 = vmatprep.subr.bf16.mxu1 %v8189_v45 }
 0xda5   : > { %8192 = vmatpush3.bf16.msra.mxu1 %v8189_v45  ;;  %v6921_v45 = vld [vmem:[%s10589_s5 + $0xf0] sm:$0xff] }
 0xda6   : > { %v8845_v46 = vpop.eup %8844  ;;  %v8219_v8 = vpack.c.bf16 %v8603_v37, %v8602_v40  ;;  %7817 = vmatprep.subr.mxu1 %v10074_v14 }
 0xda7   : > { %v8847_v4 = vpop.eup %8846  ;;  %v5481_v56 = vmul.f32 %v8845_v46, %v10395_v17  ;;  %v6168_v11 = vpop.permute.xlu1 %6167 }
 0xda8   : > { %7812 = vmatmul.mubr.msk.f32.vlgmr.msra.gmra.mrb[68].mxu1 %vm282_vm0, %v5480_v57  ;;  %8221 = vmatprep.subr.msk.bf16.mxu0 %vm9072_vm3, %v8219_v8  ;;  %v5482_v24 = vmul.f32 %v8847_v4, %v10380_v15  ;;  %v6170_v17 = vpop.permute.xlu0 %6169 }
 0xda9   : > { %7814 = vmatprep.mubr.msk.f32.mxu1 %vm282_vm0, %v5481_v56  ;;  %8224 = vmatpush3.bf16.xpose.msk.msra.mxu0 %vm9072_vm3, %v8219_v8 }
 0xdaa   : > { %7818 = vmatpush3.msra.mxu1 %v10074_v14 }
 0xdab   : > { %7825 = vmatprep.subr.mxu1 %v10089_v62  ;;  %v6172_v1 = vpop.permute.xlu1 %6171 }
 0xdac   : > { %7815 = vmatmul.mubr.msk.f32.gmra.mrb[70].mxu1 %vm282_vm0, %v5482_v24 }
 0xdb0   : > { %7878 = vmatmul.mubr.msk.f32.vlgmr.msra.gmra.mrb[72].mxu0 %vm522_vm2, %v6168_v11 }
 0xdb1   : > { %7880 = vmatprep.mubr.msk.f32.mxu0 %vm522_vm2, %v6170_v17 }
 0xdb4   : > { %7881 = vmatmul.mubr.msk.f32.gmra.mrb[74].mxu0 %vm522_vm2, %v6172_v1 }
 0xe00   : > { %v5912_v26 = vpop.xlane.xlu1 %5911 }
 0xe01   : > { %v5920_v54 = vsub.f32 %v10418_v19, %v5912_v26  ;;  %v5909_v25 = vpop.xlane.xlu0 %5908 }
 0xe02   : > { %v5919_v15 = vsub.f32 %v10420_v47, %v5909_v25 }
 0xe03   : > { %v5925_v14 = vmul.f32 1.442695, %v5920_v54 }
 0xe04   : > { %v5923_v22 = vmul.f32 1.442695, %v5919_v15 }
 0xe05   : > { %8848 = vpow2.f32 %v5925_v14  ;;  %v5915_v62 = vpop.xlane.xlu0 %5914 }
 0xe06   : > { %8850 = vpow2.f32 %v5923_v22  ;;  %v5921_v52 = vsub.f32 %v10432_v36, %v5915_v62 }
 0xe08   : > { %v5927_v9 = vmul.f32 1.442695, %v5921_v52 }
 0xe09   : > { %v5918_v31 = vpop.xlane.xlu0 %5917 }
 0xe0a   : > { %8852 = vpow2.f32 %v5927_v9  ;;  %v5922_v20 = vsub.f32 %v10434_v41, %v5918_v31 }
 0xe0c   : > { %v5929_v61 = vmul.f32 1.442695, %v5922_v20 }
 0xe0e   : > { %8854 = vpow2.f32 %v5929_v61 }
 0xe0f   : > { %v10473_v3 = vpop.eup %8848 }
 0xe10   : > { %v10475_v19 = vpop.eup %8850  ;;  %v5934_v47 = vsel %vm282_vm0, %v10473_v3, 0.0 }
 0xe11   : > { %5935 = vadd.xlane.f32.xlu0 %v5934_v47  ;;  %v5931_v33 = vsel %vm282_vm0, %v10475_v19, 0.0 }
 0xe12   : > { %5932 = vadd.xlane.f32.xlu1 %v5931_v33 }
 0xe14   : > { %v10481_v35 = vpop.eup %8852 }
 0xe15   : > { %v5937_v7 = vsel %vm282_vm0, %v10481_v35, 0.0 }
 0xe16   : > { %5938 = vadd.xlane.f32.xlu1 %v5937_v7 }
 0xe18   : > { %v10485_v29 = vpop.eup %8854 }
 0xe19   : > { %v5940_v6 = vsel %vm282_vm0, %v10485_v29, 0.0 }
 0xe1a   : > { %5941 = vadd.xlane.f32.xlu0 %v5940_v6 }
 0xe27   : > { %8605 = vrot.lane.b32.xlu1 %v9153_v55, %s8911_s10 }
 0xe30   : > { %8610 = vrot.lane.b32.xlu0 %v9155_v58, %s8911_s10 }
 0xe38   : > { %v7757_v5 = vpop.f32.mrb[52].mxu1 }
 0xe39   : > { %v5029_v32 = vadd.f32 %v10496_v10, %v7757_v5  ;;  %v5005_v63 = vpop.f32.mrb[53].mxu1 }
 0xe3a   : > { %v5028_v36 = vadd.f32 %v10496_v10, %v5005_v63 }
 0xe3b   : > { %5033 = vst.msk [vmem:[%s9748_s25 + $0x48] sm:$0xff] %vm282_vm0, %v5029_v32 }
 0xe3c   : > { %5032 = vst.msk [vmem:[%s9748_s25 + $0x40] sm:$0xff] %vm282_vm0, %v5028_v36  ;;  %v7760_v18 = vpop.f32.mrb[54].mxu1 }
 0xe3d   : > { %v5031_v0 = vadd.f32 %v10496_v10, %v7760_v18  ;;  %v5015_v53 = vpop.f32.mrb[55].mxu1 }
 0xe3e   : > { %v5030_v41 = vadd.f32 %v10496_v10, %v5015_v53 }
 0xe3f   : > { %5035 = vst.msk [vmem:[%s9748_s25 + $0x58] sm:$0xff] %vm282_vm0, %v5031_v0 }
 0xe40   : > { %5034 = vst.msk [vmem:[%s9748_s25 + $0x50] sm:$0xff] %vm282_vm0, %v5030_v41 }
 0xe4e   : > { %v7785_v34 = vpop.f32.mrb[64].mxu1 }
 0xe4f   : > { %v5299_v23 = vpop.f32.mrb[65].mxu1 }
 0xe52   : > { %v7788_v38 = vpop.f32.mrb[66].mxu1 }
 0xe53   : > { %v5309_v27 = vpop.f32.mrb[67].mxu1 }
 0xe7b   : > { %v7813_v16 = vpop.f32.mrb[68].mxu1 }
 0xe7c   : > { %v5573_v39 = vpop.f32.mrb[69].mxu1 }
 0xe7d   : > { %7819 = vmatprep.mubr.msk.f32.mxu1 %vm522_vm2, %v5573_v39 }
 0xe7e   : > { %7820 = vmatmul.mubr.msk.f32.vlgmr.msra.gmra.mrb[72].mxu1 %vm522_vm2, %v7813_v16 }
 0xe7f   : > { %v7816_v48 = vpop.f32.mrb[70].mxu1  ;;  %7826 = vmatpush3.msra.mxu1 %v8893_v30 }
 0xe80   : > { %v5583_v59 = vpop.f32.mrb[71].mxu1 }
 0xe81   : > { %7822 = vmatprep.mubr.msk.f32.mxu1 %vm522_vm2, %v5583_v59 }
 0xe82   : > { %7823 = vmatmul.mubr.msk.f32.gmra.mrb[74].mxu1 %vm522_vm2, %v7816_v48 }
 0xe83   : > { %7827 = vmatprep.mubr.msk.f32.mxu1 %vm522_vm2, %v5299_v23  ;;  %v7879_v50 = vpop.f32.mrb[72].mxu0 }
 0xe84   : > { %v6269_v13 = vadd.f32 %v7879_v50, %v6920_v51  ;;  %v6263_v60 = vpop.f32.mrb[73].mxu0 }
 0xe85   : > { %v6264_v12 = vadd.f32 %v6919_v21, %v6263_v60 }
 0xe86   : > { %7828 = vmatmul.mubr.msk.f32.vlgmr.msra.gmra.mrb[72].mxu1 %vm522_vm2, %v7785_v34  ;;  %v6285_v42 = vsel %vm282_vm0, %v6269_v13, -inf }
 0xe87   : > { %6286 = vmax.xlane.f32.xlu0 %v6285_v42  ;;  %7830 = vmatprep.mubr.msk.f32.mxu1 %vm522_vm2, %v5309_v27  ;;  %v7882_v44 = vpop.f32.mrb[74].mxu0  ;;  %v6282_v28 = vsel %vm282_vm0, %v6264_v12, -inf }
 0xe88   : > { %v6279_v37 = vadd.f32 %v7882_v44, %v6922_v2  ;;  %v6273_v40 = vpop.f32.mrb[75].mxu0  ;;  %6283 = vmax.xlane.f32.xlu1 %v6282_v28 }
 0xe89   : > { %v6274_v46 = vadd.f32 %v6921_v45, %v6273_v40 }
 0xe8a   : > { %7831 = vmatmul.mubr.msk.f32.gmra.mrb[74].mxu1 %vm522_vm2, %v7788_v38  ;;  %v6291_v57 = vsel %vm282_vm0, %v6279_v37, -inf }
 0xe8b   : > { %6292 = vmax.xlane.f32.xlu0 %v6291_v57  ;;  %v6288_v8 = vsel %vm282_vm0, %v6274_v46, -inf }
 0xe8c   : > { %6289 = vmax.xlane.f32.xlu1 %v6288_v8 }
 0xe9e   : > { %v5936_v56 = vpop.xlane.xlu0 %5935 }
 0xe9f   : > { %v5933_v4 = vpop.xlane.xlu1 %5932 }
 0xea0   : > { %8856 = vrcp.f32 %v5933_v4 }
 0xea1   : > { %8858 = vrcp.f32 %v5936_v56 }
 0xea3   : > { %v5939_v24 = vpop.xlane.xlu1 %5938 }
 0xea4   : > { %8860 = vrcp.f32 %v5939_v24 }
 0xea7   : > { %v8606_v11 = vpop.permute.xlu1 %8605  ;;  %v5942_v17 = vpop.xlane.xlu0 %5941 }
 0xea8   : > { %v8608_v1 = vunpack.i.h.bf16 %v8606_v11  ;;  %v8607_v26 = vunpack.i.l.bf16 %v8606_v11  ;;  %8862 = vrcp.f32 %v5942_v17 }
 0xeaa   : > { %v8857_v54 = vpop.eup %8856  ;;  %v8205_v25 = vpack.c.bf16 %v8608_v1, %v8607_v26 }
 0xeab   : > { %v8611_v15 = vpop.permute.xlu0 %8610  ;;  %v5947_v14 = vmul.f32 %v8857_v54, %v10475_v19  ;;  %v8859_v9 = vpop.eup %8858 }
 0xeac   : > { %v8613_v22 = vunpack.i.h.bf16 %v8611_v15  ;;  %v8612_v62 = vunpack.i.l.bf16 %v8611_v15  ;;  %8206 = vmatprep.subr.bf16.mxu1 %v8205_v25  ;;  %v5948_v20 = vmul.f32 %v8859_v9, %v10473_v3 }
 0xead   : > { %8208 = vmatpush3.bf16.msra.mxu1 %v8205_v25  ;;  %7855 = vmatprep.mubr.msk.f32.mxu1 %vm282_vm0, %v5947_v14 }
 0xeae   : > { %v8209_v52 = vpack.c.bf16 %v8613_v22, %v8612_v62  ;;  %v8861_v31 = vpop.eup %8860 }
 0xeaf   : > { %v5949_v47 = vmul.f32 %v8861_v31, %v10481_v35 }
 0xeb0   : > { %8210 = vmatprep.subr.bf16.mxu1 %v8209_v52 }
 0xeb1   : > { %8212 = vmatpush3.bf16.msra.mxu1 %v8209_v52 }
 0xeb2   : > { %7861 = vmatprep.subr.mxu1 %v10213_v49  ;;  %v8863_v61 = vpop.eup %8862 }
 0xeb3   : > { %v5950_v19 = vmul.f32 %v8863_v61, %v10485_v29 }
 0xeb4   : > { %7856 = vmatmul.mubr.msk.f32.vlgmr.msra.gmra.mrb[76].mxu1 %vm282_vm0, %v5948_v20 }
 0xeb5   : > { %7858 = vmatprep.mubr.msk.f32.mxu1 %vm282_vm0, %v5949_v47  ;;  %7862 = vmatpush3.msra.mxu1 %v10213_v49 }
 0xeb8   : > { %7859 = vmatmul.mubr.msk.f32.gmra.mrb[78].mxu1 %vm282_vm0, %v5950_v19 }
 0xf14   : > { %v6287_v33 = vpop.xlane.xlu0 %6286 }
 0xf15   : > { %v6295_v7 = vsub.f32 %v6269_v13, %v6287_v33  ;;  %v6284_v6 = vpop.xlane.xlu1 %6283 }
 0xf16   : > { %v6294_v5 = vsub.f32 %v6264_v12, %v6284_v6 }
 0xf17   : > { %v6300_v3 = vmul.f32 1.442695, %v6295_v7 }
 0xf18   : > { %v6298_v32 = vmul.f32 1.442695, %v6294_v5  ;;  %v6293_v63 = vpop.xlane.xlu0 %6292 }
 0xf19   : > { %8864 = vpow2.f32 %v6300_v3  ;;  %v6297_v36 = vsub.f32 %v6279_v37, %v6293_v63  ;;  %v6290_v35 = vpop.xlane.xlu1 %6289 }
 0xf1a   : > { %8866 = vpow2.f32 %v6298_v32  ;;  %v6296_v18 = vsub.f32 %v6274_v46, %v6290_v35 }
 0xf1b   : > { %v6304_v0 = vmul.f32 1.442695, %v6297_v36 }
 0xf1c   : > { %v6302_v53 = vmul.f32 1.442695, %v6296_v18 }
 0xf1d   : > { %8868 = vpow2.f32 %v6304_v0 }
 0xf1e   : > { %8870 = vpow2.f32 %v6302_v53 }
 0xf23   : > { %v8865_v49 = vpop.eup %8864 }
 0xf24   : > { %v8867_v29 = vpop.eup %8866  ;;  %v6309_v41 = vsel %vm282_vm0, %v8865_v49, 0.0 }
 0xf25   : > { %6310 = vadd.xlane.f32.xlu0 %v6309_v41  ;;  %v6306_v34 = vsel %vm282_vm0, %v8867_v29, 0.0 }
 0xf26   : > { %6307 = vadd.xlane.f32.xlu1 %v6306_v34 }
 0xf27   : > { %v8869_v23 = vpop.eup %8868 }
 0xf28   : > { %v8871_v38 = vpop.eup %8870  ;;  %v6315_v27 = vsel %vm282_vm0, %v8869_v23, 0.0 }
 0xf29   : > { %6316 = vadd.xlane.f32.xlu0 %v6315_v27  ;;  %v6312_v16 = vsel %vm282_vm0, %v8871_v38, 0.0 }
 0xf2a   : > { %6313 = vadd.xlane.f32.xlu1 %v6312_v16 }
 0xf3b   : > { %8615 = vrot.lane.b32.xlu1 %v9153_v55, %s8912_s24 }
 0xf3f   : > { %8620 = vrot.lane.b32.xlu0 %v9155_v58, %s8912_s24 }
 0xf87   : > { %v7857_v39 = vpop.f32.mrb[76].mxu1 }
 0xf88   : > { %v6041_v48 = vpop.f32.mrb[77].mxu1 }
 0xf89   : > { %7863 = vmatprep.mubr.msk.f32.mxu1 %vm522_vm2, %v6041_v48 }
 0xf8a   : > { %7864 = vmatmul.mubr.msk.f32.vlgmr.msra.gmra.mrb[72].mxu1 %vm522_vm2, %v7857_v39 }
 0xf8b   : > { %v7860_v30 = vpop.f32.mrb[78].mxu1 }
 0xf8c   : > { %v6051_v59 = vpop.f32.mrb[79].mxu1 }
 0xf8d   : > { %7866 = vmatprep.mubr.msk.f32.mxu1 %vm522_vm2, %v6051_v59 }
 0xf8e   : > { %7867 = vmatmul.mubr.msk.f32.gmra.mrb[74].mxu1 %vm522_vm2, %v7860_v30 }
 0xfb2   : > { %v6311_v51 = vpop.xlane.xlu0 %6310 }
 0xfb3   : > { %v6308_v21 = vpop.xlane.xlu1 %6307 }
 0xfb4   : > { %8872 = vrcp.f32 %v6308_v21 }
 0xfb5   : > { %8874 = vrcp.f32 %v6311_v51 }
 0xfb6   : > { %v6317_v50 = vpop.xlane.xlu0 %6316 }
 0xfb7   : > { %v6314_v55 = vpop.xlane.xlu1 %6313 }
 0xfb8   : > { %8876 = vrcp.f32 %v6314_v55 }
 0xfb9   : > { %8878 = vrcp.f32 %v6317_v50 }
 0xfba   : > { %v8621_v58 = vpop.permute.xlu0 %8620 }
 0xfbb   : > { %v8616_v13 = vpop.permute.xlu1 %8615  ;;  %v8623_v60 = vunpack.i.h.bf16 %v8621_v58  ;;  %v8622_v12 = vunpack.i.l.bf16 %v8621_v58 }
 0xfbc   : > { %v8618_v2 = vunpack.i.h.bf16 %v8616_v13  ;;  %v8617_v42 = vunpack.i.l.bf16 %v8616_v13 }
 0xfbd   : > { %v8229_v37 = vpack.c.bf16 %v8623_v60, %v8622_v12 }
 0xfbe   : > { %v8873_v45 = vpop.eup %8872  ;;  %v8225_v44 = vpack.c.bf16 %v8618_v2, %v8617_v42 }
 0xfbf   : > { %v6322_v28 = vmul.f32 %v8873_v45, %v8867_v29  ;;  %v8875_v40 = vpop.eup %8874 }
 0xfc0   : > { %8226 = vmatprep.subr.bf16.mxu0 %v8225_v44  ;;  %8233 = vmatprep.subr.bf16.mxu1 %v8225_v44  ;;  %v6323_v4 = vmul.f32 %v8875_v40, %v8865_v49 }
 0xfc1   : > { %8228 = vmatpush3.bf16.msra.mxu0 %v8225_v44  ;;  %8235 = vmatpush3.bf16.msra.mxu1 %v8225_v44 }
 0xfc2   : > { %v8877_v46 = vpop.eup %8876  ;;  %7891 = vmatprep.mubr.msk.f32.mxu0 %vm282_vm0, %v6322_v28  ;;  %8230 = vmatprep.subr.bf16.mxu0 %v8229_v37 }
 0xfc3   : > { %v8879_v57 = vpop.eup %8878  ;;  %8234 = vmatprep.subr.bf16.mxu1 %v8229_v37  ;;  %v6324_v8 = vmul.f32 %v8877_v46, %v8871_v38 }
 0xfc4   : > { %v6325_v56 = vmul.f32 %v8879_v57, %v8869_v23 }
 0xfc5   : > { %8232 = vmatpush3.bf16.msra.mxu0 %v8229_v37  ;;  %8236 = vmatpush3.bf16.msra.mxu1 %v8229_v37 }
 0xfc6   : > { %7894 = vmatprep.mubr.msk.f32.mxu1 %vm282_vm0, %v6324_v8  ;;  %7897 = vmatprep.subr.mxu1 %v10336_v43 }
 0xfc8   : > { %7892 = vmatmul.mubr.msk.f32.vlgmr.msra.gmra.mrb[76].mxu0 %vm282_vm0, %v6323_v4  ;;  %7895 = vmatmul.mubr.msk.f32.vlgmr.msra.gmra.mrb[80].mxu1 %vm282_vm0, %v6325_v56 }
 0xfc9   : > { %7898 = vmatpush3.msra.mxu1 %v10336_v43 }
0x109b   : > { %v7893_v24 = vpop.f32.mrb[76].mxu0  ;;  %v7896_v11 = vpop.f32.mrb[80].mxu1 }
0x109c   : > { %v6416_v17 = vpop.f32.mrb[77].mxu0  ;;  %v6426_v1 = vpop.f32.mrb[81].mxu1 }
0x109d   : > { %7899 = vmatprep.mubr.msk.f32.mxu1 %vm522_vm2, %v6416_v17 }
0x109e   : > { %7900 = vmatmul.mubr.msk.f32.vlgmr.msra.gmra.mrb[72].mxu1 %vm522_vm2, %v7893_v24 }
0x109f   : > { %7902 = vmatprep.mubr.msk.f32.mxu1 %vm522_vm2, %v6426_v1 }
0x10a2   : > { %7903 = vmatmul.mubr.msk.f32.gmra.mrb[74].mxu1 %vm522_vm2, %v7896_v11 }
0x1171   : > { %v7901_v26 = vpop.f32.mrb[72].mxu1 }
0x1172   : > { %v6537_v54 = vadd.f32 %v10496_v10, %v7901_v26  ;;  %v6513_v25 = vpop.f32.mrb[73].mxu1 }
0x1173   : > { %v6536_v43 = vadd.f32 %v10496_v10, %v6513_v25 }
0x1174   : > { %6541 = vst.msk [vmem:[%s9748_s25 + $0x68] sm:$0xff] %vm282_vm0, %v6537_v54 }
0x1175   : > { %6540 = vst.msk [vmem:[%s9748_s25 + $0x60] sm:$0xff] %vm282_vm0, %v6536_v43  ;;  %v7904_v15 = vpop.f32.mrb[74].mxu1 }
0x1176   : > { %v6539_v14 = vadd.f32 %v10496_v10, %v7904_v15  ;;  %v6523_v22 = vpop.f32.mrb[75].mxu1 }
0x1177   : > { %v6538_v62 = vadd.f32 %v10496_v10, %v6523_v22 }
0x1178   : > { %6543 = vst.msk [vmem:[%s9748_s25 + $0x78] sm:$0xff] %vm282_vm0, %v6539_v14 }
0x1179   : > { %6542 = vst.msk [vmem:[%s9748_s25 + $0x70] sm:$0xff] %vm282_vm0, %v6538_v62 }
0x117a PF: > { %s16_s21 = sadd.s32 1, %s8900_s21  }
0x117b   : > { %p13_p4 = scmp.ge.s32.totalorder %s16_s21, 4  }
0x117d   :  { %15 = sbr.rel (!%p13_p4) target bundleno = 1 (0x1), region = 81 }

</bundles_post_ra>
